<compile_context>
chip_gen: v7x
topology: tpu7x:2x2x1
jax: 0.10.0
libtpu: 0.0.40
codegen_flags: <defaults>
</compile_context>

<pallas_src>
import functools

import jax
import jax.numpy as jnp
from jax.experimental import pallas as pl
from jax.experimental.pallas import tpu as pltpu

# ----------------------------- model config (BCQ defaults) -------------------
STATE_DIM = 11
ACTION_DIM = 3
LATENT_DIM = 6
HIDDEN_VAE = (750, 750)   # [h0, h1]; decoder is (S+L) -> h1 -> h0 -> A
HIDDEN_Q = (400, 300)
PHI = 0.05
N_SAMPLES = 10

# Critic fusion: each critic's first-layer output occupies a CRIT_PAD-lane slab
# (400 real lanes + zero padding) so slicing the fused hidden is tile-aligned.
CRIT_PAD = ((HIDDEN_Q[0] + 127) // 128) * 128      # 512
OUT_W = ACTION_DIM + 1                              # packed output: [action | q]
ROW_BLOCK = 256                                     # <=512 keeps v7x VMEM happy


def _round_up(x, m):
    return ((x + m - 1) // m) * m


# --------------------------------- kernel ------------------------------------
def _bcq_kernel(phi,
                sz_ref,
                wd1, bd1, wd2, bd2, wd3, bd3,                # VAE decoder
                wa1s, wa1a, ba1, wa2, ba2, wa3, ba3,         # Actor_disturb
                wc1s, wc1a, bc1, w12, b12, w22, b22,         # fused critics L1/L2
                w13, b13, w23, b23,                          # critic heads
                out_ref):
    f32 = jnp.float32
    bf16 = jnp.bfloat16

    def dot(a, w_ref):
        # bf16 x bf16 matmul on the MXU, f32 accumulation.
        return jnp.dot(a.astype(bf16), w_ref[...], preferred_element_type=f32)

    sz = sz_ref[...]                      # (rows, S + L) f32
    s = sz[:, :STATE_DIM]                 # (rows, S)

    # ---- VAE decoder: tanh(MLP(cat([s, z]))) — single combined first layer ----
    h = jnp.maximum(dot(sz, wd1) + bd1[...], 0.0)
    h = jnp.maximum(dot(h, wd2) + bd2[...], 0.0)
    a_vae = jnp.tanh(dot(h, wd3) + bd3[...])

    # ---- Actor disturbance: clamp(phi * tanh(MLP(cat([s, a]))) + a, -1, 1) -----
    h = jnp.maximum(dot(s, wa1s) + dot(a_vae, wa1a) + ba1[...], 0.0)
    h = jnp.maximum(dot(h, wa2) + ba2[...], 0.0)
    pert = jnp.tanh(dot(h, wa3) + ba3[...])
    actions = jnp.clip(phi * pert + a_vae, -1.0, 1.0)

    # ---- Fused critics: Q1 in lanes [0, CRIT_PAD), Q2 in [CRIT_PAD, 2*CRIT_PAD) -
    hc = jnp.maximum(dot(s, wc1s) + dot(actions, wc1a) + bc1[...], 0.0)
    h1 = jnp.maximum(dot(hc[:, :CRIT_PAD], w12) + b12[...], 0.0)
    h2 = jnp.maximum(dot(hc[:, CRIT_PAD:], w22) + b22[...], 0.0)
    q1 = dot(h1, w13) + b13[...]
    q2 = dot(h2, w23) + b23[...]
    q = jnp.minimum(q1, q2)

    # Packed lane-dense output: [actions(3) | q(1)]  -> single writeback DMA.
    out_ref[...] = jnp.concatenate([actions, q], axis=-1)


def bcq_pallas(sz, params, *, row_block=ROW_BLOCK):
    """Run the fused BCQ candidate-evaluation kernel.

    sz: (N, STATE_DIM + LATENT_DIM) with N = batch * n_samples
    returns (actions (N, ACTION_DIM), Q_min (N, 1))
    """
    n = sz.shape[0]
    block = min(row_block, _round_up(n, 8))
    n_pad = _round_up(n, block)
    if n_pad != n:
        sz = jnp.pad(sz, ((0, n_pad - n), (0, 0)))

    in_specs = ([pl.BlockSpec((block, sz.shape[1]), lambda i: (i, 0))] +
                [pl.BlockSpec(p.shape, lambda i: (0, 0)) for p in params])

    kernel = functools.partial(_bcq_kernel, PHI)
    out = pl.pallas_call(
        kernel,
        out_shape=jax.ShapeDtypeStruct((n_pad, OUT_W), jnp.float32),
        grid_spec=pltpu.PrefetchScalarGridSpec(
            num_scalar_prefetch=0,
            grid=(n_pad // block,),
            in_specs=in_specs,
            out_specs=pl.BlockSpec((block, OUT_W), lambda i: (i, 0)),
        ),
        compiler_params=pltpu.CompilerParams(
            dimension_semantics=("parallel",),
            # Actual footprint is ~2 MiB of bf16 weights + a few MiB of
            # activations per 256-row tile; stay well below v7x's 64 MiB.
            vmem_limit_bytes=32 << 20),
    )(sz, *params)

    actions = out[:n, :ACTION_DIM]
    q = out[:n, ACTION_DIM:ACTION_DIM + 1]
    return actions, q


# --------------------------- parameter initialization -------------------------
def _init_linear(key, fan_in, fan_out):
    """Deterministic PyTorch-Linear-style init; weight stored as (in, out)."""
    kw, kb = jax.random.split(key)
    bound = 1.0 / float(fan_in) ** 0.5
    w = jax.random.uniform(kw, (fan_in, fan_out), jnp.float32, -bound, bound)
    b = jax.random.uniform(kb, (1, fan_out), jnp.float32, -bound, bound)
    return w, b


def init_bcq_params(key):
    """Raw (PyTorch-layout) parameters of the three BCQ networks."""
    keys = jax.random.split(key, 12)
    hv0, hv1 = HIDDEN_VAE
    hq0, hq1 = HIDDEN_Q
    p = {}
    # VAE decoder: (S + L) -> hv1 -> hv0 -> A
    p["wd1"], p["bd1"] = _init_linear(keys[0], STATE_DIM + LATENT_DIM, hv1)
    p["wd2"], p["bd2"] = _init_linear(keys[1], hv1, hv0)
    p["wd3"], p["bd3"] = _init_linear(keys[2], hv0, ACTION_DIM)
    # Actor_disturb: (S + A) -> hq0 -> hq1 -> A
    p["wa1"], p["ba1"] = _init_linear(keys[3], STATE_DIM + ACTION_DIM, hq0)
    p["wa2"], p["ba2"] = _init_linear(keys[4], hq0, hq1)
    p["wa3"], p["ba3"] = _init_linear(keys[5], hq1, ACTION_DIM)
    # Critic Q1 / Q2
    p["w11"], p["b11"] = _init_linear(keys[6], STATE_DIM + ACTION_DIM, hq0)
    p["w12"], p["b12"] = _init_linear(keys[7], hq0, hq1)
    p["w13"], p["b13"] = _init_linear(keys[8], hq1, 1)
    p["w21"], p["b21"] = _init_linear(keys[9], STATE_DIM + ACTION_DIM, hq0)
    p["w22"], p["b22"] = _init_linear(keys[10], hq0, hq1)
    p["w23"], p["b23"] = _init_linear(keys[11], hq1, 1)
    return p


def prepare_kernel_params(p):
    """Fuse / pad / cast the raw params into the kernel's layout.

    Weights -> bfloat16 (f32 accumulation in-kernel); biases stay f32.
    Critic Q1/Q2 first layers are concatenated along the output axis, each
    padded to CRIT_PAD lanes; second layers get matching zero rows so the
    padded lanes contribute exactly zero (numerically identical modulo bf16).
    """
    bf = jnp.bfloat16

    def pad_cols(w, total):
        return jnp.pad(w, ((0, 0), (0, total - w.shape[1])))

    def pad_rows(w, total):
        return jnp.pad(w, ((0, total - w.shape[0]), (0, 0)))

    # VAE decoder (combined [s|z] first layer).
    wd1 = p["wd1"].astype(bf)
    wd2 = p["wd2"].astype(bf)
    wd3 = p["wd3"].astype(bf)

    # Actor: first layer split into state / action slabs (split matmul).
    wa1s = p["wa1"][:STATE_DIM].astype(bf)
    wa1a = p["wa1"][STATE_DIM:].astype(bf)
    wa2 = p["wa2"].astype(bf)
    wa3 = p["wa3"].astype(bf)

    # Fused critics.
    wc1s = jnp.concatenate([pad_cols(p["w11"][:STATE_DIM], CRIT_PAD),
                            pad_cols(p["w21"][:STATE_DIM], CRIT_PAD)],
                           axis=1).astype(bf)
    wc1a = jnp.concatenate([pad_cols(p["w11"][STATE_DIM:], CRIT_PAD),
                            pad_cols(p["w21"][STATE_DIM:], CRIT_PAD)],
                           axis=1).astype(bf)
    bc1 = jnp.concatenate([pad_cols(p["b11"], CRIT_PAD),
                           pad_cols(p["b21"], CRIT_PAD)], axis=1)
    w12 = pad_rows(p["w12"], CRIT_PAD).astype(bf)
    w22 = pad_rows(p["w22"], CRIT_PAD).astype(bf)
    w13 = p["w13"].astype(bf)
    w23 = p["w23"].astype(bf)

    return (wd1, p["bd1"], wd2, p["bd2"], wd3, p["bd3"],
            wa1s, wa1a, p["ba1"], wa2, p["ba2"], wa3, p["ba3"],
            wc1s, wc1a, bc1, w12, p["b12"], w22, p["b22"],
            w13, p["b13"], w23, p["b23"])


# ------------------------------- BCQ.forward ----------------------------------
def bcq_forward(states, kernel_params, noise_key):
    """Mirrors BCQ.forward(states): repeat-interleave, sample, perturb, argmax-Q."""
    flat = states.reshape(-1, STATE_DIM)
    bs = flat.shape[0]
    batch_states = jnp.repeat(flat, N_SAMPLES, axis=0)          # repeat_interleave(n, 0)
    # VAE.call_samples noise: randn clamped to [-0.5, 0.5]
    z = jnp.clip(
        jax.random.normal(noise_key, (bs * N_SAMPLES, LATENT_DIM), jnp.float32),
        -0.5, 0.5)
    sz = jnp.concatenate([batch_states, z], axis=1)              # (N, S + L)

    actions, q = bcq_pallas(sz, kernel_params)

    # argmax over the n_samples candidates per original state + gather best action
    idx = jnp.argmax(q.reshape(bs, N_SAMPLES), axis=1)
    acts = actions.reshape(bs, N_SAMPLES, ACTION_DIM)
    best = jnp.take_along_axis(acts, idx[:, None, None], axis=1)  # (bs, 1, A)
    return jnp.squeeze(best)                                       # matches torch .squeeze()


# ----------------------------------- main --------------------------------------
if __name__ == "__main__":
    key = jax.random.PRNGKey(0)
    k_states, k_params, k_noise = jax.random.split(key, 3)

    batch = 2
    states = jax.random.normal(k_states, (batch, STATE_DIM), jnp.float32)
    raw_params = init_bcq_params(k_params)
    params = prepare_kernel_params(raw_params)

    fwd = jax.jit(bcq_forward)
    out = fwd(states, params, k_noise)
    out = jax.block_until_ready(out)

    assert out.shape == (batch, ACTION_DIM), out.shape
    assert bool(jnp.all(jnp.isfinite(out)))
    assert bool(jnp.all(jnp.abs(out) <= 1.0 + 1e-6))
    print("KERNEL_OK")
</pallas_src>

<mosaic_0001>
module attributes {stable_mosaic.version = 11 : i64} {
  func.func @_bcq_kernel(%arg0: i32, %arg1: memref<24x17xf32, #tpu.memory_space<vmem>>, %arg2: memref<17x750xbf16, #tpu.memory_space<vmem>>, %arg3: memref<1x750xf32, #tpu.memory_space<vmem>>, %arg4: memref<750x750xbf16, #tpu.memory_space<vmem>>, %arg5: memref<1x750xf32, #tpu.memory_space<vmem>>, %arg6: memref<750x3xbf16, #tpu.memory_space<vmem>>, %arg7: memref<1x3xf32, #tpu.memory_space<vmem>>, %arg8: memref<11x400xbf16, #tpu.memory_space<vmem>>, %arg9: memref<3x400xbf16, #tpu.memory_space<vmem>>, %arg10: memref<1x400xf32, #tpu.memory_space<vmem>>, %arg11: memref<400x300xbf16, #tpu.memory_space<vmem>>, %arg12: memref<1x300xf32, #tpu.memory_space<vmem>>, %arg13: memref<300x3xbf16, #tpu.memory_space<vmem>>, %arg14: memref<1x3xf32, #tpu.memory_space<vmem>>, %arg15: memref<11x1024xbf16, #tpu.memory_space<vmem>>, %arg16: memref<3x1024xbf16, #tpu.memory_space<vmem>>, %arg17: memref<1x1024xf32, #tpu.memory_space<vmem>>, %arg18: memref<512x300xbf16, #tpu.memory_space<vmem>>, %arg19: memref<1x300xf32, #tpu.memory_space<vmem>>, %arg20: memref<512x300xbf16, #tpu.memory_space<vmem>>, %arg21: memref<1x300xf32, #tpu.memory_space<vmem>>, %arg22: memref<300x1xbf16, #tpu.memory_space<vmem>>, %arg23: memref<1x1xf32, #tpu.memory_space<vmem>>, %arg24: memref<300x1xbf16, #tpu.memory_space<vmem>>, %arg25: memref<1x1xf32, #tpu.memory_space<vmem>>, %arg26: memref<24x4xf32, #tpu.memory_space<vmem>>) attributes {dimension_semantics = [#tpu.dimension_semantics<parallel>], iteration_bounds = array<i64: 1>, scalar_prefetch = 0 : i64, scratch_operands = 0 : i64, tpu.core_type = #tpu.core_type<tc>, window_params = [{transform_indices = @transform_0, window_bounds = array<i64: 24, 17>}, {pipeline_mode = #tpu.pipeline_mode<synchronous>, transform_indices = @transform_1, window_bounds = array<i64: 17, 750>}, {pipeline_mode = #tpu.pipeline_mode<synchronous>, transform_indices = @transform_2, window_bounds = array<i64: 1, 750>}, {pipeline_mode = #tpu.pipeline_mode<synchronous>, transform_indices = @transform_3, window_bounds = array<i64: 750, 750>}, {pipeline_mode = #tpu.pipeline_mode<synchronous>, transform_indices = @transform_4, window_bounds = array<i64: 1, 750>}, {pipeline_mode = #tpu.pipeline_mode<synchronous>, transform_indices = @transform_5, window_bounds = array<i64: 750, 3>}, {pipeline_mode = #tpu.pipeline_mode<synchronous>, transform_indices = @transform_6, window_bounds = array<i64: 1, 3>}, {pipeline_mode = #tpu.pipeline_mode<synchronous>, transform_indices = @transform_7, window_bounds = array<i64: 11, 400>}, {pipeline_mode = #tpu.pipeline_mode<synchronous>, transform_indices = @transform_8, window_bounds = array<i64: 3, 400>}, {pipeline_mode = #tpu.pipeline_mode<synchronous>, transform_indices = @transform_9, window_bounds = array<i64: 1, 400>}, {pipeline_mode = #tpu.pipeline_mode<synchronous>, transform_indices = @transform_10, window_bounds = array<i64: 400, 300>}, {pipeline_mode = #tpu.pipeline_mode<synchronous>, transform_indices = @transform_11, window_bounds = array<i64: 1, 300>}, {pipeline_mode = #tpu.pipeline_mode<synchronous>, transform_indices = @transform_12, window_bounds = array<i64: 300, 3>}, {pipeline_mode = #tpu.pipeline_mode<synchronous>, transform_indices = @transform_13, window_bounds = array<i64: 1, 3>}, {pipeline_mode = #tpu.pipeline_mode<synchronous>, transform_indices = @transform_14, window_bounds = array<i64: 11, 1024>}, {pipeline_mode = #tpu.pipeline_mode<synchronous>, transform_indices = @transform_15, window_bounds = array<i64: 3, 1024>}, {pipeline_mode = #tpu.pipeline_mode<synchronous>, transform_indices = @transform_16, window_bounds = array<i64: 1, 1024>}, {pipeline_mode = #tpu.pipeline_mode<synchronous>, transform_indices = @transform_17, window_bounds = array<i64: 512, 300>}, {pipeline_mode = #tpu.pipeline_mode<synchronous>, transform_indices = @transform_18, window_bounds = array<i64: 1, 300>}, {pipeline_mode = #tpu.pipeline_mode<synchronous>, transform_indices = @transform_19, window_bounds = array<i64: 512, 300>}, {pipeline_mode = #tpu.pipeline_mode<synchronous>, transform_indices = @transform_20, window_bounds = array<i64: 1, 300>}, {pipeline_mode = #tpu.pipeline_mode<synchronous>, transform_indices = @transform_21, window_bounds = array<i64: 300, 1>}, {pipeline_mode = #tpu.pipeline_mode<synchronous>, transform_indices = @transform_22, window_bounds = array<i64: 1, 1>}, {pipeline_mode = #tpu.pipeline_mode<synchronous>, transform_indices = @transform_23, window_bounds = array<i64: 300, 1>}, {pipeline_mode = #tpu.pipeline_mode<synchronous>, transform_indices = @transform_24, window_bounds = array<i64: 1, 1>}, {transform_indices = @transform_25, window_bounds = array<i64: 24, 4>}]} {
    %c0 = arith.constant 0 : index
    %c0_0 = arith.constant 0 : index
    %0 = vector.load %arg1[%c0, %c0_0] : memref<24x17xf32, #tpu.memory_space<vmem>>, vector<24x17xf32>
    %1 = vector.extract_strided_slice %0 {offsets = [0, 0], sizes = [24, 11], strides = [1, 1]} : vector<24x17xf32> to vector<24x11xf32>
    %2 = arith.truncf %0 : vector<24x17xf32> to vector<24x17xbf16>
    %c0_1 = arith.constant 0 : index
    %c0_2 = arith.constant 0 : index
    %3 = vector.load %arg2[%c0_1, %c0_2] : memref<17x750xbf16, #tpu.memory_space<vmem>>, vector<17x750xbf16>
    %cst = arith.constant dense<0.000000e+00> : vector<24x750xf32>
    %4 = tpu.matmul %2, %3, %cst {dimension_numbers = #tpu.dot_dimension_numbers<[1], [0], [0], [1], [0, 0, 1, 1], [], []>} : vector<24x17xbf16>, vector<17x750xbf16>, vector<24x750xf32> -> vector<24x750xf32>
    %c0_3 = arith.constant 0 : index
    %c0_4 = arith.constant 0 : index
    %5 = vector.load %arg3[%c0_3, %c0_4] : memref<1x750xf32, #tpu.memory_space<vmem>>, vector<1x750xf32>
    %6 = vector.broadcast %5 : vector<1x750xf32> to vector<24x750xf32>
    %7 = arith.addf %4, %6 : vector<24x750xf32>
    %cst_5 = arith.constant 0.000000e+00 : f32
    %8 = vector.broadcast %cst_5 : f32 to vector<24x750xf32>
    %9 = arith.maximumf %7, %8 : vector<24x750xf32>
    %10 = arith.truncf %9 : vector<24x750xf32> to vector<24x750xbf16>
    %c0_6 = arith.constant 0 : index
    %c0_7 = arith.constant 0 : index
    %11 = vector.load %arg4[%c0_6, %c0_7] : memref<750x750xbf16, #tpu.memory_space<vmem>>, vector<750x750xbf16>
    %cst_8 = arith.constant dense<0.000000e+00> : vector<24x750xf32>
    %12 = tpu.matmul %10, %11, %cst_8 {dimension_numbers = #tpu.dot_dimension_numbers<[1], [0], [0], [1], [0, 0, 1, 1], [], []>} : vector<24x750xbf16>, vector<750x750xbf16>, vector<24x750xf32> -> vector<24x750xf32>
    %c0_9 = arith.constant 0 : index
    %c0_10 = arith.constant 0 : index
    %13 = vector.load %arg5[%c0_9, %c0_10] : memref<1x750xf32, #tpu.memory_space<vmem>>, vector<1x750xf32>
    %14 = vector.broadcast %13 : vector<1x750xf32> to vector<24x750xf32>
    %15 = arith.addf %12, %14 : vector<24x750xf32>
    %cst_11 = arith.constant 0.000000e+00 : f32
    %16 = vector.broadcast %cst_11 : f32 to vector<24x750xf32>
    %17 = arith.maximumf %15, %16 : vector<24x750xf32>
    %18 = arith.truncf %17 : vector<24x750xf32> to vector<24x750xbf16>
    %c0_12 = arith.constant 0 : index
    %c0_13 = arith.constant 0 : index
    %19 = vector.load %arg6[%c0_12, %c0_13] : memref<750x3xbf16, #tpu.memory_space<vmem>>, vector<750x3xbf16>
    %cst_14 = arith.constant dense<0.000000e+00> : vector<24x3xf32>
    %20 = tpu.matmul %18, %19, %cst_14 {dimension_numbers = #tpu.dot_dimension_numbers<[1], [0], [0], [1], [0, 0, 1, 1], [], []>} : vector<24x750xbf16>, vector<750x3xbf16>, vector<24x3xf32> -> vector<24x3xf32>
    %c0_15 = arith.constant 0 : index
    %c0_16 = arith.constant 0 : index
    %21 = vector.load %arg7[%c0_15, %c0_16] : memref<1x3xf32, #tpu.memory_space<vmem>>, vector<1x3xf32>
    %22 = vector.broadcast %21 : vector<1x3xf32> to vector<24x3xf32>
    %23 = arith.addf %20, %22 : vector<24x3xf32>
    %24 = math.tanh %23 : vector<24x3xf32>
    %25 = arith.truncf %1 : vector<24x11xf32> to vector<24x11xbf16>
    %c0_17 = arith.constant 0 : index
    %c0_18 = arith.constant 0 : index
    %26 = vector.load %arg8[%c0_17, %c0_18] : memref<11x400xbf16, #tpu.memory_space<vmem>>, vector<11x400xbf16>
    %cst_19 = arith.constant dense<0.000000e+00> : vector<24x400xf32>
    %27 = tpu.matmul %25, %26, %cst_19 {dimension_numbers = #tpu.dot_dimension_numbers<[1], [0], [0], [1], [0, 0, 1, 1], [], []>} : vector<24x11xbf16>, vector<11x400xbf16>, vector<24x400xf32> -> vector<24x400xf32>
    %28 = arith.truncf %24 : vector<24x3xf32> to vector<24x3xbf16>
    %c0_20 = arith.constant 0 : index
    %c0_21 = arith.constant 0 : index
    %29 = vector.load %arg9[%c0_20, %c0_21] : memref<3x400xbf16, #tpu.memory_space<vmem>>, vector<3x400xbf16>
    %cst_22 = arith.constant dense<0.000000e+00> : vector<24x400xf32>
    %30 = tpu.matmul %28, %29, %cst_22 {dimension_numbers = #tpu.dot_dimension_numbers<[1], [0], [0], [1], [0, 0, 1, 1], [], []>} : vector<24x3xbf16>, vector<3x400xbf16>, vector<24x400xf32> -> vector<24x400xf32>
    %31 = arith.addf %27, %30 : vector<24x400xf32>
    %c0_23 = arith.constant 0 : index
    %c0_24 = arith.constant 0 : index
    %32 = vector.load %arg10[%c0_23, %c0_24] : memref<1x400xf32, #tpu.memory_space<vmem>>, vector<1x400xf32>
    %33 = vector.broadcast %32 : vector<1x400xf32> to vector<24x400xf32>
    %34 = arith.addf %31, %33 : vector<24x400xf32>
    %cst_25 = arith.constant 0.000000e+00 : f32
    %35 = vector.broadcast %cst_25 : f32 to vector<24x400xf32>
    %36 = arith.maximumf %34, %35 : vector<24x400xf32>
    %37 = arith.truncf %36 : vector<24x400xf32> to vector<24x400xbf16>
    %c0_26 = arith.constant 0 : index
    %c0_27 = arith.constant 0 : index
    %38 = vector.load %arg11[%c0_26, %c0_27] : memref<400x300xbf16, #tpu.memory_space<vmem>>, vector<400x300xbf16>
    %cst_28 = arith.constant dense<0.000000e+00> : vector<24x300xf32>
    %39 = tpu.matmul %37, %38, %cst_28 {dimension_numbers = #tpu.dot_dimension_numbers<[1], [0], [0], [1], [0, 0, 1, 1], [], []>} : vector<24x400xbf16>, vector<400x300xbf16>, vector<24x300xf32> -> vector<24x300xf32>
    %c0_29 = arith.constant 0 : index
    %c0_30 = arith.constant 0 : index
    %40 = vector.load %arg12[%c0_29, %c0_30] : memref<1x300xf32, #tpu.memory_space<vmem>>, vector<1x300xf32>
    %41 = vector.broadcast %40 : vector<1x300xf32> to vector<24x300xf32>
    %42 = arith.addf %39, %41 : vector<24x300xf32>
    %cst_31 = arith.constant 0.000000e+00 : f32
    %43 = vector.broadcast %cst_31 : f32 to vector<24x300xf32>
    %44 = arith.maximumf %42, %43 : vector<24x300xf32>
    %45 = arith.truncf %44 : vector<24x300xf32> to vector<24x300xbf16>
    %c0_32 = arith.constant 0 : index
    %c0_33 = arith.constant 0 : index
    %46 = vector.load %arg13[%c0_32, %c0_33] : memref<300x3xbf16, #tpu.memory_space<vmem>>, vector<300x3xbf16>
    %cst_34 = arith.constant dense<0.000000e+00> : vector<24x3xf32>
    %47 = tpu.matmul %45, %46, %cst_34 {dimension_numbers = #tpu.dot_dimension_numbers<[1], [0], [0], [1], [0, 0, 1, 1], [], []>} : vector<24x300xbf16>, vector<300x3xbf16>, vector<24x3xf32> -> vector<24x3xf32>
    %c0_35 = arith.constant 0 : index
    %c0_36 = arith.constant 0 : index
    %48 = vector.load %arg14[%c0_35, %c0_36] : memref<1x3xf32, #tpu.memory_space<vmem>>, vector<1x3xf32>
    %49 = vector.broadcast %48 : vector<1x3xf32> to vector<24x3xf32>
    %50 = arith.addf %47, %49 : vector<24x3xf32>
    %51 = math.tanh %50 : vector<24x3xf32>
    %cst_37 = arith.constant 5.000000e-02 : f32
    %52 = vector.broadcast %cst_37 : f32 to vector<24x3xf32>
    %53 = arith.mulf %52, %51 : vector<24x3xf32>
    %54 = arith.addf %53, %24 : vector<24x3xf32>
    %cst_38 = arith.constant -1.000000e+00 : f32
    %cst_39 = arith.constant 1.000000e+00 : f32
    %55 = vector.broadcast %cst_38 : f32 to vector<24x3xf32>
    %56 = arith.maximumf %55, %54 : vector<24x3xf32>
    %57 = vector.broadcast %cst_39 : f32 to vector<24x3xf32>
    %58 = arith.minimumf %57, %56 : vector<24x3xf32>
    %59 = arith.truncf %1 : vector<24x11xf32> to vector<24x11xbf16>
    %c0_40 = arith.constant 0 : index
    %c0_41 = arith.constant 0 : index
    %60 = vector.load %arg15[%c0_40, %c0_41] : memref<11x1024xbf16, #tpu.memory_space<vmem>>, vector<11x1024xbf16>
    %cst_42 = arith.constant dense<0.000000e+00> : vector<24x1024xf32>
    %61 = tpu.matmul %59, %60, %cst_42 {dimension_numbers = #tpu.dot_dimension_numbers<[1], [0], [0], [1], [0, 0, 1, 1], [], []>} : vector<24x11xbf16>, vector<11x1024xbf16>, vector<24x1024xf32> -> vector<24x1024xf32>
    %62 = arith.truncf %58 : vector<24x3xf32> to vector<24x3xbf16>
    %c0_43 = arith.constant 0 : index
    %c0_44 = arith.constant 0 : index
    %63 = vector.load %arg16[%c0_43, %c0_44] : memref<3x1024xbf16, #tpu.memory_space<vmem>>, vector<3x1024xbf16>
    %cst_45 = arith.constant dense<0.000000e+00> : vector<24x1024xf32>
    %64 = tpu.matmul %62, %63, %cst_45 {dimension_numbers = #tpu.dot_dimension_numbers<[1], [0], [0], [1], [0, 0, 1, 1], [], []>} : vector<24x3xbf16>, vector<3x1024xbf16>, vector<24x1024xf32> -> vector<24x1024xf32>
    %65 = arith.addf %61, %64 : vector<24x1024xf32>
    %c0_46 = arith.constant 0 : index
    %c0_47 = arith.constant 0 : index
    %66 = vector.load %arg17[%c0_46, %c0_47] : memref<1x1024xf32, #tpu.memory_space<vmem>>, vector<1x1024xf32>
    %67 = vector.broadcast %66 : vector<1x1024xf32> to vector<24x1024xf32>
    %68 = arith.addf %65, %67 : vector<24x1024xf32>
    %cst_48 = arith.constant 0.000000e+00 : f32
    %69 = vector.broadcast %cst_48 : f32 to vector<24x1024xf32>
    %70 = arith.maximumf %68, %69 : vector<24x1024xf32>
    %71 = vector.extract_strided_slice %70 {offsets = [0, 0], sizes = [24, 512], strides = [1, 1]} : vector<24x1024xf32> to vector<24x512xf32>
    %72 = arith.truncf %71 : vector<24x512xf32> to vector<24x512xbf16>
    %c0_49 = arith.constant 0 : index
    %c0_50 = arith.constant 0 : index
    %73 = vector.load %arg18[%c0_49, %c0_50] : memref<512x300xbf16, #tpu.memory_space<vmem>>, vector<512x300xbf16>
    %cst_51 = arith.constant dense<0.000000e+00> : vector<24x300xf32>
    %74 = tpu.matmul %72, %73, %cst_51 {dimension_numbers = #tpu.dot_dimension_numbers<[1], [0], [0], [1], [0, 0, 1, 1], [], []>} : vector<24x512xbf16>, vector<512x300xbf16>, vector<24x300xf32> -> vector<24x300xf32>
    %c0_52 = arith.constant 0 : index
    %c0_53 = arith.constant 0 : index
    %75 = vector.load %arg19[%c0_52, %c0_53] : memref<1x300xf32, #tpu.memory_space<vmem>>, vector<1x300xf32>
    %76 = vector.broadcast %75 : vector<1x300xf32> to vector<24x300xf32>
    %77 = arith.addf %74, %76 : vector<24x300xf32>
    %cst_54 = arith.constant 0.000000e+00 : f32
    %78 = vector.broadcast %cst_54 : f32 to vector<24x300xf32>
    %79 = arith.maximumf %77, %78 : vector<24x300xf32>
    %80 = vector.extract_strided_slice %70 {offsets = [0, 512], sizes = [24, 512], strides = [1, 1]} : vector<24x1024xf32> to vector<24x512xf32>
    %81 = arith.truncf %80 : vector<24x512xf32> to vector<24x512xbf16>
    %c0_55 = arith.constant 0 : index
    %c0_56 = arith.constant 0 : index
    %82 = vector.load %arg20[%c0_55, %c0_56] : memref<512x300xbf16, #tpu.memory_space<vmem>>, vector<512x300xbf16>
    %cst_57 = arith.constant dense<0.000000e+00> : vector<24x300xf32>
    %83 = tpu.matmul %81, %82, %cst_57 {dimension_numbers = #tpu.dot_dimension_numbers<[1], [0], [0], [1], [0, 0, 1, 1], [], []>} : vector<24x512xbf16>, vector<512x300xbf16>, vector<24x300xf32> -> vector<24x300xf32>
    %c0_58 = arith.constant 0 : index
    %c0_59 = arith.constant 0 : index
    %84 = vector.load %arg21[%c0_58, %c0_59] : memref<1x300xf32, #tpu.memory_space<vmem>>, vector<1x300xf32>
    %85 = vector.broadcast %84 : vector<1x300xf32> to vector<24x300xf32>
    %86 = arith.addf %83, %85 : vector<24x300xf32>
    %cst_60 = arith.constant 0.000000e+00 : f32
    %87 = vector.broadcast %cst_60 : f32 to vector<24x300xf32>
    %88 = arith.maximumf %86, %87 : vector<24x300xf32>
    %89 = arith.truncf %79 : vector<24x300xf32> to vector<24x300xbf16>
    %c0_61 = arith.constant 0 : index
    %c0_62 = arith.constant 0 : index
    %90 = vector.load %arg22[%c0_61, %c0_62] : memref<300x1xbf16, #tpu.memory_space<vmem>>, vector<300x1xbf16>
    %cst_63 = arith.constant dense<0.000000e+00> : vector<24x1xf32>
    %91 = tpu.matmul %89, %90, %cst_63 {dimension_numbers = #tpu.dot_dimension_numbers<[1], [0], [0], [1], [0, 0, 1, 1], [], []>} : vector<24x300xbf16>, vector<300x1xbf16>, vector<24x1xf32> -> vector<24x1xf32>
    %c0_64 = arith.constant 0 : index
    %c0_65 = arith.constant 0 : index
    %92 = vector.load %arg23[%c0_64, %c0_65] : memref<1x1xf32, #tpu.memory_space<vmem>>, vector<1x1xf32>
    %93 = vector.broadcast %92 : vector<1x1xf32> to vector<24x1xf32>
    %94 = arith.addf %91, %93 : vector<24x1xf32>
    %95 = arith.truncf %88 : vector<24x300xf32> to vector<24x300xbf16>
    %c0_66 = arith.constant 0 : index
    %c0_67 = arith.constant 0 : index
    %96 = vector.load %arg24[%c0_66, %c0_67] : memref<300x1xbf16, #tpu.memory_space<vmem>>, vector<300x1xbf16>
    %cst_68 = arith.constant dense<0.000000e+00> : vector<24x1xf32>
    %97 = tpu.matmul %95, %96, %cst_68 {dimension_numbers = #tpu.dot_dimension_numbers<[1], [0], [0], [1], [0, 0, 1, 1], [], []>} : vector<24x300xbf16>, vector<300x1xbf16>, vector<24x1xf32> -> vector<24x1xf32>
    %c0_69 = arith.constant 0 : index
    %c0_70 = arith.constant 0 : index
    %98 = vector.load %arg25[%c0_69, %c0_70] : memref<1x1xf32, #tpu.memory_space<vmem>>, vector<1x1xf32>
    %99 = vector.broadcast %98 : vector<1x1xf32> to vector<24x1xf32>
    %100 = arith.addf %97, %99 : vector<24x1xf32>
    %101 = arith.minimumf %94, %100 : vector<24x1xf32>
    %102 = tpu.concatenate %58, %101 in 1 : vector<24x3xf32>, vector<24x1xf32> -> vector<24x4xf32>
    %c0_71 = arith.constant 0 : index
    %c0_72 = arith.constant 0 : index
    %103 = vector.load %arg26[%c0_71, %c0_72] : memref<24x4xf32, #tpu.memory_space<vmem>>, vector<24x4xf32>
    tpu.vector_store %arg26[%c0_71, %c0_72], %102 {strides = array<i32>} : memref<24x4xf32, #tpu.memory_space<vmem>>, vector<24x4xf32>,
    return
  }
  func.func @transform_0(%arg0: i32) -> (i32, i32) {
    %c0_i32 = arith.constant 0 : i32
    %c0_i32_0 = arith.constant 0 : i32
    return %arg0, %c0_i32 : i32, i32
  }
  func.func @transform_1(%arg0: i32) -> (i32, i32) {
    %c0_i32 = arith.constant 0 : i32
    %c0_i32_0 = arith.constant 0 : i32
    %c0_i32_1 = arith.constant 0 : i32
    return %c0_i32, %c0_i32_0 : i32, i32
  }
  func.func @transform_2(%arg0: i32) -> (i32, i32) {
    %c0_i32 = arith.constant 0 : i32
    %c0_i32_0 = arith.constant 0 : i32
    %c0_i32_1 = arith.constant 0 : i32
    return %c0_i32, %c0_i32_0 : i32, i32
  }
  func.func @transform_3(%arg0: i32) -> (i32, i32) {
    %c0_i32 = arith.constant 0 : i32
    %c0_i32_0 = arith.constant 0 : i32
    %c0_i32_1 = arith.constant 0 : i32
    return %c0_i32, %c0_i32_0 : i32, i32
  }
  func.func @transform_4(%arg0: i32) -> (i32, i32) {
    %c0_i32 = arith.constant 0 : i32
    %c0_i32_0 = arith.constant 0 : i32
    %c0_i32_1 = arith.constant 0 : i32
    return %c0_i32, %c0_i32_0 : i32, i32
  }
  func.func @transform_5(%arg0: i32) -> (i32, i32) {
    %c0_i32 = arith.constant 0 : i32
    %c0_i32_0 = arith.constant 0 : i32
    %c0_i32_1 = arith.constant 0 : i32
    return %c0_i32, %c0_i32_0 : i32, i32
  }
  func.func @transform_6(%arg0: i32) -> (i32, i32) {
    %c0_i32 = arith.constant 0 : i32
    %c0_i32_0 = arith.constant 0 : i32
    %c0_i32_1 = arith.constant 0 : i32
    return %c0_i32, %c0_i32_0 : i32, i32
  }
  func.func @transform_7(%arg0: i32) -> (i32, i32) {
    %c0_i32 = arith.constant 0 : i32
    %c0_i32_0 = arith.constant 0 : i32
    %c0_i32_1 = arith.constant 0 : i32
    return %c0_i32, %c0_i32_0 : i32, i32
  }
  func.func @transform_8(%arg0: i32) -> (i32, i32) {
    %c0_i32 = arith.constant 0 : i32
    %c0_i32_0 = arith.constant 0 : i32
    %c0_i32_1 = arith.constant 0 : i32
    return %c0_i32, %c0_i32_0 : i32, i32
  }
  func.func @transform_9(%arg0: i32) -> (i32, i32) {
    %c0_i32 = arith.constant 0 : i32
    %c0_i32_0 = arith.constant 0 : i32
    %c0_i32_1 = arith.constant 0 : i32
    return %c0_i32, %c0_i32_0 : i32, i32
  }
  func.func @transform_10(%arg0: i32) -> (i32, i32) {
    %c0_i32 = arith.constant 0 : i32
    %c0_i32_0 = arith.constant 0 : i32
    %c0_i32_1 = arith.constant 0 : i32
    return %c0_i32, %c0_i32_0 : i32, i32
  }
  func.func @transform_11(%arg0: i32) -> (i32, i32) {
    %c0_i32 = arith.constant 0 : i32
    %c0_i32_0 = arith.constant 0 : i32
    %c0_i32_1 = arith.constant 0 : i32
    return %c0_i32, %c0_i32_0 : i32, i32
  }
  func.func @transform_12(%arg0: i32) -> (i32, i32) {
    %c0_i32 = arith.constant 0 : i32
    %c0_i32_0 = arith.constant 0 : i32
    %c0_i32_1 = arith.constant 0 : i32
    return %c0_i32, %c0_i32_0 : i32, i32
  }
  func.func @transform_13(%arg0: i32) -> (i32, i32) {
    %c0_i32 = arith.constant 0 : i32
    %c0_i32_0 = arith.constant 0 : i32
    %c0_i32_1 = arith.constant 0 : i32
    return %c0_i32, %c0_i32_0 : i32, i32
  }
  func.func @transform_14(%arg0: i32) -> (i32, i32) {
    %c0_i32 = arith.constant 0 : i32
    %c0_i32_0 = arith.constant 0 : i32
    %c0_i32_1 = arith.constant 0 : i32
    return %c0_i32, %c0_i32_0 : i32, i32
  }
  func.func @transform_15(%arg0: i32) -> (i32, i32) {
    %c0_i32 = arith.constant 0 : i32
    %c0_i32_0 = arith.constant 0 : i32
    %c0_i32_1 = arith.constant 0 : i32
    return %c0_i32, %c0_i32_0 : i32, i32
  }
  func.func @transform_16(%arg0: i32) -> (i32, i32) {
    %c0_i32 = arith.constant 0 : i32
    %c0_i32_0 = arith.constant 0 : i32
    %c0_i32_1 = arith.constant 0 : i32
    return %c0_i32, %c0_i32_0 : i32, i32
  }
  func.func @transform_17(%arg0: i32) -> (i32, i32) {
    %c0_i32 = arith.constant 0 : i32
    %c0_i32_0 = arith.constant 0 : i32
    %c0_i32_1 = arith.constant 0 : i32
    return %c0_i32, %c0_i32_0 : i32, i32
  }
  func.func @transform_18(%arg0: i32) -> (i32, i32) {
    %c0_i32 = arith.constant 0 : i32
    %c0_i32_0 = arith.constant 0 : i32
    %c0_i32_1 = arith.constant 0 : i32
    return %c0_i32, %c0_i32_0 : i32, i32
  }
  func.func @transform_19(%arg0: i32) -> (i32, i32) {
    %c0_i32 = arith.constant 0 : i32
    %c0_i32_0 = arith.constant 0 : i32
    %c0_i32_1 = arith.constant 0 : i32
    return %c0_i32, %c0_i32_0 : i32, i32
  }
  func.func @transform_20(%arg0: i32) -> (i32, i32) {
    %c0_i32 = arith.constant 0 : i32
    %c0_i32_0 = arith.constant 0 : i32
    %c0_i32_1 = arith.constant 0 : i32
    return %c0_i32, %c0_i32_0 : i32, i32
  }
  func.func @transform_21(%arg0: i32) -> (i32, i32) {
    %c0_i32 = arith.constant 0 : i32
    %c0_i32_0 = arith.constant 0 : i32
    %c0_i32_1 = arith.constant 0 : i32
    return %c0_i32, %c0_i32_0 : i32, i32
  }
  func.func @transform_22(%arg0: i32) -> (i32, i32) {
    %c0_i32 = arith.constant 0 : i32
    %c0_i32_0 = arith.constant 0 : i32
    %c0_i32_1 = arith.constant 0 : i32
    return %c0_i32, %c0_i32_0 : i32, i32
  }
  func.func @transform_23(%arg0: i32) -> (i32, i32) {
    %c0_i32 = arith.constant 0 : i32
    %c0_i32_0 = arith.constant 0 : i32
    %c0_i32_1 = arith.constant 0 : i32
    return %c0_i32, %c0_i32_0 : i32, i32
  }
  func.func @transform_24(%arg0: i32) -> (i32, i32) {
    %c0_i32 = arith.constant 0 : i32
    %c0_i32_0 = arith.constant 0 : i32
    %c0_i32_1 = arith.constant 0 : i32
    return %c0_i32, %c0_i32_0 : i32, i32
  }
  func.func @transform_25(%arg0: i32) -> (i32, i32) {
    %c0_i32 = arith.constant 0 : i32
    %c0_i32_0 = arith.constant 0 : i32
    return %arg0, %c0_i32 : i32, i32
  }
}

</mosaic_0001>

<bundles_post_ra>
// kernel: bcq_forward.1
= control target key start
LH: loop header
LB: loop body
LE: loop exit
PB: predicated region body
PF: predicated region fallthrough
CT: control target
= control target key end

     0   :  { %vm183_vm0 = vcmask 1040384   ;;  %v9578_v1 = vmov 0   ;;  %vm176_vm1 = vcmask 138240   ;;  %vm2105_vm2 = vcmask 900096   ;;  %s12310_s1 = inlined_call_operand.vmem [shape: bf16[17,750], index: 1, kind: input, shape index: {}]   ;;  %s12311_s0 = inlined_call_operand.vmem [shape: f32[24,17], index: 0, kind: input, shape index: {}]   ;;  %s12312_s3 = inlined_call_operand.vmem [shape: bf16[750,750], index: 3, kind: input, shape index: {}]   ;;  %s12313_s2 = inlined_call_operand.vmem [shape: f32[1,750], index: 2, kind: input, shape index: {}]   ;;  %s12314_s5 = inlined_call_operand.vmem [shape: bf16[750,3], index: 5, kind: input, shape index: {}]   ;;  %s12315_s4 = inlined_call_operand.vmem [shape: f32[1,750], index: 4, kind: input, shape index: {}]   ;;  %s12316_s6 = inlined_call_operand.vmem [shape: f32[1,3], index: 6, kind: input, shape index: {}]   ;;  %s12317_s8 = inlined_call_operand.vmem [shape: bf16[3,400], index: 8, kind: input, shape index: {}]   ;;  %s12318_s7 = inlined_call_operand.vmem [shape: bf16[11,400], index: 7, kind: input, shape index: {}]   ;;  %s12319_s10 = inlined_call_operand.vmem [shape: bf16[400,300], index: 10, kind: input, shape index: {}]   ;;  %s12320_s9 = inlined_call_operand.vmem [shape: f32[1,400], index: 9, kind: input, shape index: {}]   ;;  %s12321_s12 = inlined_call_operand.vmem [shape: bf16[300,3], index: 12, kind: input, shape index: {}]   ;;  %s12322_s11 = inlined_call_operand.vmem [shape: f32[1,300], index: 11, kind: input, shape index: {}]   ;;  %s12323_s15 = inlined_call_operand.vmem [shape: bf16[3,1024], index: 15, kind: input, shape index: {}]   ;;  %s12324_s17 = inlined_call_operand.vmem [shape: bf16[512,300], index: 17, kind: input, shape index: {}]   ;;  %s12325_s13 = inlined_call_operand.vmem [shape: f32[1,3], index: 13, kind: input, shape index: {}]   ;;  %s12326_s14 = inlined_call_operand.vmem [shape: bf16[11,1024], index: 14, kind: input, shape index: {}]   ;;  %s12327_s19 = inlined_call_operand.vmem [shape: bf16[512,300], index: 19, kind: input, shape index: {}]   ;;  %s12328_s16 = inlined_call_operand.vmem [shape: f32[1,1024], index: 16, kind: input, shape index: {}]   ;;  %s12329_s21 = inlined_call_operand.vmem [shape: bf16[300,1], index: 21, kind: input, shape index: {}]   ;;  %s12330_s23 = inlined_call_operand.vmem [shape: bf16[300,1], index: 23, kind: input, shape index: {}]   ;;  %s12331_s18 = inlined_call_operand.vmem [shape: f32[1,300], index: 18, kind: input, shape index: {}]   ;;  %s12332_s20 = inlined_call_operand.vmem [shape: f32[1,300], index: 20, kind: input, shape index: {}]   ;;  %s12333_s22 = inlined_call_operand.<no memory space> [shape: f32[1,1], index: 22, kind: input, shape index: {}]   ;;  %s12334_s24 = inlined_call_operand.<no memory space> [shape: f32[1,1], index: 24, kind: input, shape index: {}]   ;;  %s12335_s25 = inlined_call_operand.vmem [shape: f32[24,4], index: 25, kind: output, shape index: {}]  }
   0x1   :  { %12342 = sst [smem:[#allocation4_spill]] %s12310_s1  ;;  %236 = vmatprep.mubr.bf16.mxu0 %v9578_v1  ;;  %246 = vmatprep.mubr.bf16.mxu1 %v9578_v1  ;;  %v185_v4 = vsel %vm183_vm0, 65535, %v9578_v1  ;;  %vm2112_vm3 = vcmask 1046528   ;;  %vm3190_vm4 = vcmask 1041408   ;;  %vm3328_vm5 = vcmask 1044480  }
   0x2   :  { %12343 = sst [smem:[#allocation5_spill]] %s12311_s0  ;;  %vm3329_vm6 = vcmask 1045504   ;;  %vm3183_vm7 = vcmask 23552   ;;  %vm3323_vm8 = vcmask 89088   ;;  %vm4017_vm9 = vcmask 130048  }
   0x3   :  { %12344 = sst [smem:[#allocation6_spill]] %s12312_s3  ;;  %s12353_s27 = sld [smem:[#allocation5_spill]]  ;;  %vm4395_vm10 = vcmask 359424   ;;  %vm7448_vm11 = vcmask 31744  }
   0x4   :  { %12345 = sst [smem:[#allocation7_spill]] %s12313_s2 }
   0x5   :  { %12346 = sst [smem:[#allocation8_spill]] %s12314_s5  ;;  %s12355_s26 = sld [smem:[#allocation7_spill]] }
   0x6   :  { %12347 = sst [smem:[#allocation9_spill]] %s12315_s4  ;;  %s12356_s4 = sld [smem:[#allocation8_spill]] }
   0x7   :  { %12348 = sst [smem:[#allocation10_spill]] %s12316_s6  ;;  %s12352_s6 = sld [smem:[#allocation4_spill]] }
   0x8   :  { %12349 = sst [smem:[#allocation11_spill]] %s12317_s8  ;;  %s12357_s28 = sld [smem:[#allocation9_spill]] }
   0x9   :  { %12350 = sst [smem:[#allocation12_spill]] %s12318_s7  ;;  %v85_v7 = vld [vmem:[%s12353_s27] sm:$0xff]  ;;  %v86_v8 = vld [vmem:[%s12353_s27 + $0x8] sm:$0xff]  ;;  %v87_v9 = vld [vmem:[%s12353_s27 + $0x10] sm:$0xff]  ;;  %s12358_s30 = sld [smem:[#allocation10_spill]] }
   0xa   :  { %12351 = sst [smem:[#allocation13_spill]] %s12319_s10  ;;  %v9743_v16 = vpack.c.bf16 %v86_v8, %v85_v7  ;;  %v9745_v17 = vpack.c.bf16 %v87_v9, %v87_v9  ;;  %s12361_s1 = sld [smem:[#allocation12_spill]] }
   0xb   :  { %s12360_s27 = sld [smem:[#allocation13_spill]] }
   0xd   :  { %v8659_v0 = vld [vmem:[%s12352_s6 + $0x4] ss:$24 sps:$4 sm:$0xff]   ;;  %v8661_v2 = vld [vmem:[%s12352_s6] ss:$24 sps:$4 sm:$0xff]   ;;  %v96_v3 = vld [vmem:[%s12352_s6 + $0x30] sm:$0x11] }
   0xe   :  { %204 = vmatprep.subr.bf16.mxu0 %v8659_v0  ;;  %v7463_v5 = vcombine.high %v96_v3, %v96_v3  ;;  %v7462_v6 = vcombine.low %v96_v3, %v96_v3  ;;  %8516 = vmatprep.subr.bf16.mxu1 %v8659_v0  ;;  %v8666_v12 = vld [vmem:[%s12352_s6 + $0xc] ss:$24 sps:$4 sm:$0xff]   ;;  %v97_v13 = vld [vmem:[%s12352_s6 + $0x38] sm:$0x11]  ;;  %v8664_v19 = vld [vmem:[%s12352_s6 + $0x8] ss:$24 sps:$4 sm:$0xff]  }
   0xf   :  { %205 = vmatpush1.bf16.msra.mxu0 %v8661_v2  ;;  %8518 = vmatpush1.bf16.msra.mxu1 %v8661_v2  ;;  %v7465_v14 = vcombine.high %v97_v13, %v97_v13  ;;  %v8671_v15 = vld [vmem:[%s12352_s6 + $0x14] ss:$24 sps:$4 sm:$0xff]   ;;  %v98_v18 = vld [vmem:[%s12352_s6 + $0x40] sm:$0x11]  ;;  %v7464_v20 = vcombine.low %v97_v13, %v97_v13  ;;  %v8669_v22 = vld [vmem:[%s12352_s6 + $0x10] ss:$24 sps:$4 sm:$0xff]  }
  0x10   :  { %v190_v10 = vand.u32 %v7463_v5, %v185_v4  ;;  %v187_v11 = vand.u32 %v7462_v6, %v185_v4  ;;  %v7466_v23 = vcombine.low %v98_v18, %v98_v18  ;;  %v7467_v24 = vcombine.high %v98_v18, %v98_v18  ;;  %s12354_s6 = sld [smem:[#allocation6_spill]] }
  0x11   :  { %v196_v21 = vand.u32 %v7465_v14, %v185_v4  ;;  %v193_v26 = vand.u32 %v7464_v20, %v185_v4 }
  0x12   :  { %206 = vmatprep.subr.bf16.mxu0 %v190_v10  ;;  %8517 = vmatprep.subr.bf16.mxu1 %v190_v10  ;;  %v202_v25 = vand.u32 %v7467_v24, %v185_v4  ;;  %v199_v27 = vand.u32 %v7466_v23, %v185_v4 }
  0x13   :  { %207 = vmatpush1.bf16.msra.mxu0 %v187_v11  ;;  %8519 = vmatpush1.bf16.msra.mxu1 %v187_v11 }
  0x14   :  { %255 = vmatprep.subr.bf16.mxu1 %v8666_v12  ;;  %306 = vmatprep.subr.bf16.mxu0 %v8671_v15 }
  0x16   :  { %7468 = vmatmul.mubr.msk.bf16.vlgmr.msra.gmra.mrb[0].mxu0 %vm176_vm1, %v9743_v16  ;;  %7469 = vmatmul.mubr.msk.bf16.vlgmr.msra.gmra.mrb[0].mxu1 %vm176_vm1, %v9745_v17  ;;  %v8676_v28 = vld [vmem:[%s12354_s6 + $0x4] ss:$24 sps:$4 sm:$0xff]   ;;  %v8674_v30 = vld [vmem:[%s12354_s6] ss:$24 sps:$4 sm:$0xff]   ;;  %v8682_v32 = vld [vmem:[%s12354_s6 + $0x34] ss:$24 sps:$4 sm:$0xff]  }
  0x17   :  { %256 = vmatpush1.bf16.msra.mxu1 %v8664_v19  ;;  %287 = vmatprep.mubr.bf16.mxu1 %v9578_v1  ;;  %v8679_v29 = vld [vmem:[%s12354_s6 + $0xc] ss:$24 sps:$4 sm:$0xff]   ;;  %v8677_v31 = vld [vmem:[%s12354_s6 + $0x8] ss:$24 sps:$4 sm:$0xff]   ;;  %v8685_v33 = vld [vmem:[%s12354_s6 + $0x3c] ss:$24 sps:$4 sm:$0xff]  }
  0x18   :  { %257 = vmatprep.subr.bf16.mxu1 %v196_v21  ;;  %307 = vmatpush1.bf16.msra.mxu0 %v8669_v22  ;;  %v8680_v34 = vld [vmem:[%s12354_s6 + $0x30] ss:$24 sps:$4 sm:$0xff]   ;;  %v8688_v36 = vld [vmem:[%s12354_s6 + $0x64] ss:$24 sps:$4 sm:$0xff]   ;;  %v8686_v38 = vld [vmem:[%s12354_s6 + $0x60] ss:$24 sps:$4 sm:$0xff]  }
  0x19   :  { %308 = vmatprep.subr.bf16.mxu0 %v202_v25  ;;  %338 = vmatprep.mubr.bf16.mxu0 %v9578_v1  ;;  %v8683_v35 = vld [vmem:[%s12354_s6 + $0x38] ss:$24 sps:$4 sm:$0xff]   ;;  %v8691_v37 = vld [vmem:[%s12354_s6 + $0x6c] ss:$24 sps:$4 sm:$0xff]   ;;  %v8689_v39 = vld [vmem:[%s12354_s6 + $0x68] ss:$24 sps:$4 sm:$0xff]  }
  0x1a   :  { %v8694_v40 = vld [vmem:[%s12354_s6 + $0x94] ss:$24 sps:$4 sm:$0xff]   ;;  %v8692_v42 = vld [vmem:[%s12354_s6 + $0x90] ss:$24 sps:$4 sm:$0xff]   ;;  %v8700_v44 = vld [vmem:[%s12354_s6 + $0xc4] ss:$24 sps:$4 sm:$0xff]  }
  0x1b   :  { %258 = vmatpush1.bf16.msra.mxu1 %v193_v26  ;;  %v8697_v41 = vld [vmem:[%s12354_s6 + $0x9c] ss:$24 sps:$4 sm:$0xff]   ;;  %v8695_v43 = vld [vmem:[%s12354_s6 + $0x98] ss:$24 sps:$4 sm:$0xff]   ;;  %v8703_v45 = vld [vmem:[%s12354_s6 + $0xcc] ss:$24 sps:$4 sm:$0xff]  }
  0x1c   :  { %309 = vmatpush1.bf16.msra.mxu0 %v199_v27  ;;  %2131 = vmatprep.subr.bf16.mxu1 %v8676_v28  ;;  %v8698_v46 = vld [vmem:[%s12354_s6 + $0xc0] ss:$24 sps:$4 sm:$0xff]   ;;  %v8706_v48 = vld [vmem:[%s12354_s6 + $0xf4] ss:$24 sps:$4 sm:$0xff]   ;;  %v8704_v50 = vld [vmem:[%s12354_s6 + $0xf0] ss:$24 sps:$4 sm:$0xff]  }
  0x1d   :  { %2284 = vmatprep.subr.bf16.mxu0 %v8679_v29  ;;  %v8701_v47 = vld [vmem:[%s12354_s6 + $0xc8] ss:$24 sps:$4 sm:$0xff]   ;;  %v8709_v49 = vld [vmem:[%s12354_s6 + $0xfc] ss:$24 sps:$4 sm:$0xff]   ;;  %v8707_v51 = vld [vmem:[%s12354_s6 + $0xf8] ss:$24 sps:$4 sm:$0xff]  }
  0x1e   :  { %7470 = vmatmul.mubr.msk.bf16.vlgmr.msra.gmra.mrb[4].mxu1 %vm176_vm1, %v9743_v16  ;;  %v8712_v52 = vld [vmem:[%s12354_s6 + $0x124] ss:$24 sps:$4 sm:$0xff]   ;;  %v8710_v54 = vld [vmem:[%s12354_s6 + $0x120] ss:$24 sps:$4 sm:$0xff]   ;;  %v8718_v56 = vld [vmem:[%s12354_s6 + $0x154] ss:$24 sps:$4 sm:$0xff]  }
  0x1f   :  { %297 = vmatprep.mubr.bf16.mxu1 %v9578_v1  ;;  %7472 = vmatmul.mubr.msk.bf16.vlgmr.msra.gmra.mrb[4].mxu0 %vm176_vm1, %v9743_v16  ;;  %v8715_v53 = vld [vmem:[%s12354_s6 + $0x12c] ss:$24 sps:$4 sm:$0xff]   ;;  %v8713_v55 = vld [vmem:[%s12354_s6 + $0x128] ss:$24 sps:$4 sm:$0xff]   ;;  %v8721_v57 = vld [vmem:[%s12354_s6 + $0x15c] ss:$24 sps:$4 sm:$0xff]  }
  0x20   :  { %348 = vmatprep.mubr.bf16.mxu0 %v9578_v1  ;;  %2132 = vmatpush1.bf16.msra.mxu1 %v8674_v30  ;;  %v8716_v58 = vld [vmem:[%s12354_s6 + $0x150] ss:$24 sps:$4 sm:$0xff]   ;;  %v8724_v60 = vld [vmem:[%s12354_s6 + $0x184] ss:$24 sps:$4 sm:$0xff]   ;;  %v8722_v62 = vld [vmem:[%s12354_s6 + $0x180] ss:$24 sps:$4 sm:$0xff]  }
  0x21   :  { %2285 = vmatpush1.bf16.msra.mxu0 %v8677_v31  ;;  %2133 = vmatprep.subr.bf16.mxu1 %v8682_v32  ;;  %v8719_v59 = vld [vmem:[%s12354_s6 + $0x158] ss:$24 sps:$4 sm:$0xff]   ;;  %v8727_v61 = vld [vmem:[%s12354_s6 + $0x18c] ss:$24 sps:$4 sm:$0xff]   ;;  %v8725_v63 = vld [vmem:[%s12354_s6 + $0x188] ss:$24 sps:$4 sm:$0xff]  }
  0x22   :  { %2286 = vmatprep.subr.bf16.mxu0 %v8685_v33  ;;  %v8730_v0 = vld [vmem:[%s12354_s6 + $0x1b4] ss:$24 sps:$4 sm:$0xff]   ;;  %v8728_v3 = vld [vmem:[%s12354_s6 + $0x1b0] ss:$24 sps:$4 sm:$0xff]   ;;  %v8736_v5 = vld [vmem:[%s12354_s6 + $0x1e4] ss:$24 sps:$4 sm:$0xff]   ;;  %v101_v33 = vlaneseq }
  0x23   :  { %v8733_v2 = vld [vmem:[%s12354_s6 + $0x1bc] ss:$24 sps:$4 sm:$0xff]   ;;  %v8731_v4 = vld [vmem:[%s12354_s6 + $0x1b8] ss:$24 sps:$4 sm:$0xff]   ;;  %v8739_v6 = vld [vmem:[%s12354_s6 + $0x1ec] ss:$24 sps:$4 sm:$0xff]  }
  0x24   :  { %2134 = vmatpush1.bf16.msra.mxu1 %v8680_v34  ;;  %v8734_v7 = vld [vmem:[%s12354_s6 + $0x1e0] ss:$24 sps:$4 sm:$0xff]   ;;  %v8742_v9 = vld [vmem:[%s12354_s6 + $0x214] ss:$24 sps:$4 sm:$0xff]   ;;  %v8740_v11 = vld [vmem:[%s12354_s6 + $0x210] ss:$24 sps:$4 sm:$0xff]  }
  0x25   :  { %2287 = vmatpush1.bf16.msra.mxu0 %v8683_v35  ;;  %2135 = vmatprep.subr.bf16.mxu1 %v8688_v36  ;;  %v8737_v8 = vld [vmem:[%s12354_s6 + $0x1e8] ss:$24 sps:$4 sm:$0xff]   ;;  %v8745_v10 = vld [vmem:[%s12354_s6 + $0x21c] ss:$24 sps:$4 sm:$0xff]   ;;  %v8743_v12 = vld [vmem:[%s12354_s6 + $0x218] ss:$24 sps:$4 sm:$0xff]  }
  0x26   :  { %7471 = vmatmul.mubr.msk.bf16.gmra.mrb[8].mxu1 %vm176_vm1, %v9745_v17  ;;  %2288 = vmatprep.subr.bf16.mxu0 %v8691_v37  ;;  %v8748_v13 = vld [vmem:[%s12354_s6 + $0x244] ss:$24 sps:$4 sm:$0xff]   ;;  %v8746_v15 = vld [vmem:[%s12354_s6 + $0x240] ss:$24 sps:$4 sm:$0xff]   ;;  %v8754_v19 = vld [vmem:[%s12354_s6 + $0x274] ss:$24 sps:$4 sm:$0xff]  }
  0x27   :  { %7473 = vmatmul.mubr.msk.bf16.gmra.mrb[8].mxu0 %vm176_vm1, %v9745_v17  ;;  %v8751_v14 = vld [vmem:[%s12354_s6 + $0x24c] ss:$24 sps:$4 sm:$0xff]   ;;  %v8749_v18 = vld [vmem:[%s12354_s6 + $0x248] ss:$24 sps:$4 sm:$0xff]   ;;  %v8757_v20 = vld [vmem:[%s12354_s6 + $0x27c] ss:$24 sps:$4 sm:$0xff]  }
  0x28   :  { %2136 = vmatpush1.bf16.msra.mxu1 %v8686_v38  ;;  %v8752_v21 = vld [vmem:[%s12354_s6 + $0x270] ss:$24 sps:$4 sm:$0xff]   ;;  %v8760_v23 = vld [vmem:[%s12354_s6 + $0x2a4] ss:$24 sps:$4 sm:$0xff]   ;;  %v8758_v25 = vld [vmem:[%s12354_s6 + $0x2a0] ss:$24 sps:$4 sm:$0xff]  }
  0x29   :  { %2289 = vmatpush1.bf16.msra.mxu0 %v8689_v39  ;;  %2137 = vmatprep.subr.bf16.mxu1 %v8694_v40  ;;  %v8755_v22 = vld [vmem:[%s12354_s6 + $0x278] ss:$24 sps:$4 sm:$0xff]   ;;  %v8763_v24 = vld [vmem:[%s12354_s6 + $0x2ac] ss:$24 sps:$4 sm:$0xff]   ;;  %v8761_v26 = vld [vmem:[%s12354_s6 + $0x2a8] ss:$24 sps:$4 sm:$0xff]  }
  0x2a   :  { %2290 = vmatprep.subr.bf16.mxu0 %v8697_v41  ;;  %v8766_v27 = vld [vmem:[%s12354_s6 + $0x2d4] ss:$24 sps:$4 sm:$0xff]   ;;  %v8764_v29 = vld [vmem:[%s12354_s6 + $0x2d0] ss:$24 sps:$4 sm:$0xff]   ;;  %v8772_v31 = vld [vmem:[%s12354_s6 + $0x304] ss:$24 sps:$4 sm:$0xff]  }
  0x2b   :  { %v8769_v28 = vld [vmem:[%s12354_s6 + $0x2dc] ss:$24 sps:$4 sm:$0xff]   ;;  %v8767_v30 = vld [vmem:[%s12354_s6 + $0x2d8] ss:$24 sps:$4 sm:$0xff]   ;;  %v8775_v32 = vld [vmem:[%s12354_s6 + $0x30c] ss:$24 sps:$4 sm:$0xff]  }
  0x2c   :  { %2138 = vmatpush1.bf16.msra.mxu1 %v8692_v42  ;;  %v9970_v34 = vshrl.u32 %v101_v33, 7  ;;  %v99_v36 = vld [vmem:[%s12355_s26] sm:$0x3f]  ;;  %s12359_s26 = sld [smem:[#allocation11_spill]] }
  0x2d   :  { %2291 = vmatpush1.bf16.msra.mxu0 %v8695_v43  ;;  %2139 = vmatprep.subr.bf16.mxu1 %v8700_v44 }
  0x2e   :  { %2292 = vmatprep.subr.bf16.mxu0 %v8703_v45  ;;  %v9973_v35 = vsub.s32 0, %v9970_v34  ;;  %v9979_v37 = vsub.s32 1, %v9970_v34  ;;  %v9984_v45 = vsub.s32 2, %v9970_v34 }
  0x30   :  { %2140 = vmatpush1.bf16.msra.mxu1 %v8698_v46  ;;  %v104_v38 = vrot.slane %v99_v36, %v9973_v35  ;;  %v108_v39 = vrot.slane %v99_v36, %v9979_v37  ;;  %v9987_v46 = vsub.s32 3, %v9970_v34 }
  0x31   :  { %2293 = vmatpush1.bf16.msra.mxu0 %v8701_v47  ;;  %2141 = vmatprep.subr.bf16.mxu1 %v8706_v48 }
  0x32   :  { %2294 = vmatprep.subr.bf16.mxu0 %v8709_v49 }
  0x34   :  { %2142 = vmatpush1.bf16.msra.mxu1 %v8704_v50 }
  0x35   :  { %2295 = vmatpush1.bf16.msra.mxu0 %v8707_v51  ;;  %2143 = vmatprep.subr.bf16.mxu1 %v8712_v52  ;;  %v9990_v51 = vsub.s32 4, %v9970_v34 }
  0x36   :  { %2296 = vmatprep.subr.bf16.mxu0 %v8715_v53 }
  0x38   :  { %2144 = vmatpush1.bf16.msra.mxu1 %v8710_v54 }
  0x39   :  { %2297 = vmatpush1.bf16.msra.mxu0 %v8713_v55  ;;  %2145 = vmatprep.subr.bf16.mxu1 %v8718_v56  ;;  %v9993_v55 = vsub.s32 5, %v9970_v34 }
  0x3a   :  { %2298 = vmatprep.subr.bf16.mxu0 %v8721_v57 }
  0x3c   :  { %2146 = vmatpush1.bf16.msra.mxu1 %v8716_v58 }
  0x3d   :  { %2299 = vmatpush1.bf16.msra.mxu0 %v8719_v59  ;;  %2147 = vmatprep.subr.bf16.mxu1 %v8724_v60  ;;  %v9996_v59 = vrot.slane %v99_v36, %v9984_v45  ;;  %v9999_v60 = vrot.slane %v99_v36, %v9987_v46 }
  0x3e   :  { %2300 = vmatprep.subr.bf16.mxu0 %v8727_v61 }
  0x40   :  { %2148 = vmatpush1.bf16.msra.mxu1 %v8722_v62 }
  0x41   :  { %2301 = vmatpush1.bf16.msra.mxu0 %v8725_v63  ;;  %2149 = vmatprep.subr.bf16.mxu1 %v8730_v0  ;;  %v10002_v0 = vrot.slane %v99_v36, %v9990_v51 }
  0x42   :  { %2302 = vmatprep.subr.bf16.mxu0 %v8733_v2 }
  0x44   :  { %2150 = vmatpush1.bf16.msra.mxu1 %v8728_v3 }
  0x45   :  { %2303 = vmatpush1.bf16.msra.mxu0 %v8731_v4  ;;  %2151 = vmatprep.subr.bf16.mxu1 %v8736_v5  ;;  %v10007_v4 = vrot.slane %v99_v36, %v9993_v55  ;;  %v8784_v36 = vld [vmem:[%s12354_s6 + $0x364] ss:$24 sps:$4 sm:$0xff]  }
  0x46   :  { %2304 = vmatprep.subr.bf16.mxu0 %v8739_v6  ;;  %v8770_v6 = vld [vmem:[%s12354_s6 + $0x300] ss:$24 sps:$4 sm:$0xff]  }
  0x48   :  { %2152 = vmatpush1.bf16.msra.mxu1 %v8734_v7  ;;  %v8773_v7 = vld [vmem:[%s12354_s6 + $0x308] ss:$24 sps:$4 sm:$0xff]  }
  0x49   :  { %2305 = vmatpush1.bf16.msra.mxu0 %v8737_v8  ;;  %2153 = vmatprep.subr.bf16.mxu1 %v8742_v9  ;;  %v8778_v9 = vld [vmem:[%s12354_s6 + $0x334] ss:$24 sps:$4 sm:$0xff]  }
  0x4a   :  { %2306 = vmatprep.subr.bf16.mxu0 %v8745_v10  ;;  %v8781_v10 = vld [vmem:[%s12354_s6 + $0x33c] ss:$24 sps:$4 sm:$0xff]  }
  0x4c   :  { %2154 = vmatpush1.bf16.msra.mxu1 %v8740_v11 }
  0x4d   :  { %2307 = vmatpush1.bf16.msra.mxu0 %v8743_v12  ;;  %2155 = vmatprep.subr.bf16.mxu1 %v8748_v13 }
  0x4e   :  { %2308 = vmatprep.subr.bf16.mxu0 %v8751_v14 }
  0x50   :  { %2156 = vmatpush1.bf16.msra.mxu1 %v8746_v15 }
  0x51   :  { %2309 = vmatpush1.bf16.msra.mxu0 %v8749_v18  ;;  %2157 = vmatprep.subr.bf16.mxu1 %v8754_v19 }
  0x52   :  { %2310 = vmatprep.subr.bf16.mxu0 %v8757_v20 }
  0x54   :  { %2158 = vmatpush1.bf16.msra.mxu1 %v8752_v21  ;;  %v8776_v21 = vld [vmem:[%s12354_s6 + $0x330] ss:$24 sps:$4 sm:$0xff]  }
  0x55   :  { %2311 = vmatpush1.bf16.msra.mxu0 %v8755_v22  ;;  %2159 = vmatprep.subr.bf16.mxu1 %v8760_v23 }
  0x56   :  { %2312 = vmatprep.subr.bf16.mxu0 %v8763_v24 }
  0x58   :  { %2160 = vmatpush1.bf16.msra.mxu1 %v8758_v25 }
  0x59   :  { %2313 = vmatpush1.bf16.msra.mxu0 %v8761_v26  ;;  %2161 = vmatprep.subr.bf16.mxu1 %v8766_v27 }
  0x5a   :  { %2314 = vmatprep.subr.bf16.mxu0 %v8769_v28  ;;  %v8779_v28 = vld [vmem:[%s12354_s6 + $0x338] ss:$24 sps:$4 sm:$0xff]  }
  0x5c   :  { %2162 = vmatpush1.bf16.msra.mxu1 %v8764_v29 }
  0x5d   :  { %2315 = vmatpush1.bf16.msra.mxu0 %v8767_v30  ;;  %2182 = vmatprep.subr.bf16.mxu1 %v8772_v31 }
  0x5e   :  { %2335 = vmatprep.subr.bf16.mxu0 %v8775_v32 }
  0xe9   :  { %v238_v40 = vpop.f32.mrb[0].mxu0  ;;  %v248_v41 = vpop.f32.mrb[0].mxu1 }
  0xea   :  { %v239_v42 = vadd.f32 %v238_v40, %v104_v38  ;;  %v240_v43 = vpop.f32.mrb[1].mxu0  ;;  %v250_v44 = vpop.f32.mrb[1].mxu1  ;;  %v249_v3 = vadd.f32 %v248_v41, %v104_v38 }
  0xeb   :  { %v241_v47 = vadd.f32 %v240_v43, %v108_v39  ;;  %v242_v48 = vpop.f32.mrb[2].mxu0  ;;  %v251_v49 = vadd.f32 %v250_v44, %v108_v39  ;;  %v252_v50 = vpop.f32.mrb[2].mxu1 }
  0xec   :  { %v243_v52 = vadd.f32 %v242_v48, %v104_v38  ;;  %v244_v53 = vpop.f32.mrb[3].mxu0  ;;  %v253_v54 = vpop.f32.mrb[3].mxu1  ;;  %v357_v57 = vmax.f32 %v239_v42, 0.0  ;;  %v369_v22 = vmax.f32 %v249_v3, 0.0  ;;  %v8787_v38 = vld [vmem:[%s12354_s6 + $0x36c] ss:$24 sps:$4 sm:$0xff]  }
  0xed   :  { %v245_v56 = vadd.f32 %v244_v53, %v108_v39  ;;  %v358_v61 = vmax.f32 %v241_v47, 0.0  ;;  %v370_v63 = vmax.f32 %v251_v49, 0.0  ;;  %v8782_v49 = vld [vmem:[%s12354_s6 + $0x360] ss:$24 sps:$4 sm:$0xff]  }
  0xee   :  { %v363_v58 = vmax.f32 %v243_v52, 0.0  ;;  %v10051_v44 = vpack.c.bf16 %v369_v22, %v369_v22  ;;  %v8785_v50 = vld [vmem:[%s12354_s6 + $0x368] ss:$24 sps:$4 sm:$0xff]   ;;  %v8808_v22 = vld [vmem:[%s12354_s6 + $0x424] ss:$24 sps:$4 sm:$0xff]  }
  0xef   :  { %v364_v62 = vmax.f32 %v245_v56, 0.0  ;;  %v10026_v14 = vpack.c.bf16 %v370_v63, %v370_v63  ;;  %v8790_v56 = vld [vmem:[%s12354_s6 + $0x394] ss:$24 sps:$4 sm:$0xff]  }
  0xf0   :  { %v10004_v2 = vpack.c.bf16 %v363_v58, %v357_v57  ;;  %v8793_v57 = vld [vmem:[%s12354_s6 + $0x39c] ss:$24 sps:$4 sm:$0xff]  }
  0xf1   :  { %v10009_v5 = vpack.c.bf16 %v364_v62, %v358_v61  ;;  %v289_v8 = vpop.f32.mrb[4].mxu1 }
  0xf2   :  { %v290_v11 = vadd.f32 %v289_v8, %v9996_v59  ;;  %v291_v12 = vpop.f32.mrb[5].mxu1  ;;  %v340_v13 = vpop.f32.mrb[4].mxu0  ;;  %v8788_v8 = vld [vmem:[%s12354_s6 + $0x390] ss:$24 sps:$4 sm:$0xff]  }
  0xf3   :  { %2163 = vmatprep.mubr.bf16.mxu1 %v10009_v5  ;;  %2316 = vmatprep.mubr.bf16.mxu0 %v10009_v5  ;;  %v292_v15 = vadd.f32 %v291_v12, %v9999_v60  ;;  %v293_v18 = vpop.f32.mrb[6].mxu1  ;;  %v341_v19 = vadd.f32 %v340_v13, %v10002_v0  ;;  %v342_v20 = vpop.f32.mrb[5].mxu0  ;;  %v8794_v13 = vld [vmem:[%s12354_s6 + $0x3c0] ss:$24 sps:$4 sm:$0xff]  }
  0xf4   :  { %2164 = vmatmul.mubr.bf16.vlgmr.msra.gmra.mrb[12].mxu1 %v10004_v2  ;;  %2317 = vmatmul.mubr.bf16.vlgmr.msra.gmra.mrb[12].mxu0 %v10004_v2  ;;  %v359_v23 = vmax.f32 %v290_v11, 0.0  ;;  %v294_v24 = vadd.f32 %v293_v18, %v9996_v59  ;;  %v295_v25 = vpop.f32.mrb[7].mxu1  ;;  %v343_v26 = vadd.f32 %v342_v20, %v10007_v4  ;;  %v344_v27 = vpop.f32.mrb[6].mxu0  ;;  %v8799_v11 = vld [vmem:[%s12354_s6 + $0x3cc] ss:$24 sps:$4 sm:$0xff]  }
  0xf5   :  { %2183 = vmatpush1.bf16.msra.mxu1 %v8770_v6  ;;  %2336 = vmatpush1.bf16.msra.mxu0 %v8773_v7  ;;  %v360_v29 = vmax.f32 %v292_v15, 0.0  ;;  %v296_v30 = vadd.f32 %v295_v25, %v9999_v60  ;;  %v361_v31 = vmax.f32 %v341_v19, 0.0  ;;  %v345_v32 = vadd.f32 %v344_v27, %v10002_v0  ;;  %v346_v33 = vpop.f32.mrb[7].mxu0  ;;  %v8797_v15 = vld [vmem:[%s12354_s6 + $0x3c8] ss:$24 sps:$4 sm:$0xff]  }
  0xf6   :  { %2184 = vmatprep.subr.bf16.mxu1 %v8778_v9  ;;  %2337 = vmatprep.subr.bf16.mxu0 %v8781_v10  ;;  %v365_v39 = vmax.f32 %v294_v24, 0.0  ;;  %v362_v40 = vmax.f32 %v343_v26, 0.0  ;;  %v347_v41 = vadd.f32 %v346_v33, %v10007_v4  ;;  %v8791_v9 = vld [vmem:[%s12354_s6 + $0x398] ss:$24 sps:$4 sm:$0xff]   ;;  %v8796_v10 = vld [vmem:[%s12354_s6 + $0x3c4] ss:$24 sps:$4 sm:$0xff]  }
  0xf7   :  { %2173 = vmatprep.mubr.bf16.mxu1 %v10026_v14  ;;  %2326 = vmatprep.mubr.bf16.mxu0 %v10026_v14  ;;  %v366_v42 = vmax.f32 %v296_v30, 0.0  ;;  %v367_v43 = vmax.f32 %v345_v32, 0.0  ;;  %v8802_v18 = vld [vmem:[%s12354_s6 + $0x3f4] ss:$24 sps:$4 sm:$0xff]   ;;  %v8800_v20 = vld [vmem:[%s12354_s6 + $0x3f0] ss:$24 sps:$4 sm:$0xff]  }
  0xf8   :  { %v10053_v47 = vpack.c.bf16 %v365_v39, %v359_v23  ;;  %v368_v48 = vmax.f32 %v347_v41, 0.0  ;;  %v8805_v19 = vld [vmem:[%s12354_s6 + $0x3fc] ss:$24 sps:$4 sm:$0xff]   ;;  %v8811_v23 = vld [vmem:[%s12354_s6 + $0x42c] ss:$24 sps:$4 sm:$0xff]  }
  0xf9   :  { %2185 = vmatpush1.bf16.msra.mxu1 %v8776_v21  ;;  %2338 = vmatpush1.bf16.msra.mxu0 %v8779_v28  ;;  %v10061_v52 = vpack.c.bf16 %v366_v42, %v360_v29  ;;  %v10063_v53 = vpop.f32.mrb[8].mxu1  ;;  %v10065_v54 = vpack.c.bf16 %v367_v43, %v361_v31  ;;  %v8803_v21 = vld [vmem:[%s12354_s6 + $0x3f8] ss:$24 sps:$4 sm:$0xff]   ;;  %v8809_v25 = vld [vmem:[%s12354_s6 + $0x428] ss:$24 sps:$4 sm:$0xff]  }
  0xfa   :  { %2186 = vmatprep.subr.bf16.mxu1 %v8784_v36  ;;  %2339 = vmatprep.subr.bf16.mxu0 %v8787_v38  ;;  %v10073_v58 = vpop.f32.mrb[9].mxu1  ;;  %v10075_v61 = vpack.c.bf16 %v368_v48, %v362_v40  ;;  %v10077_v62 = vpop.f32.mrb[8].mxu0  ;;  %v8806_v24 = vld [vmem:[%s12354_s6 + $0x420] ss:$24 sps:$4 sm:$0xff]   ;;  %v8814_v26 = vld [vmem:[%s12354_s6 + $0x454] ss:$24 sps:$4 sm:$0xff]  }
  0xfb   :  { %v303_v63 = vpop.f32.mrb[10].mxu1  ;;  %v10079_v3 = vpop.f32.mrb[9].mxu0  ;;  %v8817_v27 = vld [vmem:[%s12354_s6 + $0x45c] ss:$24 sps:$4 sm:$0xff]   ;;  %v8812_v28 = vld [vmem:[%s12354_s6 + $0x450] ss:$24 sps:$4 sm:$0xff]  }
  0xfc   :  { %2174 = vmatmul.mubr.bf16.gmra.mrb[16].mxu1 %v10051_v44  ;;  %2327 = vmatmul.mubr.bf16.gmra.mrb[16].mxu0 %v10051_v44  ;;  %v304_v6 = vpop.f32.mrb[11].mxu1  ;;  %v354_v7 = vpop.f32.mrb[10].mxu0  ;;  %v8815_v29 = vld [vmem:[%s12354_s6 + $0x458] ss:$24 sps:$4 sm:$0xff]   ;;  %v8820_v30 = vld [vmem:[%s12354_s6 + $0x484] ss:$24 sps:$4 sm:$0xff]  }
  0xfd   :  { %2187 = vmatpush1.bf16.msra.mxu1 %v8782_v49  ;;  %2340 = vmatpush1.bf16.msra.mxu0 %v8785_v50  ;;  %v355_v12 = vpop.f32.mrb[11].mxu0  ;;  %v8823_v31 = vld [vmem:[%s12354_s6 + $0x48c] ss:$24 sps:$4 sm:$0xff]   ;;  %v8818_v32 = vld [vmem:[%s12354_s6 + $0x480] ss:$24 sps:$4 sm:$0xff]  }
  0xfe   :  { %2188 = vmatprep.subr.bf16.mxu1 %v8790_v56  ;;  %2341 = vmatprep.subr.bf16.mxu0 %v8793_v57  ;;  %v8821_v33 = vld [vmem:[%s12354_s6 + $0x488] ss:$24 sps:$4 sm:$0xff]   ;;  %v8826_v36 = vld [vmem:[%s12354_s6 + $0x4b4] ss:$24 sps:$4 sm:$0xff]   ;;  %v8827_v40 = vld [vmem:[%s12354_s6 + $0x4b8] ss:$24 sps:$4 sm:$0xff]  }
  0xff   :  { %2214 = vmatprep.mubr.bf16.mxu1 %v10061_v52  ;;  %2367 = vmatprep.mubr.bf16.mxu0 %v10061_v52  ;;  %v8829_v38 = vld [vmem:[%s12354_s6 + $0x4bc] ss:$24 sps:$4 sm:$0xff]   ;;  %v8824_v39 = vld [vmem:[%s12354_s6 + $0x4b0] ss:$24 sps:$4 sm:$0xff]   ;;  %v8835_v42 = vld [vmem:[%s12354_s6 + $0x4ec] ss:$24 sps:$4 sm:$0xff]  }
 0x100   :  { %v8832_v41 = vld [vmem:[%s12354_s6 + $0x4e4] ss:$24 sps:$4 sm:$0xff]   ;;  %v8830_v43 = vld [vmem:[%s12354_s6 + $0x4e0] ss:$24 sps:$4 sm:$0xff]   ;;  %v8838_v49 = vld [vmem:[%s12354_s6 + $0x514] ss:$24 sps:$4 sm:$0xff]  }
 0x101   :  { %2189 = vmatpush1.bf16.msra.mxu1 %v8788_v8  ;;  %2342 = vmatpush1.bf16.msra.mxu0 %v8791_v9  ;;  %v8833_v48 = vld [vmem:[%s12354_s6 + $0x4e8] ss:$24 sps:$4 sm:$0xff]   ;;  %v8841_v50 = vld [vmem:[%s12354_s6 + $0x51c] ss:$24 sps:$4 sm:$0xff]   ;;  %v8839_v57 = vld [vmem:[%s12354_s6 + $0x518] ss:$24 sps:$4 sm:$0xff]  }
 0x102   :  { %2190 = vmatprep.subr.bf16.mxu1 %v8796_v10  ;;  %2343 = vmatprep.subr.bf16.mxu0 %v8799_v11  ;;  %v8836_v56 = vld [vmem:[%s12354_s6 + $0x510] ss:$24 sps:$4 sm:$0xff]   ;;  %v8844_v63 = vld [vmem:[%s12354_s6 + $0x544] ss:$24 sps:$4 sm:$0xff]   ;;  %v8842_v7 = vld [vmem:[%s12354_s6 + $0x540] ss:$24 sps:$4 sm:$0xff]  }
 0x103   :  { %v8847_v6 = vld [vmem:[%s12354_s6 + $0x54c] ss:$24 sps:$4 sm:$0xff]   ;;  %v8845_v8 = vld [vmem:[%s12354_s6 + $0x548] ss:$24 sps:$4 sm:$0xff]   ;;  %v8853_v10 = vld [vmem:[%s12354_s6 + $0x57c] ss:$24 sps:$4 sm:$0xff]  }
 0x104   :  { %v8850_v9 = vld [vmem:[%s12354_s6 + $0x574] ss:$24 sps:$4 sm:$0xff]   ;;  %v8848_v11 = vld [vmem:[%s12354_s6 + $0x570] ss:$24 sps:$4 sm:$0xff]  }
 0x105   :  { %2191 = vmatpush1.bf16.msra.mxu1 %v8794_v13  ;;  %2344 = vmatpush1.bf16.msra.mxu0 %v8797_v15  ;;  %v8851_v12 = vld [vmem:[%s12354_s6 + $0x578] ss:$24 sps:$4 sm:$0xff]   ;;  %v8856_v13 = vld [vmem:[%s12354_s6 + $0x5a4] ss:$24 sps:$4 sm:$0xff]  }
 0x106   :  { %2192 = vmatprep.subr.bf16.mxu1 %v8802_v18  ;;  %2345 = vmatprep.subr.bf16.mxu0 %v8805_v19  ;;  %v8859_v15 = vld [vmem:[%s12354_s6 + $0x5ac] ss:$24 sps:$4 sm:$0xff]   ;;  %v8854_v18 = vld [vmem:[%s12354_s6 + $0x5a0] ss:$24 sps:$4 sm:$0xff]  }
 0x107   :  { %v8857_v19 = vld [vmem:[%s12354_s6 + $0x5a8] ss:$24 sps:$4 sm:$0xff]  }
 0x109   :  { %2193 = vmatpush1.bf16.msra.mxu1 %v8800_v20  ;;  %2346 = vmatpush1.bf16.msra.mxu0 %v8803_v21  ;;  %v8862_v20 = vld [vmem:[%s12354_s6 + $0x5d4] ss:$24 sps:$4 sm:$0xff]  }
 0x10a   :  { %2194 = vmatprep.subr.bf16.mxu1 %v8808_v22  ;;  %2347 = vmatprep.subr.bf16.mxu0 %v8811_v23  ;;  %v8865_v21 = vld [vmem:[%s12354_s6 + $0x5dc] ss:$24 sps:$4 sm:$0xff]   ;;  %v302_v22 = vadd.f32 %v10073_v58, %v9999_v60  ;;  %v8860_v23 = vld [vmem:[%s12354_s6 + $0x5d0] ss:$24 sps:$4 sm:$0xff]   ;;  %v8871_v60 = vld [vmem:[%s12354_s6 + $0x60c] ss:$24 sps:$4 sm:$0xff]  }
 0x10c   :  { %v372_v58 = vmax.f32 %v302_v22, 0.0  ;;  %v8914_v22 = vld [vmem:[%s12354_s6 + $0x780] ss:$24 sps:$4 sm:$0xff]  }
 0x10d   :  { %2195 = vmatpush1.bf16.msra.mxu1 %v8806_v24  ;;  %2348 = vmatpush1.bf16.msra.mxu0 %v8809_v25  ;;  %v8863_v24 = vld [vmem:[%s12354_s6 + $0x5d8] ss:$24 sps:$4 sm:$0xff]   ;;  %v8868_v25 = vld [vmem:[%s12354_s6 + $0x604] ss:$24 sps:$4 sm:$0xff]  }
 0x10e   :  { %2196 = vmatprep.subr.bf16.mxu1 %v8814_v26  ;;  %2349 = vmatprep.subr.bf16.mxu0 %v8817_v27  ;;  %v300_v26 = vadd.f32 %v10063_v53, %v9996_v59  ;;  %v8866_v27 = vld [vmem:[%s12354_s6 + $0x600] ss:$24 sps:$4 sm:$0xff]   ;;  %v8877_v59 = vld [vmem:[%s12354_s6 + $0x63c] ss:$24 sps:$4 sm:$0xff]   ;;  %v10257_v53 = vpack.c.bf16 %v372_v58, %v372_v58 }
 0x10f   :  { %v8923_v58 = vld [vmem:[%s12354_s6 + $0x7b8] ss:$24 sps:$4 sm:$0xff]  }
 0x111   :  { %2197 = vmatpush1.bf16.msra.mxu1 %v8812_v28  ;;  %2350 = vmatpush1.bf16.msra.mxu0 %v8815_v29  ;;  %v8869_v28 = vld [vmem:[%s12354_s6 + $0x608] ss:$24 sps:$4 sm:$0xff]   ;;  %v8874_v29 = vld [vmem:[%s12354_s6 + $0x634] ss:$24 sps:$4 sm:$0xff]  }
 0x112   :  { %2198 = vmatprep.subr.bf16.mxu1 %v8820_v30  ;;  %2351 = vmatprep.subr.bf16.mxu0 %v8823_v31  ;;  %v371_v30 = vmax.f32 %v300_v26, 0.0  ;;  %v8872_v31 = vld [vmem:[%s12354_s6 + $0x630] ss:$24 sps:$4 sm:$0xff]   ;;  %v8928_v26 = vld [vmem:[%s12354_s6 + $0x7e4] ss:$24 sps:$4 sm:$0xff]  }
 0x115   :  { %2199 = vmatpush1.bf16.msra.mxu1 %v8818_v32  ;;  %2352 = vmatpush1.bf16.msra.mxu0 %v8821_v33  ;;  %v8875_v32 = vld [vmem:[%s12354_s6 + $0x638] ss:$24 sps:$4 sm:$0xff]   ;;  %v8880_v33 = vld [vmem:[%s12354_s6 + $0x664] ss:$24 sps:$4 sm:$0xff]  }
 0x116   :  { %2200 = vmatprep.subr.bf16.mxu1 %v8826_v36  ;;  %2353 = vmatprep.subr.bf16.mxu0 %v8829_v38  ;;  %v8883_v36 = vld [vmem:[%s12354_s6 + $0x66c] ss:$24 sps:$4 sm:$0xff]   ;;  %v10275_v38 = vpack.c.bf16 %v371_v30, %v371_v30  ;;  %v8937_v30 = vld [vmem:[%s12354_s6 + $0x81c] ss:$24 sps:$4 sm:$0xff]  }
 0x119   :  { %2201 = vmatpush1.bf16.msra.mxu1 %v8824_v39  ;;  %2354 = vmatpush1.bf16.msra.mxu0 %v8827_v40  ;;  %v8878_v39 = vld [vmem:[%s12354_s6 + $0x660] ss:$24 sps:$4 sm:$0xff]  }
 0x11a   :  { %2202 = vmatprep.subr.bf16.mxu1 %v8832_v41  ;;  %2355 = vmatprep.subr.bf16.mxu0 %v8835_v42  ;;  %v8881_v40 = vld [vmem:[%s12354_s6 + $0x668] ss:$24 sps:$4 sm:$0xff]   ;;  %v8886_v41 = vld [vmem:[%s12354_s6 + $0x694] ss:$24 sps:$4 sm:$0xff]  }
 0x11b   :  { %v8889_v42 = vld [vmem:[%s12354_s6 + $0x69c] ss:$24 sps:$4 sm:$0xff]  }
 0x11d   :  { %2203 = vmatpush1.bf16.msra.mxu1 %v8830_v43  ;;  %2356 = vmatpush1.bf16.msra.mxu0 %v8833_v48  ;;  %v8884_v43 = vld [vmem:[%s12354_s6 + $0x690] ss:$24 sps:$4 sm:$0xff]  }
 0x11e   :  { %2204 = vmatprep.subr.bf16.mxu1 %v8838_v49  ;;  %2357 = vmatprep.subr.bf16.mxu0 %v8841_v50  ;;  %v8887_v48 = vld [vmem:[%s12354_s6 + $0x698] ss:$24 sps:$4 sm:$0xff]   ;;  %v8892_v49 = vld [vmem:[%s12354_s6 + $0x6c4] ss:$24 sps:$4 sm:$0xff]  }
 0x11f   :  { %v8895_v50 = vld [vmem:[%s12354_s6 + $0x6cc] ss:$24 sps:$4 sm:$0xff]  }
 0x121   :  { %2205 = vmatpush1.bf16.msra.mxu1 %v8836_v56  ;;  %2358 = vmatpush1.bf16.msra.mxu0 %v8839_v57  ;;  %v8890_v56 = vld [vmem:[%s12354_s6 + $0x6c0] ss:$24 sps:$4 sm:$0xff]  }
 0x122   :  { %2206 = vmatprep.subr.bf16.mxu1 %v8844_v63  ;;  %2359 = vmatprep.subr.bf16.mxu0 %v8847_v6  ;;  %v8893_v57 = vld [vmem:[%s12354_s6 + $0x6c8] ss:$24 sps:$4 sm:$0xff]   ;;  %v8898_v63 = vld [vmem:[%s12354_s6 + $0x6f4] ss:$24 sps:$4 sm:$0xff]  }
 0x123   :  { %v8901_v6 = vld [vmem:[%s12354_s6 + $0x6fc] ss:$24 sps:$4 sm:$0xff]  }
 0x125   :  { %2207 = vmatpush1.bf16.msra.mxu1 %v8842_v7  ;;  %2360 = vmatpush1.bf16.msra.mxu0 %v8845_v8  ;;  %v8896_v7 = vld [vmem:[%s12354_s6 + $0x6f0] ss:$24 sps:$4 sm:$0xff]  }
 0x126   :  { %2208 = vmatprep.subr.bf16.mxu1 %v8850_v9  ;;  %2361 = vmatprep.subr.bf16.mxu0 %v8853_v10  ;;  %v8899_v8 = vld [vmem:[%s12354_s6 + $0x6f8] ss:$24 sps:$4 sm:$0xff]   ;;  %v8904_v9 = vld [vmem:[%s12354_s6 + $0x724] ss:$24 sps:$4 sm:$0xff]  }
 0x127   :  { %v8907_v10 = vld [vmem:[%s12354_s6 + $0x72c] ss:$24 sps:$4 sm:$0xff]  }
 0x129   :  { %2209 = vmatpush1.bf16.msra.mxu1 %v8848_v11  ;;  %2362 = vmatpush1.bf16.msra.mxu0 %v8851_v12  ;;  %v8902_v11 = vld [vmem:[%s12354_s6 + $0x720] ss:$24 sps:$4 sm:$0xff]  }
 0x12a   :  { %2210 = vmatprep.subr.bf16.mxu1 %v8856_v13  ;;  %2363 = vmatprep.subr.bf16.mxu0 %v8859_v15  ;;  %v8905_v12 = vld [vmem:[%s12354_s6 + $0x728] ss:$24 sps:$4 sm:$0xff]   ;;  %v8910_v13 = vld [vmem:[%s12354_s6 + $0x754] ss:$24 sps:$4 sm:$0xff]  }
 0x12b   :  { %v8913_v15 = vld [vmem:[%s12354_s6 + $0x75c] ss:$24 sps:$4 sm:$0xff]  }
 0x12d   :  { %2211 = vmatpush1.bf16.msra.mxu1 %v8854_v18  ;;  %2364 = vmatpush1.bf16.msra.mxu0 %v8857_v19  ;;  %v8908_v18 = vld [vmem:[%s12354_s6 + $0x750] ss:$24 sps:$4 sm:$0xff]  }
 0x12e   :  { %2212 = vmatprep.subr.bf16.mxu1 %v8862_v20  ;;  %2365 = vmatprep.subr.bf16.mxu0 %v8865_v21  ;;  %v8911_v19 = vld [vmem:[%s12354_s6 + $0x758] ss:$24 sps:$4 sm:$0xff]   ;;  %v8916_v20 = vld [vmem:[%s12354_s6 + $0x784] ss:$24 sps:$4 sm:$0xff]  }
 0x12f   :  { %v8919_v21 = vld [vmem:[%s12354_s6 + $0x78c] ss:$24 sps:$4 sm:$0xff]  }
 0x131   :  { %2213 = vmatpush1.bf16.msra.mxu1 %v8860_v23  ;;  %2366 = vmatpush1.bf16.msra.mxu0 %v8863_v24  ;;  %v8917_v23 = vld [vmem:[%s12354_s6 + $0x788] ss:$24 sps:$4 sm:$0xff]   ;;  %v8922_v24 = vld [vmem:[%s12354_s6 + $0x7b4] ss:$24 sps:$4 sm:$0xff]  }
 0x132   :  { %2233 = vmatprep.subr.bf16.mxu1 %v8868_v25  ;;  %2386 = vmatprep.subr.bf16.mxu0 %v8871_v60  ;;  %v8925_v25 = vld [vmem:[%s12354_s6 + $0x7bc] ss:$24 sps:$4 sm:$0xff]   ;;  %v8920_v60 = vld [vmem:[%s12354_s6 + $0x7b0] ss:$24 sps:$4 sm:$0xff]  }
 0x134   :  { %2215 = vmatmul.mubr.bf16.vlgmr.msra.gmra.mrb[12].mxu1 %v10053_v47  ;;  %2368 = vmatmul.mubr.bf16.vlgmr.msra.gmra.mrb[12].mxu0 %v10053_v47 }
 0x135   :  { %2234 = vmatpush1.bf16.msra.mxu1 %v8866_v27  ;;  %2387 = vmatpush1.bf16.msra.mxu0 %v8869_v28  ;;  %v8931_v27 = vld [vmem:[%s12354_s6 + $0x7ec] ss:$24 sps:$4 sm:$0xff]   ;;  %v8926_v28 = vld [vmem:[%s12354_s6 + $0x7e0] ss:$24 sps:$4 sm:$0xff]  }
 0x136   :  { %2235 = vmatprep.subr.bf16.mxu1 %v8874_v29  ;;  %2388 = vmatprep.subr.bf16.mxu0 %v8877_v59  ;;  %v8929_v29 = vld [vmem:[%s12354_s6 + $0x7e8] ss:$24 sps:$4 sm:$0xff]   ;;  %v8934_v59 = vld [vmem:[%s12354_s6 + $0x814] ss:$24 sps:$4 sm:$0xff]  }
 0x137   :  { %2224 = vmatprep.mubr.bf16.mxu1 %v10257_v53  ;;  %2377 = vmatprep.mubr.bf16.mxu0 %v10257_v53 }
 0x139   :  { %2236 = vmatpush1.bf16.msra.mxu1 %v8872_v31  ;;  %2389 = vmatpush1.bf16.msra.mxu0 %v8875_v32  ;;  %v8932_v31 = vld [vmem:[%s12354_s6 + $0x810] ss:$24 sps:$4 sm:$0xff]  }
 0x13a   :  { %2237 = vmatprep.subr.bf16.mxu1 %v8880_v33  ;;  %2390 = vmatprep.subr.bf16.mxu0 %v8883_v36  ;;  %v8935_v32 = vld [vmem:[%s12354_s6 + $0x818] ss:$24 sps:$4 sm:$0xff]   ;;  %v8940_v33 = vld [vmem:[%s12354_s6 + $0x844] ss:$24 sps:$4 sm:$0xff]  }
 0x13b   :  { %v8943_v36 = vld [vmem:[%s12354_s6 + $0x84c] ss:$24 sps:$4 sm:$0xff]  }
 0x13c   :  { %2225 = vmatmul.mubr.bf16.gmra.mrb[16].mxu1 %v10275_v38  ;;  %2378 = vmatmul.mubr.bf16.gmra.mrb[16].mxu0 %v10275_v38 }
 0x13d   :  { %2238 = vmatpush1.bf16.msra.mxu1 %v8878_v39  ;;  %2391 = vmatpush1.bf16.msra.mxu0 %v8881_v40  ;;  %v8938_v39 = vld [vmem:[%s12354_s6 + $0x840] ss:$24 sps:$4 sm:$0xff]  }
 0x13e   :  { %2239 = vmatprep.subr.bf16.mxu1 %v8886_v41  ;;  %2392 = vmatprep.subr.bf16.mxu0 %v8889_v42  ;;  %v8941_v40 = vld [vmem:[%s12354_s6 + $0x848] ss:$24 sps:$4 sm:$0xff]   ;;  %v8946_v41 = vld [vmem:[%s12354_s6 + $0x874] ss:$24 sps:$4 sm:$0xff]  }
 0x13f   :  { %7757 = vmatprep.mubr.msk.bf16.mxu1 %vm2105_vm2, %v10075_v61  ;;  %7760 = vmatprep.mubr.msk.bf16.mxu0 %vm2105_vm2, %v10075_v61  ;;  %v8949_v42 = vld [vmem:[%s12354_s6 + $0x87c] ss:$24 sps:$4 sm:$0xff]  }
 0x141   :  { %2240 = vmatpush1.bf16.msra.mxu1 %v8884_v43  ;;  %2393 = vmatpush1.bf16.msra.mxu0 %v8887_v48  ;;  %v8944_v43 = vld [vmem:[%s12354_s6 + $0x870] ss:$24 sps:$4 sm:$0xff]  }
 0x142   :  { %2241 = vmatprep.subr.bf16.mxu1 %v8892_v49  ;;  %2394 = vmatprep.subr.bf16.mxu0 %v8895_v50  ;;  %v8947_v48 = vld [vmem:[%s12354_s6 + $0x878] ss:$24 sps:$4 sm:$0xff]   ;;  %v8950_v49 = vld [vmem:[%s12354_s6 + $0x8a4] ss:$24 sps:$4 sm:$0x7f]  }
 0x143   :  { %v8952_v50 = vld [vmem:[%s12354_s6 + $0x8ac] ss:$24 sps:$4 sm:$0x7f]  }
 0x145   :  { %2242 = vmatpush1.bf16.msra.mxu1 %v8890_v56  ;;  %2395 = vmatpush1.bf16.msra.mxu0 %v8893_v57  ;;  %v353_v56 = vadd.f32 %v10079_v3, %v10007_v4  ;;  %v8954_v57 = vld [vmem:[%s12354_s6 + $0x8a0] ss:$24 sps:$4 sm:$0x7f]  }
 0x146   :  { %2243 = vmatprep.subr.bf16.mxu1 %v8898_v63  ;;  %2396 = vmatprep.subr.bf16.mxu0 %v8901_v6  ;;  %v8955_v63 = vld [vmem:[%s12354_s6 + $0x8a8] ss:$24 sps:$4 sm:$0x7f]   ;;  %v2114_v4 = vsel %vm2112_vm3, %v8954_v57, 0 }
 0x147   :  { %v374_v6 = vmax.f32 %v353_v56, 0.0  ;;  %v2120_v3 = vsel %vm2112_vm3, %v8955_v63, 0  ;;  %v9009_v56 = vld [vmem:[%s12354_s6 + $0x344] ss:$24 sps:$4 sm:$0xff]   ;;  %v9099_v63 = vld [vmem:[%s12356_s4 + $0x48] sm:$0xff]  }
 0x148   :  { %v9098_v57 = vld [vmem:[%s12356_s4] sm:$0xff]  }
 0x149   :  { %2244 = vmatpush1.bf16.msra.mxu1 %v8896_v7  ;;  %2397 = vmatpush1.bf16.msra.mxu0 %v8899_v8  ;;  %v8958_v7 = vld [vmem:[%s12354_s6 + $0x14] ss:$24 sps:$4 sm:$0xff]   ;;  %v351_v8 = vadd.f32 %v10077_v62, %v10002_v0  ;;  %v8959_v0 = vld [vmem:[%s12354_s6 + $0x40] ss:$24 sps:$4 sm:$0xff]  }
 0x14a   :  { %2245 = vmatprep.subr.bf16.mxu1 %v8904_v9  ;;  %2398 = vmatprep.subr.bf16.mxu0 %v8907_v10  ;;  %v10444_v9 = vpack.c.bf16 %v374_v6, %v374_v6  ;;  %v8956_v10 = vld [vmem:[%s12354_s6 + $0x10] ss:$24 sps:$4 sm:$0xff]   ;;  %v8964_v62 = vld [vmem:[%s12354_s6 + $0x74] ss:$24 sps:$4 sm:$0xff]  }
 0x14b   :  { %v9100_v6 = vld [vmem:[%s12356_s4 + $0x8] sm:$0xff]  }
 0x14d   :  { %2246 = vmatpush1.bf16.msra.mxu1 %v8902_v11  ;;  %2399 = vmatpush1.bf16.msra.mxu0 %v8905_v12  ;;  %v8961_v11 = vld [vmem:[%s12354_s6 + $0x44] ss:$24 sps:$4 sm:$0xff]   ;;  %v373_v12 = vmax.f32 %v351_v8, 0.0  ;;  %v9102_v8 = vld [vmem:[%s12356_s4 + $0x10] sm:$0xff]  }
 0x14e   :  { %2247 = vmatprep.subr.bf16.mxu1 %v8910_v13  ;;  %2400 = vmatprep.subr.bf16.mxu0 %v8913_v15  ;;  %v8962_v15 = vld [vmem:[%s12354_s6 + $0x70] ss:$24 sps:$4 sm:$0xff]  }
 0x14f   :  { %v10464_v13 = vpack.c.bf16 %v373_v12, %v373_v12  ;;  %v9013_v12 = vld [vmem:[%s12354_s6 + $0x3a0] ss:$24 sps:$4 sm:$0xff]  }
 0x151   :  { %2248 = vmatpush1.bf16.msra.mxu1 %v8908_v18  ;;  %2401 = vmatpush1.bf16.msra.mxu0 %v8911_v19  ;;  %v8967_v18 = vld [vmem:[%s12354_s6 + $0xa4] ss:$24 sps:$4 sm:$0xff]   ;;  %v8965_v19 = vld [vmem:[%s12354_s6 + $0xa0] ss:$24 sps:$4 sm:$0xff]  }
 0x152   :  { %2249 = vmatprep.subr.bf16.mxu1 %v8916_v20  ;;  %2402 = vmatprep.subr.bf16.mxu0 %v8919_v21  ;;  %v8970_v20 = vld [vmem:[%s12354_s6 + $0xd4] ss:$24 sps:$4 sm:$0xff]   ;;  %v8968_v21 = vld [vmem:[%s12354_s6 + $0xd0] ss:$24 sps:$4 sm:$0xff]  }
 0x155   :  { %2250 = vmatpush1.bf16.msra.mxu1 %v8914_v22  ;;  %2403 = vmatpush1.bf16.msra.mxu0 %v8917_v23  ;;  %v8973_v22 = vld [vmem:[%s12354_s6 + $0x104] ss:$24 sps:$4 sm:$0xff]   ;;  %v8976_v23 = vld [vmem:[%s12354_s6 + $0x134] ss:$24 sps:$4 sm:$0xff]  }
 0x156   :  { %2251 = vmatprep.subr.bf16.mxu1 %v8922_v24  ;;  %2404 = vmatprep.subr.bf16.mxu0 %v8925_v25  ;;  %v8974_v24 = vld [vmem:[%s12354_s6 + $0x130] ss:$24 sps:$4 sm:$0xff]   ;;  %v8979_v25 = vld [vmem:[%s12354_s6 + $0x164] ss:$24 sps:$4 sm:$0xff]  }
 0x159   :  { %2252 = vmatpush1.bf16.msra.mxu1 %v8920_v60  ;;  %2405 = vmatpush1.bf16.msra.mxu0 %v8923_v58  ;;  %v8977_v60 = vld [vmem:[%s12354_s6 + $0x160] ss:$24 sps:$4 sm:$0xff]   ;;  %v8982_v58 = vld [vmem:[%s12354_s6 + $0x194] ss:$24 sps:$4 sm:$0xff]  }
 0x15a   :  { %2253 = vmatprep.subr.bf16.mxu1 %v8928_v26  ;;  %2406 = vmatprep.subr.bf16.mxu0 %v8931_v27  ;;  %v8980_v26 = vld [vmem:[%s12354_s6 + $0x190] ss:$24 sps:$4 sm:$0xff]   ;;  %v8985_v27 = vld [vmem:[%s12354_s6 + $0x1c4] ss:$24 sps:$4 sm:$0xff]  }
 0x15d   :  { %2254 = vmatpush1.bf16.msra.mxu1 %v8926_v28  ;;  %2407 = vmatpush1.bf16.msra.mxu0 %v8929_v29  ;;  %v8983_v28 = vld [vmem:[%s12354_s6 + $0x1c0] ss:$24 sps:$4 sm:$0xff]   ;;  %v8988_v29 = vld [vmem:[%s12354_s6 + $0x1f4] ss:$24 sps:$4 sm:$0xff]  }
 0x15e   :  { %2255 = vmatprep.subr.bf16.mxu1 %v8934_v59  ;;  %2408 = vmatprep.subr.bf16.mxu0 %v8937_v30  ;;  %v8986_v59 = vld [vmem:[%s12354_s6 + $0x1f0] ss:$24 sps:$4 sm:$0xff]   ;;  %v8991_v30 = vld [vmem:[%s12354_s6 + $0x224] ss:$24 sps:$4 sm:$0xff]  }
 0x161   :  { %2256 = vmatpush1.bf16.msra.mxu1 %v8932_v31  ;;  %2409 = vmatpush1.bf16.msra.mxu0 %v8935_v32  ;;  %v8989_v31 = vld [vmem:[%s12354_s6 + $0x220] ss:$24 sps:$4 sm:$0xff]   ;;  %v8994_v32 = vld [vmem:[%s12354_s6 + $0x254] ss:$24 sps:$4 sm:$0xff]  }
 0x162   :  { %2257 = vmatprep.subr.bf16.mxu1 %v8940_v33  ;;  %2410 = vmatprep.subr.bf16.mxu0 %v8943_v36  ;;  %v8992_v33 = vld [vmem:[%s12354_s6 + $0x250] ss:$24 sps:$4 sm:$0xff]   ;;  %v8997_v36 = vld [vmem:[%s12354_s6 + $0x284] ss:$24 sps:$4 sm:$0xff]  }
 0x165   :  { %2258 = vmatpush1.bf16.msra.mxu1 %v8938_v39  ;;  %2411 = vmatpush1.bf16.msra.mxu0 %v8941_v40  ;;  %v8995_v39 = vld [vmem:[%s12354_s6 + $0x280] ss:$24 sps:$4 sm:$0xff]   ;;  %v9000_v40 = vld [vmem:[%s12354_s6 + $0x2b4] ss:$24 sps:$4 sm:$0xff]  }
 0x166   :  { %2259 = vmatprep.subr.bf16.mxu1 %v8946_v41  ;;  %2412 = vmatprep.subr.bf16.mxu0 %v8949_v42  ;;  %v8998_v41 = vld [vmem:[%s12354_s6 + $0x2b0] ss:$24 sps:$4 sm:$0xff]   ;;  %v9003_v42 = vld [vmem:[%s12354_s6 + $0x2e4] ss:$24 sps:$4 sm:$0xff]  }
 0x169   :  { %2260 = vmatpush1.bf16.msra.mxu1 %v8944_v43  ;;  %2413 = vmatpush1.bf16.msra.mxu0 %v8947_v48  ;;  %v9001_v43 = vld [vmem:[%s12354_s6 + $0x2e0] ss:$24 sps:$4 sm:$0xff]   ;;  %v9006_v48 = vld [vmem:[%s12354_s6 + $0x314] ss:$24 sps:$4 sm:$0xff]  }
 0x16a   :  { %7756 = vmatprep.subr.msk.bf16.mxu1 %vm2112_vm3, %v8950_v49  ;;  %7759 = vmatprep.subr.msk.bf16.mxu0 %vm2112_vm3, %v8952_v50  ;;  %v9004_v49 = vld [vmem:[%s12354_s6 + $0x310] ss:$24 sps:$4 sm:$0xff]   ;;  %v9097_v50 = vld [vmem:[%s12356_s4 + $0x40] sm:$0xff]  }
 0x16d   :  { %2262 = vmatpush1.bf16.msra.mxu1 %v2114_v4  ;;  %2415 = vmatpush1.bf16.msra.mxu0 %v2120_v3  ;;  %v9007_v4 = vld [vmem:[%s12354_s6 + $0x340] ss:$24 sps:$4 sm:$0xff]   ;;  %v9012_v3 = vld [vmem:[%s12354_s6 + $0x374] ss:$24 sps:$4 sm:$0xff]  }
 0x16e   :  { %2437 = vmatprep.subr.bf16.mxu1 %v8958_v7  ;;  %8191 = vmatprep.subr.bf16.mxu0 %v9097_v50  ;;  %v9101_v7 = vld [vmem:[%s12356_s4 + $0x50] sm:$0xff]  }
 0x16f   :  { %v9054_v50 = vld [vmem:[%s12354_s6 + $0x614] ss:$24 sps:$4 sm:$0xff]  }
 0x170   :  { %2266 = vmatmul.mubr.bf16.vlgmr.msra.gmra.mrb[12].mxu1 %v10065_v54  ;;  %2419 = vmatmul.mubr.bf16.vlgmr.msra.gmra.mrb[12].mxu0 %v10065_v54 }
 0x171   :  { %2438 = vmatpush1.bf16.msra.mxu1 %v8956_v10  ;;  %7758 = vmatprep.mubr.msk.bf16.mxu1 %vm2105_vm2, %v10444_v9  ;;  %v9015_v10 = vld [vmem:[%s12354_s6 + $0x3a4] ss:$24 sps:$4 sm:$0xff]  }
 0x172   :  { %2439 = vmatprep.subr.bf16.mxu1 %v8961_v11  ;;  %7761 = vmatprep.mubr.msk.bf16.mxu0 %vm2105_vm2, %v10444_v9  ;;  %v9104_v11 = vld [vmem:[%s12356_s4 + $0x18] sm:$0xff]  }
 0x173   :  { %8192 = vmatpush3.bf16.msra.mxu0 %v9098_v57  ;;  %v9057_v57 = vld [vmem:[%s12354_s6 + $0x644] ss:$24 sps:$4 sm:$0xff]  }
 0x174   :  { %8193 = vmatprep.subr.bf16.mxu0 %v9099_v63  ;;  %v9055_v63 = vld [vmem:[%s12354_s6 + $0x640] ss:$24 sps:$4 sm:$0xff]  }
 0x175   :  { %2440 = vmatpush1.bf16.msra.mxu1 %v8959_v0  ;;  %v9105_v0 = vld [vmem:[%s12356_s4 + $0x60] sm:$0xff]  }
 0x176   :  { %2441 = vmatprep.subr.bf16.mxu1 %v8964_v62  ;;  %v9018_v62 = vld [vmem:[%s12354_s6 + $0x3d4] ss:$24 sps:$4 sm:$0xff]  }
 0x177   :  { %8194 = vmatpush3.bf16.msra.mxu0 %v9100_v6  ;;  %v9060_v6 = vld [vmem:[%s12354_s6 + $0x674] ss:$24 sps:$4 sm:$0xff]  }
 0x178   :  { %2276 = vmatmul.mubr.bf16.gmra.mrb[16].mxu1 %v10464_v13  ;;  %2429 = vmatmul.mubr.bf16.gmra.mrb[16].mxu0 %v10464_v13 }
 0x179   :  { %2442 = vmatpush1.bf16.msra.mxu1 %v8962_v15  ;;  %2469 = vmatprep.mubr.bf16.mxu1 %v10009_v5  ;;  %v8971_v5 = vld [vmem:[%s12354_s6 + $0x100] ss:$24 sps:$4 sm:$0xff]  }
 0x17a   :  { %2443 = vmatprep.subr.bf16.mxu1 %v8967_v18  ;;  %8195 = vmatprep.subr.bf16.mxu0 %v9101_v7  ;;  %v9106_v15 = vld [vmem:[%s12356_s4 + $0x20] sm:$0xff]   ;;  %v9107_v18 = vld [vmem:[%s12356_s4 + $0x68] sm:$0xff]  }
 0x17b   :  { %8196 = vmatpush3.bf16.msra.mxu0 %v9102_v8  ;;  %v9064_v7 = vld [vmem:[%s12354_s6 + $0x6d0] ss:$24 sps:$4 sm:$0xff]   ;;  %v9072_v8 = vld [vmem:[%s12354_s6 + $0x734] ss:$24 sps:$4 sm:$0xff]  }
 0x17d   :  { %2444 = vmatpush1.bf16.msra.mxu1 %v8965_v19  ;;  %v9021_v19 = vld [vmem:[%s12354_s6 + $0x404] ss:$24 sps:$4 sm:$0xff]  }
 0x17e   :  { %2445 = vmatprep.subr.bf16.mxu1 %v8970_v20  ;;  %v9108_v20 = vld [vmem:[%s12356_s4 + $0x28] sm:$0xff]  }
 0x181   :  { %2446 = vmatpush1.bf16.msra.mxu1 %v8968_v21  ;;  %v9024_v21 = vld [vmem:[%s12354_s6 + $0x434] ss:$24 sps:$4 sm:$0xff]  }
 0x182   :  { %2447 = vmatprep.subr.bf16.mxu1 %v8973_v22  ;;  %v9022_v22 = vld [vmem:[%s12354_s6 + $0x430] ss:$24 sps:$4 sm:$0xff]  }
 0x185   :  { %2448 = vmatpush1.bf16.msra.mxu1 %v8971_v5  ;;  %v9109_v5 = vld [vmem:[%s12356_s4 + $0x70] sm:$0xff]  }
 0x186   :  { %2449 = vmatprep.subr.bf16.mxu1 %v8976_v23  ;;  %v9027_v23 = vld [vmem:[%s12354_s6 + $0x464] ss:$24 sps:$4 sm:$0xff]  }
 0x189   :  { %2450 = vmatpush1.bf16.msra.mxu1 %v8974_v24  ;;  %v9110_v24 = vld [vmem:[%s12356_s4 + $0x30] sm:$0xff]  }
 0x18a   :  { %2451 = vmatprep.subr.bf16.mxu1 %v8979_v25  ;;  %v9025_v25 = vld [vmem:[%s12354_s6 + $0x460] ss:$24 sps:$4 sm:$0xff]  }
 0x18d   :  { %2452 = vmatpush1.bf16.msra.mxu1 %v8977_v60  ;;  %v9111_v60 = vld [vmem:[%s12356_s4 + $0x78] sm:$0xff]  }
 0x18e   :  { %2453 = vmatprep.subr.bf16.mxu1 %v8982_v58  ;;  %v9030_v58 = vld [vmem:[%s12354_s6 + $0x494] ss:$24 sps:$4 sm:$0xff]  }
 0x191   :  { %2454 = vmatpush1.bf16.msra.mxu1 %v8980_v26  ;;  %v9112_v26 = vld [vmem:[%s12356_s4 + $0x38] sm:$0xff]  }
 0x192   :  { %2455 = vmatprep.subr.bf16.mxu1 %v8985_v27  ;;  %v9028_v27 = vld [vmem:[%s12354_s6 + $0x490] ss:$24 sps:$4 sm:$0xff]  }
 0x195   :  { %2456 = vmatpush1.bf16.msra.mxu1 %v8983_v28  ;;  %v9113_v28 = vld [vmem:[%s12356_s4 + $0xc0] sm:$0xff]  }
 0x196   :  { %2457 = vmatprep.subr.bf16.mxu1 %v8988_v29  ;;  %v9033_v29 = vld [vmem:[%s12354_s6 + $0x4c4] ss:$24 sps:$4 sm:$0xff]  }
 0x199   :  { %2458 = vmatpush1.bf16.msra.mxu1 %v8986_v59  ;;  %v9031_v59 = vld [vmem:[%s12354_s6 + $0x4c0] ss:$24 sps:$4 sm:$0xff]  }
 0x19a   :  { %2459 = vmatprep.subr.bf16.mxu1 %v8991_v30  ;;  %v9036_v30 = vld [vmem:[%s12354_s6 + $0x4f4] ss:$24 sps:$4 sm:$0xff]  }
 0x19d   :  { %2460 = vmatpush1.bf16.msra.mxu1 %v8989_v31  ;;  %v9034_v31 = vld [vmem:[%s12354_s6 + $0x4f0] ss:$24 sps:$4 sm:$0xff]  }
 0x19e   :  { %2461 = vmatprep.subr.bf16.mxu1 %v8994_v32  ;;  %v9039_v32 = vld [vmem:[%s12354_s6 + $0x524] ss:$24 sps:$4 sm:$0xff]  }
 0x1a1   :  { %2462 = vmatpush1.bf16.msra.mxu1 %v8992_v33  ;;  %v9037_v33 = vld [vmem:[%s12354_s6 + $0x520] ss:$24 sps:$4 sm:$0xff]  }
 0x1a2   :  { %2463 = vmatprep.subr.bf16.mxu1 %v8997_v36  ;;  %v9042_v36 = vld [vmem:[%s12354_s6 + $0x554] ss:$24 sps:$4 sm:$0xff]  }
 0x1a5   :  { %2464 = vmatpush1.bf16.msra.mxu1 %v8995_v39  ;;  %v9040_v39 = vld [vmem:[%s12354_s6 + $0x550] ss:$24 sps:$4 sm:$0xff]  }
 0x1a6   :  { %2465 = vmatprep.subr.bf16.mxu1 %v9000_v40  ;;  %v9045_v40 = vld [vmem:[%s12354_s6 + $0x584] ss:$24 sps:$4 sm:$0xff]  }
 0x1a9   :  { %2466 = vmatpush1.bf16.msra.mxu1 %v8998_v41  ;;  %v9043_v41 = vld [vmem:[%s12354_s6 + $0x580] ss:$24 sps:$4 sm:$0xff]  }
 0x1aa   :  { %2467 = vmatprep.subr.bf16.mxu1 %v9003_v42  ;;  %v9048_v42 = vld [vmem:[%s12354_s6 + $0x5b4] ss:$24 sps:$4 sm:$0xff]  }
 0x1ad   :  { %2468 = vmatpush1.bf16.msra.mxu1 %v9001_v43  ;;  %v9046_v43 = vld [vmem:[%s12354_s6 + $0x5b0] ss:$24 sps:$4 sm:$0xff]  }
 0x1ae   :  { %2488 = vmatprep.subr.bf16.mxu1 %v9006_v48  ;;  %v9051_v48 = vld [vmem:[%s12354_s6 + $0x5e4] ss:$24 sps:$4 sm:$0xff]  }
 0x1b0   :  { %2470 = vmatmul.mubr.bf16.vlgmr.msra.gmra.mrb[20].mxu1 %v10004_v2  ;;  %v9103_v2 = vld [vmem:[%s12356_s4 + $0x58] sm:$0xff]  }
 0x1b1   :  { %2479 = vmatprep.mubr.bf16.mxu1 %v10026_v14  ;;  %2489 = vmatpush1.bf16.msra.mxu1 %v9004_v49  ;;  %v9010_v14 = vld [vmem:[%s12354_s6 + $0x370] ss:$24 sps:$4 sm:$0xff]   ;;  %v9049_v49 = vld [vmem:[%s12354_s6 + $0x5e0] ss:$24 sps:$4 sm:$0xff]  }
 0x1b2   :  { %2490 = vmatprep.subr.bf16.mxu1 %v9009_v56  ;;  %8197 = vmatprep.subr.bf16.mxu0 %v9103_v2  ;;  %v9052_v56 = vld [vmem:[%s12354_s6 + $0x610] ss:$24 sps:$4 sm:$0xff]  }
 0x1b3   :  { %8198 = vmatpush3.bf16.msra.mxu0 %v9104_v11  ;;  %v9070_v2 = vld [vmem:[%s12354_s6 + $0x730] ss:$24 sps:$4 sm:$0xff]   ;;  %v9078_v11 = vld [vmem:[%s12354_s6 + $0x794] ss:$24 sps:$4 sm:$0xff]  }
 0x1b4   :  { %8199 = vmatprep.subr.bf16.mxu0 %v9105_v0  ;;  %v9081_v0 = vld [vmem:[%s12354_s6 + $0x7c4] ss:$24 sps:$4 sm:$0xff]  }
 0x1b5   :  { %2491 = vmatpush1.bf16.msra.mxu1 %v9007_v4  ;;  %v9058_v4 = vld [vmem:[%s12354_s6 + $0x670] ss:$24 sps:$4 sm:$0xff]  }
 0x1b6   :  { %2492 = vmatprep.subr.bf16.mxu1 %v9012_v3  ;;  %v9066_v3 = vld [vmem:[%s12354_s6 + $0x6d4] ss:$24 sps:$4 sm:$0xff]  }
 0x1b7   :  { %8200 = vmatpush3.bf16.msra.mxu0 %v9106_v15  ;;  %v9084_v15 = vld [vmem:[%s12354_s6 + $0x7f4] ss:$24 sps:$4 sm:$0xff]  }
 0x1b8   :  { %2480 = vmatmul.mubr.bf16.gmra.mrb[24].mxu1 %v10051_v44  ;;  %v9016_v44 = vld [vmem:[%s12354_s6 + $0x3d0] ss:$24 sps:$4 sm:$0xff]   ;;  %8201 = vmatprep.subr.bf16.mxu0 %v9107_v18 }
 0x1b9   :  { %2493 = vmatpush1.bf16.msra.mxu1 %v9010_v14  ;;  %2520 = vmatprep.mubr.bf16.mxu1 %v10061_v52  ;;  %v9019_v52 = vld [vmem:[%s12354_s6 + $0x400] ss:$24 sps:$4 sm:$0xff]   ;;  %v9075_v14 = vld [vmem:[%s12354_s6 + $0x764] ss:$24 sps:$4 sm:$0xff]   ;;  %v9082_v18 = vld [vmem:[%s12354_s6 + $0x7f0] ss:$24 sps:$4 sm:$0xff]  }
 0x1ba   :  { %2494 = vmatprep.subr.bf16.mxu1 %v9015_v10  ;;  %v9073_v10 = vld [vmem:[%s12354_s6 + $0x760] ss:$24 sps:$4 sm:$0xff]  }
 0x1bb   :  { %8202 = vmatpush3.bf16.msra.mxu0 %v9108_v20  ;;  %v9090_v20 = vld [vmem:[%s12354_s6 + $0x854] ss:$24 sps:$4 sm:$0xff]  }
 0x1bc   :  { %8203 = vmatprep.subr.bf16.mxu0 %v9109_v5  ;;  %v9094_v5 = vld [vmem:[%s12354_s6 + $0x8b4] ss:$24 sps:$4 sm:$0x7f]  }
 0x1bd   :  { %2495 = vmatpush1.bf16.msra.mxu1 %v9013_v12  ;;  %v9076_v12 = vld [vmem:[%s12354_s6 + $0x790] ss:$24 sps:$4 sm:$0xff]  }
 0x1be   :  { %2496 = vmatprep.subr.bf16.mxu1 %v9018_v62  ;;  %v9079_v62 = vld [vmem:[%s12354_s6 + $0x7c0] ss:$24 sps:$4 sm:$0xff]  }
 0x1bf   :  { %8204 = vmatpush3.bf16.msra.mxu0 %v9110_v24 }
 0x1c0   :  { %8205 = vmatprep.subr.bf16.mxu0 %v9111_v60 }
 0x1c1   :  { %2497 = vmatpush1.bf16.msra.mxu1 %v9016_v44  ;;  %v9087_v44 = vld [vmem:[%s12354_s6 + $0x824] ss:$24 sps:$4 sm:$0xff]  }
 0x1c2   :  { %2498 = vmatprep.subr.bf16.mxu1 %v9021_v19  ;;  %v9085_v19 = vld [vmem:[%s12354_s6 + $0x820] ss:$24 sps:$4 sm:$0xff]  }
 0x1c3   :  { %8206 = vmatpush3.bf16.msra.mxu0 %v9112_v26 }
 0x1c4   :  { %8219 = vmatprep.subr.bf16.mxu0 %v9113_v28 }
 0x1c5   :  { %2499 = vmatpush1.bf16.msra.mxu1 %v9019_v52  ;;  %v9088_v52 = vld [vmem:[%s12354_s6 + $0x850] ss:$24 sps:$4 sm:$0xff]  }
 0x1c6   :  { %2500 = vmatprep.subr.bf16.mxu1 %v9024_v21  ;;  %v9093_v21 = vld [vmem:[%s12354_s6 + $0x884] ss:$24 sps:$4 sm:$0xff]  }
 0x1c9   :  { %2501 = vmatpush1.bf16.msra.mxu1 %v9022_v22  ;;  %v9091_v22 = vld [vmem:[%s12354_s6 + $0x880] ss:$24 sps:$4 sm:$0xff]  }
 0x1ca   :  { %2502 = vmatprep.subr.bf16.mxu1 %v9027_v23  ;;  %v9096_v23 = vld [vmem:[%s12354_s6 + $0x8b0] ss:$24 sps:$4 sm:$0x7f]  }
 0x1cb   :  { %v2126_v24 = vsel %vm2112_vm3, %v9096_v23, 0  ;;  %v9119_v23 = vld [vmem:[%s12356_s4 + $0xd8] sm:$0xff]  }
 0x1cd   :  { %2503 = vmatpush1.bf16.msra.mxu1 %v9025_v25  ;;  %v10805_v25 = vld [vmem:[%s12357_s28] sm:$0x3f] }
 0x1ce   :  { %2504 = vmatprep.subr.bf16.mxu1 %v9030_v58  ;;  %v674_v60 = vrot.slane %v10805_v25, %v9973_v35  ;;  %v10811_v58 = vrot.slane %v10805_v25, %v9984_v45 }
 0x1d1   :  { %2505 = vmatpush1.bf16.msra.mxu1 %v9028_v27 }
 0x1d2   :  { %2506 = vmatprep.subr.bf16.mxu1 %v9033_v29 }
 0x1d5   :  { %2507 = vmatpush1.bf16.msra.mxu1 %v9031_v59 }
 0x1d6   :  { %2508 = vmatprep.subr.bf16.mxu1 %v9036_v30 }
 0x1d9   :  { %2509 = vmatpush1.bf16.msra.mxu1 %v9034_v31 }
 0x1da   :  { %2510 = vmatprep.subr.bf16.mxu1 %v9039_v32 }
 0x1dd   :  { %2511 = vmatpush1.bf16.msra.mxu1 %v9037_v33 }
 0x1de   :  { %2512 = vmatprep.subr.bf16.mxu1 %v9042_v36 }
 0x1e1   :  { %2513 = vmatpush1.bf16.msra.mxu1 %v9040_v39 }
 0x1e2   :  { %2514 = vmatprep.subr.bf16.mxu1 %v9045_v40 }
 0x1e5   :  { %2515 = vmatpush1.bf16.msra.mxu1 %v9043_v41 }
 0x1e6   :  { %2516 = vmatprep.subr.bf16.mxu1 %v9048_v42 }
 0x1e9   :  { %2517 = vmatpush1.bf16.msra.mxu1 %v9046_v43 }
 0x1ea   :  { %2518 = vmatprep.subr.bf16.mxu1 %v9051_v48 }
 0x1ed   :  { %2519 = vmatpush1.bf16.msra.mxu1 %v9049_v49 }
 0x1ee   :  { %2539 = vmatprep.subr.bf16.mxu1 %v9054_v50 }
 0x1f0   :  { %2521 = vmatmul.mubr.bf16.vlgmr.msra.gmra.mrb[20].mxu1 %v10053_v47  ;;  %v9063_v47 = vld [vmem:[%s12354_s6 + $0x6a4] ss:$24 sps:$4 sm:$0xff]  }
 0x1f1   :  { %2530 = vmatprep.mubr.bf16.mxu1 %v10257_v53  ;;  %2540 = vmatpush1.bf16.msra.mxu1 %v9052_v56  ;;  %v9061_v53 = vld [vmem:[%s12354_s6 + $0x6a0] ss:$24 sps:$4 sm:$0xff]  }
 0x1f2   :  { %2541 = vmatprep.subr.bf16.mxu1 %v9057_v57 }
 0x1f5   :  { %2542 = vmatpush1.bf16.msra.mxu1 %v9055_v63 }
 0x1f6   :  { %2543 = vmatprep.subr.bf16.mxu1 %v9060_v6 }
 0x1f8   :  { %2531 = vmatmul.mubr.bf16.gmra.mrb[24].mxu1 %v10275_v38  ;;  %v9069_v38 = vld [vmem:[%s12354_s6 + $0x704] ss:$24 sps:$4 sm:$0xff]  }
 0x1f9   :  { %2544 = vmatpush1.bf16.msra.mxu1 %v9058_v4  ;;  %7763 = vmatprep.mubr.msk.bf16.mxu1 %vm2105_vm2, %v10075_v61  ;;  %v9067_v61 = vld [vmem:[%s12354_s6 + $0x700] ss:$24 sps:$4 sm:$0xff]  }
 0x1fa   :  { %2545 = vmatprep.subr.bf16.mxu1 %v9063_v47 }
 0x1fd   :  { %2546 = vmatpush1.bf16.msra.mxu1 %v9061_v53 }
 0x1fe   :  { %2547 = vmatprep.subr.bf16.mxu1 %v9066_v3 }
 0x201   :  { %2548 = vmatpush1.bf16.msra.mxu1 %v9064_v7 }
 0x202   :  { %2549 = vmatprep.subr.bf16.mxu1 %v9069_v38 }
 0x205   :  { %2550 = vmatpush1.bf16.msra.mxu1 %v9067_v61 }
 0x206   :  { %2551 = vmatprep.subr.bf16.mxu1 %v9072_v8  ;;  %v9114_v8 = vld [vmem:[%s12356_s4 + $0x80] sm:$0xff]  }
 0x209   :  { %2552 = vmatpush1.bf16.msra.mxu1 %v9070_v2 }
 0x20a   :  { %2553 = vmatprep.subr.bf16.mxu1 %v9075_v14 }
 0x20d   :  { %2554 = vmatpush1.bf16.msra.mxu1 %v9073_v10 }
 0x20e   :  { %2555 = vmatprep.subr.bf16.mxu1 %v9078_v11  ;;  %v9115_v11 = vld [vmem:[%s12356_s4 + $0xc8] sm:$0xff]  }
 0x211   :  { %2556 = vmatpush1.bf16.msra.mxu1 %v9076_v12 }
 0x212   :  { %2557 = vmatprep.subr.bf16.mxu1 %v9081_v0 }
 0x215   :  { %2558 = vmatpush1.bf16.msra.mxu1 %v9079_v62 }
 0x216   :  { %2559 = vmatprep.subr.bf16.mxu1 %v9084_v15 }
 0x219   :  { %2560 = vmatpush1.bf16.msra.mxu1 %v9082_v18 }
 0x21a   :  { %2561 = vmatprep.subr.bf16.mxu1 %v9087_v44 }
 0x21d   :  { %2562 = vmatpush1.bf16.msra.mxu1 %v9085_v19  ;;  %v9116_v19 = vld [vmem:[%s12356_s4 + $0x88] sm:$0xff]  }
 0x21e   :  { %2563 = vmatprep.subr.bf16.mxu1 %v9090_v20 }
 0x221   :  { %2564 = vmatpush1.bf16.msra.mxu1 %v9088_v52  ;;  %v9117_v52 = vld [vmem:[%s12356_s4 + $0xd0] sm:$0xff]  }
 0x222   :  { %2565 = vmatprep.subr.bf16.mxu1 %v9093_v21 }
 0x225   :  { %2566 = vmatpush1.bf16.msra.mxu1 %v9091_v22  ;;  %v9118_v22 = vld [vmem:[%s12356_s4 + $0x90] sm:$0xff]  }
 0x226   :  { %7762 = vmatprep.subr.msk.bf16.mxu1 %vm2112_vm3, %v9094_v5 }
 0x229   :  { %2568 = vmatpush1.bf16.msra.mxu1 %v2126_v24  ;;  %v9120_v24 = vld [vmem:[%s12356_s4 + $0x98] sm:$0xff]  }
 0x22c   :  { %2572 = vmatmul.mubr.bf16.vlgmr.msra.gmra.mrb[20].mxu1 %v10065_v54  ;;  %v678_v54 = vrot.slane %v10805_v25, %v9979_v37 }
 0x22d   :  { %7764 = vmatprep.mubr.msk.bf16.mxu1 %vm2105_vm2, %v10444_v9  ;;  %v10817_v9 = vrot.slane %v10805_v25, %v9987_v46 }
 0x234   :  { %2582 = vmatmul.mubr.bf16.gmra.mrb[24].mxu1 %v10464_v13 }
 0x243   :  { %v2267_v13 = vpop.f32.mrb[12].mxu1  ;;  %v2420_v26 = vpop.f32.mrb[12].mxu0 }
 0x244   :  { %v8520_v27 = vadd.f32 %v2267_v13, %v674_v60  ;;  %v8526_v28 = vadd.f32 %v2420_v26, %v10811_v58  ;;  %v2269_v29 = vpop.f32.mrb[13].mxu1  ;;  %v2422_v59 = vpop.f32.mrb[13].mxu0  ;;  %v9123_v13 = vld [vmem:[%s12356_s4 + $0xe8] sm:$0xff]  }
 0x245   :  { %v8521_v30 = vadd.f32 %v2269_v29, %v678_v54  ;;  %v8527_v31 = vadd.f32 %v2422_v59, %v10817_v9  ;;  %v2271_v32 = vpop.f32.mrb[14].mxu1  ;;  %v2424_v33 = vpop.f32.mrb[14].mxu0  ;;  %v9124_v26 = vld [vmem:[%s12356_s4 + $0xa8] sm:$0xff]   ;;  %v9127_v29 = vld [vmem:[%s12356_s4 + $0xf8] sm:$0xff]  }
 0x246   :  { %v8522_v36 = vadd.f32 %v2271_v32, %v674_v60  ;;  %v8528_v39 = vadd.f32 %v2424_v33, %v10811_v58  ;;  %v2273_v40 = vpop.f32.mrb[15].mxu1  ;;  %v2426_v41 = vpop.f32.mrb[15].mxu0  ;;  %v2590_v48 = vmax.f32 %v8520_v27, 0.0  ;;  %v2592_v49 = vmax.f32 %v8526_v28, 0.0  ;;  %v9125_v27 = vld [vmem:[%s12356_s4 + $0xf0] sm:$0xff]   ;;  %v9129_v32 = vld [vmem:[%s12356_s4 + $0x100] sm:$0xff]  }
 0x247   :  { %v8523_v42 = vadd.f32 %v2273_v40, %v678_v54  ;;  %v8529_v43 = vadd.f32 %v2426_v41, %v10817_v9  ;;  %v2591_v57 = vmax.f32 %v8521_v30, 0.0  ;;  %v2593_v63 = vmax.f32 %v8527_v31, 0.0  ;;  %v9126_v28 = vld [vmem:[%s12356_s4 + $0xb0] sm:$0xff]   ;;  %v9128_v30 = vld [vmem:[%s12356_s4 + $0xb8] sm:$0xff]  }
 0x248   :  { %v2596_v50 = vmax.f32 %v8522_v36, 0.0  ;;  %v2598_v56 = vmax.f32 %v8528_v39, 0.0  ;;  %v9131_v40 = vld [vmem:[%s12356_s4 + $0x110] sm:$0xff]  }
 0x249   :  { %v2597_v6 = vmax.f32 %v8523_v42, 0.0  ;;  %v2599_v4 = vmax.f32 %v8529_v43, 0.0  ;;  %v9133_v42 = vld [vmem:[%s12356_s4 + $0x120] sm:$0xff]   ;;  %v9134_v43 = vld [vmem:[%s12356_s4 + $0x128] sm:$0xff]  }
 0x24a   :  { %v2608_v47 = vpack.c.bf16 %v2596_v50, %v2590_v48  ;;  %v2610_v53 = vpack.c.bf16 %v2598_v56, %v2592_v49  ;;  %v9135_v48 = vld [vmem:[%s12356_s4 + $0x130] sm:$0xff]   ;;  %v9136_v49 = vld [vmem:[%s12356_s4 + $0x138] sm:$0xff]   ;;  %v9137_v50 = vld [vmem:[%s12356_s4 + $0x140] sm:$0xff]  }
 0x24b   :  { %v2609_v3 = vpack.c.bf16 %v2597_v6, %v2591_v57  ;;  %v2611_v7 = vpack.c.bf16 %v2599_v4, %v2593_v63  ;;  %v2277_v38 = vpop.f32.mrb[16].mxu1  ;;  %v2430_v61 = vpop.f32.mrb[16].mxu0  ;;  %v9138_v56 = vld [vmem:[%s12356_s4 + $0x148] sm:$0xff]   ;;  %v9139_v57 = vld [vmem:[%s12356_s4 + $0x150] sm:$0xff]   ;;  %v9140_v63 = vld [vmem:[%s12356_s4 + $0x158] sm:$0xff]  }
 0x24c   :  { %v8524_v2 = vadd.f32 %v2277_v38, %v674_v60  ;;  %v2279_v14 = vpop.f32.mrb[17].mxu1  ;;  %v2432_v10 = vpop.f32.mrb[17].mxu0  ;;  %v9121_v60 = vld [vmem:[%s12356_s4 + $0xe0] sm:$0xff]   ;;  %v8530_v33 = vadd.f32 %v2430_v61, %v10811_v58  ;;  %v9132_v58 = vld [vmem:[%s12356_s4 + $0x118] sm:$0xff]   ;;  %v9142_v4 = vld [vmem:[%s12356_s4 + $0x168] sm:$0xff]  }
 0x24d   :  { %v8525_v12 = vadd.f32 %v2279_v14, %v678_v54  ;;  %v2281_v0 = vpop.f32.mrb[18].mxu1  ;;  %v2434_v62 = vpop.f32.mrb[18].mxu0  ;;  %3043 = vmatprep.mubr.bf16.mxu0 %v2609_v3  ;;  %v9122_v54 = vld [vmem:[%s12356_s4 + $0xa0] sm:$0xff]   ;;  %v8531_v59 = vadd.f32 %v2432_v10, %v10817_v9  ;;  %v9130_v9 = vld [vmem:[%s12356_s4 + $0x108] sm:$0xff]   ;;  %v690_v3 = vrot.slane %v10805_v25, %v9990_v51 }
 0x24e   :  { %v2282_v15 = vpop.f32.mrb[19].mxu1  ;;  %v2435_v18 = vpop.f32.mrb[19].mxu0  ;;  %3044 = vmatmul.mubr.bf16.vlgmr.msra.gmra.mrb[20].mxu0 %v2608_v47  ;;  %v2602_v20 = vmax.f32 %v8524_v2, 0.0  ;;  %v2604_v39 = vmax.f32 %v8530_v33, 0.0  ;;  %v9141_v6 = vld [vmem:[%s12356_s4 + $0x160] sm:$0xff]  }
 0x24f   :  { %v2603_v44 = vmax.f32 %v8525_v12, 0.0  ;;  %8220 = vmatpush3.bf16.msra.mxu0 %v9114_v8  ;;  %v2605_v31 = vmax.f32 %v8531_v59, 0.0  ;;  %v9143_v47 = vld [vmem:[%s12356_s4 + $0x170] sm:$0x7f]  }
 0x250   :  { %8221 = vmatprep.subr.bf16.mxu0 %v9115_v11  ;;  %v2614_v5 = vpack.c.bf16 %v2602_v20, %v2602_v20  ;;  %v2616_v41 = vpack.c.bf16 %v2604_v39, %v2604_v39 }
 0x251   :  { %v2615_v21 = vpack.c.bf16 %v2603_v44, %v2603_v44  ;;  %v2617_v36 = vpack.c.bf16 %v2605_v31, %v2605_v31 }
 0x253   :  { %8222 = vmatpush3.bf16.msra.mxu0 %v9116_v19  ;;  %3051 = vmatprep.mubr.bf16.mxu0 %v2615_v21 }
 0x254   :  { %8223 = vmatprep.subr.bf16.mxu0 %v9117_v52 }
 0x256   :  { %3052 = vmatmul.mubr.bf16.gmra.mrb[24].mxu0 %v2614_v5 }
 0x257   :  { %8224 = vmatpush3.bf16.msra.mxu0 %v9118_v22  ;;  %3091 = vmatprep.mubr.bf16.mxu0 %v2611_v7  ;;  %v694_v7 = vrot.slane %v10805_v25, %v9993_v55 }
 0x258   :  { %8225 = vmatprep.subr.bf16.mxu0 %v9119_v23 }
 0x25b   :  { %8226 = vmatpush3.bf16.msra.mxu0 %v9120_v24 }
 0x25c   :  { %8227 = vmatprep.subr.bf16.mxu0 %v9121_v60 }
 0x25f   :  { %8228 = vmatpush3.bf16.msra.mxu0 %v9122_v54 }
 0x260   :  { %8229 = vmatprep.subr.bf16.mxu0 %v9123_v13 }
 0x263   :  { %8230 = vmatpush3.bf16.msra.mxu0 %v9124_v26 }
 0x264   :  { %8231 = vmatprep.subr.bf16.mxu0 %v9125_v27 }
 0x267   :  { %8232 = vmatpush3.bf16.msra.mxu0 %v9126_v28 }
 0x268   :  { %8233 = vmatprep.subr.bf16.mxu0 %v9127_v29 }
 0x26b   :  { %8234 = vmatpush3.bf16.msra.mxu0 %v9128_v30 }
 0x26c   :  { %3107 = vmatprep.subr.bf16.mxu0 %v9578_v1 }
 0x26e   :  { %3092 = vmatmul.mubr.bf16.vlgmr.msra.gmra.mrb[28].mxu0 %v2610_v53  ;;  %v3009_v53 = vsel %vm2112_vm3, %v9143_v47, 0 }
 0x26f   :  { %3099 = vmatprep.mubr.bf16.mxu0 %v2617_v36  ;;  %3108 = vmatpush1.bf16.msra.mxu0 %v9129_v32 }
 0x270   :  { %3109 = vmatprep.subr.bf16.mxu0 %v9578_v1 }
 0x273   :  { %3110 = vmatpush1.bf16.msra.mxu0 %v9130_v9  ;;  %v7765_v9 = vld [vmem:[%s12358_s30] ss:$0 sm:$0xff] }
 0x274   :  { %3111 = vmatprep.subr.bf16.mxu0 %v9578_v1 }
 0x276   :  { %3100 = vmatmul.mubr.bf16.gmra.mrb[32].mxu0 %v2616_v41 }
 0x277   :  { %3112 = vmatpush1.bf16.msra.mxu0 %v9131_v40 }
 0x278   :  { %3113 = vmatprep.subr.bf16.mxu0 %v9578_v1 }
 0x27b   :  { %3114 = vmatpush1.bf16.msra.mxu0 %v9132_v58 }
 0x27c   :  { %3115 = vmatprep.subr.bf16.mxu0 %v9578_v1 }
 0x27f   :  { %3116 = vmatpush1.bf16.msra.mxu0 %v9133_v42 }
 0x280   :  { %3117 = vmatprep.subr.bf16.mxu0 %v9578_v1 }
 0x283   :  { %3118 = vmatpush1.bf16.msra.mxu0 %v9134_v43 }
 0x284   :  { %3119 = vmatprep.subr.bf16.mxu0 %v9578_v1 }
 0x287   :  { %3120 = vmatpush1.bf16.msra.mxu0 %v9135_v48 }
 0x288   :  { %3121 = vmatprep.subr.bf16.mxu0 %v9578_v1 }
 0x28b   :  { %3122 = vmatpush1.bf16.msra.mxu0 %v9136_v49 }
 0x28c   :  { %3123 = vmatprep.subr.bf16.mxu0 %v9578_v1 }
 0x28f   :  { %3124 = vmatpush1.bf16.msra.mxu0 %v9137_v50 }
 0x290   :  { %3125 = vmatprep.subr.bf16.mxu0 %v9578_v1 }
 0x293   :  { %3126 = vmatpush1.bf16.msra.mxu0 %v9138_v56 }
 0x294   :  { %3127 = vmatprep.subr.bf16.mxu0 %v9578_v1 }
 0x297   :  { %3128 = vmatpush1.bf16.msra.mxu0 %v9139_v57 }
 0x298   :  { %3129 = vmatprep.subr.bf16.mxu0 %v9578_v1 }
 0x29b   :  { %3130 = vmatpush1.bf16.msra.mxu0 %v9140_v63 }
 0x29c   :  { %3131 = vmatprep.subr.bf16.mxu0 %v9578_v1 }
 0x29f   :  { %3132 = vmatpush1.bf16.msra.mxu0 %v9141_v6 }
 0x2a0   :  { %3133 = vmatprep.subr.bf16.mxu0 %v9578_v1 }
 0x2a3   :  { %3134 = vmatpush1.bf16.msra.mxu0 %v9142_v4 }
 0x2a4   :  { %3135 = vmatprep.subr.bf16.mxu0 %v9578_v1 }
 0x2a7   :  { %3136 = vmatpush1.bf16.msra.mxu0 %v3009_v53 }
 0x2ff   :  { %v2573_v38 = vpop.f32.mrb[20].mxu1 }
 0x300   :  { %v8532_v61 = vadd.f32 %v2573_v38, %v690_v3  ;;  %v2575_v8 = vpop.f32.mrb[21].mxu1 }
 0x301   :  { %v8533_v2 = vadd.f32 %v2575_v8, %v694_v7  ;;  %v2577_v14 = vpop.f32.mrb[22].mxu1  ;;  %v3164_v8 = vld [vmem:[%s12359_s26] sm:$0xff] }
 0x302   :  { %v8534_v10 = vadd.f32 %v2577_v14, %v690_v3  ;;  %v2579_v11 = vpop.f32.mrb[23].mxu1  ;;  %v2594_v0 = vmax.f32 %v8532_v61, 0.0 }
 0x303   :  { %v8535_v12 = vadd.f32 %v2579_v11, %v694_v7  ;;  %v2595_v15 = vmax.f32 %v8533_v2, 0.0  ;;  %v9580_v2 = vmov 65535  }
 0x304   :  { %v2600_v62 = vmax.f32 %v8534_v10, 0.0  ;;  %v3191_v14 = vsel %vm183_vm0, 4294967295, %v9580_v2 }
 0x305   :  { %v2601_v18 = vmax.f32 %v8535_v12, 0.0  ;;  %v10955_v12 = vsel %vm3190_vm4, %v3191_v14, 0  ;;  %v9177_v14 = vld [vmem:[%s12360_s27 + $0xc4] ss:$12 sps:$4 sm:$0xff]  }
 0x306   :  { %v2612_v44 = vpack.c.bf16 %v2600_v62, %v2594_v0 }
 0x307   :  { %v2613_v19 = vpack.c.bf16 %v2601_v18, %v2595_v15  ;;  %v2583_v20 = vpop.f32.mrb[24].mxu1  ;;  %v3166_v18 = vcombine.high %v3164_v8, %v3164_v8 }
 0x308   :  { %v8536_v52 = vadd.f32 %v2583_v20, %v690_v3  ;;  %v2585_v21 = vpop.f32.mrb[25].mxu1 }
 0x309   :  { %v8537_v22 = vadd.f32 %v2585_v21, %v694_v7  ;;  %v2587_v5 = vpop.f32.mrb[26].mxu1  ;;  %7813 = vmatprep.mubr.msk.bf16.mxu0 %vm2105_vm2, %v2613_v19  ;;  %v9579_v7 = vmov 1983009808   ;;  %v9153_v21 = vld [vmem:[%s12360_s27 + $0x4] ss:$12 sps:$4 sm:$0xff]  }
 0x30a   :  { %v2588_v25 = vpop.f32.mrb[27].mxu1  ;;  %3140 = vmatmul.mubr.bf16.vlgmr.msra.gmra.mrb[36].mxu0 %v2612_v44  ;;  %v2606_v24 = vmax.f32 %v8536_v52, 0.0  ;;  %v3168_v38 = vunpack.c.l.s4 %v9579_v7  ;;  %v9151_v52 = vld [vmem:[%s12360_s27] ss:$12 sps:$4 sm:$0xff]   ;;  %4024 = vmatprep.subr.bf16.mxu1 %v9153_v21  ;;  %v9154_v5 = vld [vmem:[%s12360_s27 + $0x18] ss:$12 sps:$4 sm:$0xff]  }
 0x30b   :  { %v2607_v23 = vmax.f32 %v8537_v22, 0.0  ;;  %v9156_v22 = vld [vmem:[%s12360_s27 + $0x1c] ss:$12 sps:$4 sm:$0xff]   ;;  %4025 = vmatpush1.bf16.msra.mxu1 %v9151_v52  ;;  %v9159_v25 = vld [vmem:[%s12360_s27 + $0x34] ss:$12 sps:$4 sm:$0xff]  }
 0x30c   :  { %v2618_v54 = vpack.c.bf16 %v2606_v24, %v2606_v24  ;;  %v3169_v61 = vunpack.c.0.s8 %v3168_v38  ;;  %4026 = vmatprep.subr.bf16.mxu1 %v9156_v22  ;;  %v9162_v24 = vld [vmem:[%s12360_s27 + $0x4c] ss:$12 sps:$4 sm:$0xff]   ;;  %v9185_v21 = vld [vmem:[%s12360_s27 + $0xf0] ss:$12 sps:$4 sm:$0xff]  }
 0x30d   :  { %v2619_v60 = vpack.c.bf16 %v2607_v23, %v2607_v23  ;;  %v9157_v23 = vld [vmem:[%s12360_s27 + $0x30] ss:$12 sps:$4 sm:$0xff]   ;;  %v9188_v52 = vld [vmem:[%s12360_s27 + $0xf8] ss:$12 sps:$4 sm:$0xff]  }
 0x30e   :  { %v10952_v10 = vsub.s32 %v3169_v61, %v9970_v34  ;;  %v9150_v7 = vld [vmem:[%s12361_s1 + $0xc] ss:$16 sps:$4 sm:$0x3f]   ;;  %v9189_v22 = vld [vmem:[%s12360_s27 + $0x38] ss:$12 sps:$4 sm:$0xff]  }
 0x30f   :  { %7814 = vmatprep.mubr.msk.bf16.mxu0 %vm2105_vm2, %v2619_v60  ;;  %4027 = vmatpush1.bf16.msra.mxu1 %v9154_v5  ;;  %v9160_v60 = vld [vmem:[%s12360_s27 + $0x48] ss:$12 sps:$4 sm:$0xff]   ;;  %v9192_v5 = vld [vmem:[%s12360_s27 + $0x10c] ss:$12 sps:$4 sm:$0xff]  }
 0x310   :  { %v3173_v11 = vrot.slane %v3164_v8, %v10952_v10  ;;  %v10960_v44 = vrot.slane %v3166_v18, %v10952_v10  ;;  %4028 = vmatprep.subr.bf16.mxu1 %v9159_v25  ;;  %v9148_v8 = vld [vmem:[%s12361_s1 + $0x8] ss:$16 sps:$4 sm:$0x3f]   ;;  %v9183_v18 = vld [vmem:[%s12360_s27 + $0xe0] ss:$12 sps:$4 sm:$0xff]  }
 0x311   :  { %v9193_v25 = vld [vmem:[%s12360_s27 + $0x110] ss:$12 sps:$4 sm:$0xff]  }
 0x312   :  { %3148 = vmatmul.mubr.bf16.gmra.mrb[40].mxu0 %v2618_v54  ;;  %v3181_v0 = vcombine.high %v3173_v11, %v3173_v11  ;;  %v3194_v15 = vand.u32 %v10955_v12, %v3173_v11  ;;  %v3182_v19 = vcombine.high %v10960_v44, %v10960_v44  ;;  %v9165_v54 = vld [vmem:[%s12360_s27 + $0x64] ss:$12 sps:$4 sm:$0xff]   ;;  %v9178_v11 = vld [vmem:[%s12360_s27 + $0xc8] ss:$12 sps:$4 sm:$0xff]  }
 0x313   :  { %3237 = vmatprep.mubr.bf16.mxu0 %v9578_v1  ;;  %4029 = vmatpush1.bf16.msra.mxu1 %v9157_v23  ;;  %v9190_v23 = vld [vmem:[%s12360_s27 + $0x108] ss:$12 sps:$4 sm:$0xff]  }
 0x314   :  { %v3197_v62 = vand.u32 %v10955_v12, %v3181_v0  ;;  %v3203_v20 = vand.u32 %v10955_v12, %v3182_v19  ;;  %4030 = vmatprep.subr.bf16.mxu1 %v9162_v24  ;;  %v9175_v0 = vld [vmem:[%s12360_s27 + $0xc0] ss:$12 sps:$4 sm:$0xff]   ;;  %v9194_v24 = vld [vmem:[%s12360_s27 + $0x50] ss:$12 sps:$4 sm:$0xff]  }
 0x315   :  { %v9184_v19 = vld [vmem:[%s12360_s27 + $0x20] ss:$12 sps:$4 sm:$0xff]  }
 0x316   :  { %3205 = vmatprep.subr.bf16.mxu0 %v3197_v62  ;;  %v9179_v62 = vld [vmem:[%s12360_s27 + $0x8] ss:$12 sps:$4 sm:$0xff]  }
 0x317   :  { %3206 = vmatpush1.bf16.msra.mxu0 %v3194_v15  ;;  %4031 = vmatpush1.bf16.msra.mxu1 %v9160_v60  ;;  %v9182_v15 = vld [vmem:[%s12360_s27 + $0xdc] ss:$12 sps:$4 sm:$0xff]   ;;  %v9197_v60 = vld [vmem:[%s12360_s27 + $0x124] ss:$12 sps:$4 sm:$0xff]  }
 0x318   :  { %3256 = vmatprep.subr.bf16.mxu0 %v3203_v20  ;;  %4032 = vmatprep.subr.bf16.mxu1 %v9165_v54  ;;  %v9187_v20 = vld [vmem:[%s12360_s27 + $0xf4] ss:$12 sps:$4 sm:$0xff]  }
 0x319   :  { %v9198_v54 = vld [vmem:[%s12360_s27 + $0x128] ss:$12 sps:$4 sm:$0xff]  }
 0x321   :  { %v8207_v13 = vpop.f32.mrb[20].mxu0 }
 0x322   :  { %v8208_v26 = vpop.f32.mrb[21].mxu0 }
 0x323   :  { %v8209_v27 = vadd.f32 %v8208_v26, %v8207_v13  ;;  %v8210_v28 = vpop.f32.mrb[22].mxu0  ;;  %v9163_v13 = vld [vmem:[%s12360_s27 + $0x60] ss:$12 sps:$4 sm:$0xff]   ;;  %v9168_v26 = vld [vmem:[%s12360_s27 + $0x7c] ss:$12 sps:$4 sm:$0xff]  }
 0x324   :  { %v8211_v29 = vpop.f32.mrb[23].mxu0  ;;  %4033 = vmatpush1.bf16.msra.mxu1 %v9163_v13  ;;  %v9195_v13 = vld [vmem:[%s12360_s27 + $0x120] ss:$12 sps:$4 sm:$0xff]  }
 0x325   :  { %v8212_v59 = vadd.f32 %v8211_v29, %v8210_v28  ;;  %v3046_v41 = vadd.f32 %v8209_v27, %v7765_v9  ;;  %v9166_v27 = vld [vmem:[%s12360_s27 + $0x78] ss:$12 sps:$4 sm:$0xff]   ;;  %v9171_v28 = vld [vmem:[%s12360_s27 + $0x94] ss:$12 sps:$4 sm:$0xff]   ;;  %4034 = vmatprep.subr.bf16.mxu1 %v9168_v26  ;;  %v9169_v29 = vld [vmem:[%s12360_s27 + $0x90] ss:$12 sps:$4 sm:$0xff]  }
 0x326   :  { %v9199_v26 = vld [vmem:[%s12360_s27 + $0x68] ss:$12 sps:$4 sm:$0xff]  }
 0x327   :  { %v3049_v48 = vadd.f32 %v8212_v59, %v7765_v9  ;;  %v9174_v59 = vld [vmem:[%s12360_s27 + $0xac] ss:$12 sps:$4 sm:$0xff]  }
 0x328   :  { %4035 = vmatpush1.bf16.msra.mxu1 %v9166_v27  ;;  %v9202_v27 = vld [vmem:[%s12360_s27 + $0x13c] ss:$12 sps:$4 sm:$0xff]  }
 0x329   :  { %v8213_v30 = vpop.f32.mrb[24].mxu0  ;;  %4036 = vmatprep.subr.bf16.mxu1 %v9171_v28  ;;  %v9203_v28 = vld [vmem:[%s12360_s27 + $0x140] ss:$12 sps:$4 sm:$0xff]  }
 0x32a   :  { %v8214_v31 = vpop.f32.mrb[25].mxu0 }
 0x32b   :  { %v8215_v32 = vadd.f32 %v8214_v31, %v8213_v30  ;;  %v8216_v33 = vpop.f32.mrb[26].mxu0  ;;  %v9172_v30 = vld [vmem:[%s12360_s27 + $0xa8] ss:$12 sps:$4 sm:$0xff]  }
 0x32c   :  { %v8217_v36 = vpop.f32.mrb[27].mxu0  ;;  %4037 = vmatpush1.bf16.msra.mxu1 %v9169_v29  ;;  %v9200_v29 = vld [vmem:[%s12360_s27 + $0x138] ss:$12 sps:$4 sm:$0xff]  }
 0x32d   :  { %v3054_v6 = vadd.f32 %v8215_v32, %v7765_v9  ;;  %4038 = vmatprep.subr.bf16.mxu1 %v9174_v59  ;;  %v9204_v59 = vld [vmem:[%s12360_s27 + $0x80] ss:$12 sps:$4 sm:$0xff]  }
 0x330   :  { %4039 = vmatpush1.bf16.msra.mxu1 %v9172_v30  ;;  %v9207_v30 = vld [vmem:[%s12360_s27 + $0x154] ss:$12 sps:$4 sm:$0xff]  }
 0x331   :  { %4040 = vmatprep.subr.bf16.mxu1 %v9177_v14 }
 0x334   :  { %4041 = vmatpush1.bf16.msra.mxu1 %v9175_v0 }
 0x335   :  { %4042 = vmatprep.subr.bf16.mxu1 %v9182_v15 }
 0x341   :  { %v8235_v39 = vpop.f32.mrb[28].mxu0 }
 0x342   :  { %v8236_v40 = vpop.f32.mrb[29].mxu0 }
 0x343   :  { %v8237_v58 = vadd.f32 %v8236_v40, %v8235_v39  ;;  %v8238_v42 = vpop.f32.mrb[30].mxu0 }
 0x344   :  { %v8239_v43 = vpop.f32.mrb[31].mxu0 }
 0x345   :  { %v8240_v49 = vadd.f32 %v8239_v43, %v8238_v42  ;;  %v10941_v50 = vadd.f32 %v8237_v58, %v3046_v41  ;;  %v3330_v42 = vsel %vm3328_vm5, 4294967295, %v9580_v2 }
 0x347   :  { %v10943_v56 = vadd.f32 %v8240_v49, %v3049_v48  ;;  %v9147_v49 = vld [vmem:[%s12361_s1 + $0x4] ss:$16 sps:$4 sm:$0x3f]  }
 0x349   :  { %v8241_v57 = vpop.f32.mrb[32].mxu0 }
 0x34a   :  { %v8242_v63 = vpop.f32.mrb[33].mxu0 }
 0x34b   :  { %v8243_v4 = vadd.f32 %v8242_v63, %v8241_v57  ;;  %v8244_v47 = vpop.f32.mrb[34].mxu0  ;;  %v3200_v63 = vand.u32 %v10955_v12, %v10960_v44  ;;  %v9180_v44 = vld [vmem:[%s12360_s27 + $0xd8] ss:$12 sps:$4 sm:$0xff]  }
 0x34c   :  { %v8245_v53 = vpop.f32.mrb[35].mxu0  ;;  %4043 = vmatpush1.bf16.msra.mxu1 %v9180_v44 }
 0x34d   :  { %v10945_v3 = vadd.f32 %v8243_v4, %v3054_v6  ;;  %4044 = vmatprep.subr.bf16.mxu1 %v9187_v20 }
 0x350   :  { %4045 = vmatpush1.bf16.msra.mxu1 %v9185_v21 }
 0x351   :  { %4046 = vmatprep.subr.bf16.mxu1 %v9192_v5  ;;  %v9218_v5 = vld [vmem:[%s12360_s27 + $0x188] ss:$12 sps:$4 sm:$0xff]  }
 0x354   :  { %4047 = vmatpush1.bf16.msra.mxu1 %v9190_v23 }
 0x355   :  { %4048 = vmatprep.subr.bf16.mxu1 %v9197_v60 }
 0x358   :  { %4049 = vmatpush1.bf16.msra.mxu1 %v9195_v13 }
 0x359   :  { %4050 = vmatprep.subr.bf16.mxu1 %v9202_v27 }
 0x35c   :  { %4051 = vmatpush1.bf16.msra.mxu1 %v9200_v29  ;;  %v9222_v29 = vld [vmem:[%s12360_s27 + $0x1a0] ss:$12 sps:$4 sm:$0xff]  }
 0x35d   :  { %4052 = vmatprep.subr.bf16.mxu1 %v9207_v30 }
 0x3dd   :  { %v3141_v31 = vpop.f32.mrb[36].mxu0 }
 0x3de   :  { %v3142_v32 = vadd.f32 %v3141_v31, %v10941_v50  ;;  %v3143_v33 = vpop.f32.mrb[37].mxu0  ;;  %v11020_v50 = vsel %vm3329_vm6, %v3330_v42, 0  ;;  %v9208_v31 = vld [vmem:[%s12360_s27 + $0x158] ss:$12 sps:$4 sm:$0xff]  }
 0x3df   :  { %v3144_v36 = vpop.f32.mrb[38].mxu0  ;;  %v3336_v4 = vand.u32 %v9147_v49, %v11020_v50  ;;  %v3342_v61 = vand.u32 %v9150_v7, %v11020_v50  ;;  %v3339_v2 = vand.u32 %v9148_v8, %v11020_v50  ;;  %v9209_v33 = vld [vmem:[%s12360_s27 + $0x98] ss:$12 sps:$4 sm:$0xff]  }
 0x3e0   :  { %v3145_v9 = vadd.f32 %v3144_v36, %v10943_v56  ;;  %v3146_v39 = vpop.f32.mrb[39].mxu0  ;;  %9566 = vtanh.f32 %v3142_v32  ;;  %v9205_v32 = vld [vmem:[%s12360_s27 + $0x150] ss:$12 sps:$4 sm:$0xff]   ;;  %v9212_v36 = vld [vmem:[%s12360_s27 + $0x16c] ss:$12 sps:$4 sm:$0xff]  }
 0x3e1   :  { %4053 = vmatpush1.bf16.msra.mxu1 %v9205_v32  ;;  %v9210_v39 = vld [vmem:[%s12360_s27 + $0x168] ss:$12 sps:$4 sm:$0xff]  }
 0x3e2   :  { %9568 = vtanh.f32 %v3145_v9  ;;  %v9213_v9 = vld [vmem:[%s12360_s27 + $0x170] ss:$12 sps:$4 sm:$0xff]   ;;  %4054 = vmatprep.subr.bf16.mxu1 %v9212_v36 }
 0x3e5   :  { %v3149_v40 = vpop.f32.mrb[40].mxu0  ;;  %4055 = vmatpush1.bf16.msra.mxu1 %v9210_v39  ;;  %v9223_v39 = vld [vmem:[%s12360_s27 + $0x1b0] ss:$12 sps:$4 sm:$0xff]  }
 0x3e6   :  { %v3150_v41 = vadd.f32 %v3149_v40, %v10945_v3  ;;  %v3151_v58 = vpop.f32.mrb[41].mxu0  ;;  %v9145_v3 = vld [vmem:[%s12361_s1] ss:$16 sps:$4 sm:$0x3f]  }
 0x3e7   :  { %v3152_v43 = vpop.f32.mrb[42].mxu0  ;;  %v3333_v38 = vand.u32 %v9145_v3, %v11020_v50  ;;  %v9214_v40 = vld [vmem:[%s12360_s27 + $0xb0] ss:$12 sps:$4 sm:$0xff]  }
 0x3e8   :  { %9570 = vtanh.f32 %v3150_v41  ;;  %v3153_v48 = vpop.f32.mrb[43].mxu0  ;;  %v9217_v41 = vld [vmem:[%s12360_s27 + $0x184] ss:$12 sps:$4 sm:$0xff]  }
 0x3e9   :  { %4075 = vmatprep.subr.bf16.mxu1 %v9217_v41 }
 0x3ea   :  { %v11022_v56 = vpop.eup %9566 }
 0x3ec   :  { %v11024_v57 = vpop.eup %9568 }
 0x3ed   :  { %v3162_v6 = vpack.c.bf16 %v11024_v57, %v11022_v56 }
 0x3ef   :  { %7815 = vmatmul.mubr.msk.bf16.vlgmr.msra.gmra.mrb[44].mxu0 %vm3183_vm7, %v3162_v6 }
 0x3f0   :  { %3257 = vmatpush1.bf16.msra.mxu0 %v3200_v63  ;;  %3247 = vmatprep.mubr.bf16.mxu0 %v9578_v1 }
 0x3f1   :  { %3344 = vmatprep.subr.bf16.mxu0 %v3336_v4  ;;  %v3446_v4 = vld [vmem:[%s12320_s9] sm:$0xf] }
 0x3f2   :  { %v11033_v47 = vpop.eup %9570  ;;  %v3451_v3 = vrot.slane %v3446_v4, %v9973_v35  ;;  %v3455_v7 = vrot.slane %v3446_v4, %v9979_v37  ;;  %v11192_v30 = vrot.slane %v3446_v4, %v9984_v45 }
 0x3f3   :  { %v3163_v53 = vpack.c.bf16 %v11033_v47, %v11033_v47 }
 0x3f7   :  { %7816 = vmatmul.mubr.msk.bf16.gmra.mrb[48].mxu0 %vm3183_vm7, %v3163_v53 }
 0x3f8   :  { %3288 = vmatprep.mubr.bf16.mxu0 %v9578_v1 }
 0x3ff   :  { %7817 = vmatmul.mubr.msk.bf16.vlgmr.msra.gmra.mrb[52].mxu0 %vm3183_vm7, %v3162_v6 }
 0x400   :  { %3345 = vmatpush1.bf16.msra.mxu0 %v3333_v38  ;;  %3298 = vmatprep.mubr.bf16.mxu0 %v9578_v1 }
 0x401   :  { %3395 = vmatprep.subr.bf16.mxu0 %v3342_v61 }
 0x407   :  { %7818 = vmatmul.mubr.msk.bf16.gmra.mrb[56].mxu0 %vm3183_vm7, %v3163_v53 }
 0x408   :  { %3376 = vmatprep.mubr.bf16.mxu0 %v9578_v1 }
 0x40f   :  { %7823 = vmatmul.mubr.msk.bf16.vlgmr.msra.gmra.mrb[44].mxu0 %vm3323_vm8, %v9743_v16 }
 0x410   :  { %3386 = vmatprep.mubr.bf16.mxu0 %v9578_v1  ;;  %3396 = vmatpush1.bf16.msra.mxu0 %v3339_v2 }
 0x411   :  { %8247 = vmatprep.subr.bf16.mxu0 %v9178_v11 }
 0x417   :  { %7824 = vmatmul.mubr.msk.bf16.gmra.mrb[60].mxu0 %vm3323_vm8, %v9745_v17 }
 0x418   :  { %3427 = vmatprep.mubr.bf16.mxu0 %v9578_v1 }
 0x41f   :  { %7825 = vmatmul.mubr.msk.bf16.vlgmr.msra.gmra.mrb[52].mxu0 %vm3323_vm8, %v9743_v16 }
 0x420   :  { %3437 = vmatprep.mubr.bf16.mxu0 %v9578_v1  ;;  %8248 = vmatpush3.bf16.msra.mxu0 %v9179_v62 }
 0x421   :  { %8249 = vmatprep.subr.bf16.mxu0 %v9183_v18 }
 0x424   :  { %8250 = vmatpush3.bf16.msra.mxu0 %v9184_v19 }
 0x425   :  { %8251 = vmatprep.subr.bf16.mxu0 %v9188_v52 }
 0x427   :  { %7826 = vmatmul.mubr.msk.bf16.gmra.mrb[64].mxu0 %vm3323_vm8, %v9745_v17 }
 0x428   :  { %8252 = vmatpush3.bf16.msra.mxu0 %v9189_v22  ;;  %v9215_v22 = vld [vmem:[%s12360_s27 + $0x180] ss:$12 sps:$4 sm:$0xff]  }
 0x429   :  { %8253 = vmatprep.subr.bf16.mxu0 %v9193_v25 }
 0x42c   :  { %8254 = vmatpush3.bf16.msra.mxu0 %v9194_v24  ;;  %v9221_v24 = vld [vmem:[%s12360_s27 + $0x19c] ss:$12 sps:$4 sm:$0xff]  }
 0x42d   :  { %8255 = vmatprep.subr.bf16.mxu0 %v9198_v54 }
 0x430   :  { %8256 = vmatpush3.bf16.msra.mxu0 %v9199_v26 }
 0x431   :  { %8257 = vmatprep.subr.bf16.mxu0 %v9203_v28  ;;  %v9219_v28 = vld [vmem:[%s12360_s27 + $0x198] ss:$12 sps:$4 sm:$0xff]  }
 0x434   :  { %8258 = vmatpush3.bf16.msra.mxu0 %v9204_v59 }
 0x435   :  { %8259 = vmatprep.subr.bf16.mxu0 %v9208_v31  ;;  %v9225_v31 = vld [vmem:[%s12360_s27 + $0x1b4] ss:$12 sps:$4 sm:$0xff]  }
 0x438   :  { %8260 = vmatpush3.bf16.msra.mxu0 %v9209_v33  ;;  %v11198_v33 = vrot.slane %v3446_v4, %v9987_v46 }
 0x439   :  { %8261 = vmatprep.subr.bf16.mxu0 %v9213_v9 }
 0x43c   :  { %8262 = vmatpush3.bf16.msra.mxu0 %v9214_v40  ;;  %v9226_v40 = vld [vmem:[%s12360_s27 + $0x1b8] ss:$12 sps:$4 sm:$0xff]  }
 0x43d   :  { %4174 = vmatprep.subr.bf16.mxu0 %v9578_v1 }
 0x4ca   :  { %v3249_v58 = vpop.f32.mrb[48].mxu0 }
 0x4cb   :  { %v3251_v42 = vpop.f32.mrb[49].mxu0 }
 0x4cc   :  { %v3253_v43 = vpop.f32.mrb[50].mxu0 }
 0x4cd   :  { %v3254_v48 = vpop.f32.mrb[51].mxu0  ;;  %v9229_v43 = vld [vmem:[%s12360_s27 + $0x1cc] ss:$12 sps:$4 sm:$0xff]  }
 0x4da   :  { %v11166_v49 = vpop.f32.mrb[56].mxu0 }
 0x4db   :  { %v11168_v63 = vpop.f32.mrb[57].mxu0 }
 0x4dc   :  { %v3304_v6 = vpop.f32.mrb[58].mxu0 }
 0x4dd   :  { %v3305_v53 = vpop.f32.mrb[59].mxu0 }
 0x4e2   :  { %v3378_v38 = vpop.f32.mrb[44].mxu0 }
 0x4e3   :  { %v3468_v61 = vadd.f32 %v3451_v3, %v3378_v38  ;;  %v3380_v8 = vpop.f32.mrb[45].mxu0  ;;  %v9230_v38 = vld [vmem:[%s12360_s27 + $0x1d0] ss:$12 sps:$4 sm:$0xff]  }
 0x4e4   :  { %v3469_v2 = vadd.f32 %v3455_v7, %v3380_v8  ;;  %v3382_v14 = vpop.f32.mrb[46].mxu0 }
 0x4e5   :  { %v3472_v11 = vadd.f32 %v3451_v3, %v3382_v14  ;;  %v3384_v0 = vpop.f32.mrb[47].mxu0  ;;  %v3480_v15 = vmax.f32 %v3468_v61, 0.0 }
 0x4e6   :  { %v3473_v62 = vadd.f32 %v3455_v7, %v3384_v0  ;;  %v3481_v44 = vmax.f32 %v3469_v2, 0.0  ;;  %v9233_v2 = vld [vmem:[%s12360_s27 + $0x1e4] ss:$12 sps:$4 sm:$0xff]  }
 0x4e7   :  { %v3484_v18 = vmax.f32 %v3472_v11, 0.0 }
 0x4e8   :  { %v3485_v19 = vmax.f32 %v3473_v62, 0.0 }
 0x4e9   :  { %v3492_v20 = vpack.c.bf16 %v3484_v18, %v3480_v15  ;;  %v9231_v18 = vld [vmem:[%s12360_s27 + $0x1e0] ss:$12 sps:$4 sm:$0xff]  }
 0x4ea   :  { %v3493_v52 = vpack.c.bf16 %v3485_v19, %v3481_v44  ;;  %v3388_v21 = vpop.f32.mrb[60].mxu0  ;;  %v9234_v44 = vld [vmem:[%s12360_s27 + $0x1e8] ss:$12 sps:$4 sm:$0xff]  }
 0x4eb   :  { %v3389_v25 = vadd.f32 %v3388_v21, %v3249_v58  ;;  %v3390_v23 = vpop.f32.mrb[61].mxu0 }
 0x4ec   :  { %v3391_v60 = vadd.f32 %v3390_v23, %v3251_v42  ;;  %4056 = vmatprep.mubr.bf16.mxu1 %v3493_v52  ;;  %4158 = vmatprep.mubr.bf16.mxu0 %v3493_v52  ;;  %v3392_v54 = vpop.f32.mrb[62].mxu0  ;;  %v9237_v52 = vld [vmem:[%s12360_s27 + $0x1fc] ss:$12 sps:$4 sm:$0xff]  }
 0x4ed   :  { %v3476_v13 = vadd.f32 %v3451_v3, %v3389_v25  ;;  %4057 = vmatmul.mubr.bf16.vlgmr.msra.gmra.mrb[28].mxu1 %v3492_v20  ;;  %4159 = vmatmul.mubr.bf16.vlgmr.msra.gmra.mrb[68].mxu0 %v3492_v20  ;;  %v3393_v26 = vpop.f32.mrb[63].mxu0  ;;  %v9238_v25 = vld [vmem:[%s12360_s27 + $0x200] ss:$12 sps:$4 sm:$0xff]   ;;  %v9239_v23 = vld [vmem:[%s12360_s27 + $0x210] ss:$12 sps:$4 sm:$0xff]  }
 0x4ee   :  { %v3477_v27 = vadd.f32 %v3455_v7, %v3391_v60  ;;  %4076 = vmatpush1.bf16.msra.mxu1 %v9215_v22  ;;  %4175 = vmatpush1.bf16.msra.mxu0 %v9218_v5  ;;  %v9227_v7 = vld [vmem:[%s12360_s27 + $0x1c8] ss:$12 sps:$4 sm:$0xff]   ;;  %v9245_v60 = vld [vmem:[%s12360_s27 + $0x22c] ss:$12 sps:$4 sm:$0xff]   ;;  %v9249_v26 = vld [vmem:[%s12360_s27 + $0x244] ss:$12 sps:$4 sm:$0xff]  }
 0x4ef   :  { %v3488_v59 = vmax.f32 %v3476_v13, 0.0  ;;  %4077 = vmatprep.subr.bf16.mxu1 %v9221_v24  ;;  %4176 = vmatprep.subr.bf16.mxu0 %v9578_v1  ;;  %v9242_v24 = vld [vmem:[%s12360_s27 + $0x218] ss:$12 sps:$4 sm:$0xff]   ;;  %v9243_v54 = vld [vmem:[%s12360_s27 + $0x228] ss:$12 sps:$4 sm:$0xff]  }
 0x4f0   :  { %v3489_v32 = vmax.f32 %v3477_v27, 0.0  ;;  %v9246_v13 = vld [vmem:[%s12360_s27 + $0x230] ss:$12 sps:$4 sm:$0xff]  }
 0x4f1   :  { %v3496_v41 = vpack.c.bf16 %v3488_v59, %v3488_v59 }
 0x4f2   :  { %v3497_v36 = vpack.c.bf16 %v3489_v32, %v3489_v32  ;;  %4078 = vmatpush1.bf16.msra.mxu1 %v9219_v28  ;;  %4177 = vmatpush1.bf16.msra.mxu0 %v9222_v29  ;;  %v3429_v9 = vpop.f32.mrb[52].mxu0  ;;  %v9247_v28 = vld [vmem:[%s12360_s27 + $0x240] ss:$12 sps:$4 sm:$0xff]   ;;  %v9250_v29 = vld [vmem:[%s12360_s27 + $0x248] ss:$12 sps:$4 sm:$0xff]  }
 0x4f3   :  { %v3470_v58 = vadd.f32 %v11192_v30, %v3429_v9  ;;  %v3431_v42 = vpop.f32.mrb[53].mxu0  ;;  %4079 = vmatprep.subr.bf16.mxu1 %v9225_v31  ;;  %4178 = vmatprep.subr.bf16.mxu0 %v9578_v1  ;;  %v9251_v9 = vld [vmem:[%s12321_s12 + $0x40] sm:$0xff]  }
 0x4f4   :  { %v3471_v48 = vadd.f32 %v11198_v33, %v3431_v42  ;;  %v3433_v6 = vpop.f32.mrb[54].mxu0  ;;  %4066 = vmatprep.mubr.bf16.mxu1 %v3497_v36  ;;  %4166 = vmatprep.mubr.bf16.mxu0 %v3497_v36  ;;  %v9257_v42 = vld [vmem:[%s12321_s12 + $0x58] sm:$0xff]  }
 0x4f5   :  { %v3474_v4 = vadd.f32 %v11192_v30, %v3433_v6  ;;  %v3435_v53 = vpop.f32.mrb[55].mxu0  ;;  %4067 = vmatmul.mubr.bf16.gmra.mrb[32].mxu1 %v3496_v41  ;;  %4167 = vmatmul.mubr.bf16.gmra.mrb[72].mxu0 %v3496_v41  ;;  %v3482_v61 = vmax.f32 %v3470_v58, 0.0  ;;  %v9255_v41 = vld [vmem:[%s12321_s12 + $0x50] sm:$0xff]   ;;  %v9259_v6 = vld [vmem:[%s12321_s12 + $0x60] sm:$0xff]  }
 0x4f6   :  { %v3475_v3 = vadd.f32 %v11198_v33, %v3435_v53  ;;  %4080 = vmatpush1.bf16.msra.mxu1 %v9223_v39  ;;  %4179 = vmatpush1.bf16.msra.mxu0 %v9226_v40  ;;  %v3483_v14 = vmax.f32 %v3471_v48, 0.0  ;;  %v9252_v39 = vld [vmem:[%s12321_s12] sm:$0xff]   ;;  %v9254_v40 = vld [vmem:[%s12321_s12 + $0x8] sm:$0xff]   ;;  %v9256_v58 = vld [vmem:[%s12321_s12 + $0x10] sm:$0xff]  }
 0x4f7   :  { %v3486_v8 = vmax.f32 %v3474_v4, 0.0  ;;  %4081 = vmatprep.subr.bf16.mxu1 %v9229_v43  ;;  %4180 = vmatprep.subr.bf16.mxu0 %v9578_v1  ;;  %v9258_v43 = vld [vmem:[%s12321_s12 + $0x18] sm:$0xff]   ;;  %v9261_v48 = vld [vmem:[%s12321_s12 + $0x80] sm:$0xff]   ;;  %v9262_v53 = vld [vmem:[%s12321_s12 + $0x68] sm:$0xff]  }
 0x4f8   :  { %v3487_v11 = vmax.f32 %v3475_v3, 0.0  ;;  %v9260_v4 = vld [vmem:[%s12321_s12 + $0x20] sm:$0xff]   ;;  %v9263_v3 = vld [vmem:[%s12321_s12 + $0x28] sm:$0xff]  }
 0x4f9   :  { %v3494_v0 = vpack.c.bf16 %v3486_v8, %v3482_v61  ;;  %v9266_v61 = vld [vmem:[%s12321_s12 + $0x88] sm:$0xff]   ;;  %v9267_v8 = vld [vmem:[%s12321_s12 + $0x78] sm:$0xff]  }
 0x4fa   :  { %v3495_v62 = vpack.c.bf16 %v3487_v11, %v3483_v14  ;;  %4082 = vmatpush1.bf16.msra.mxu1 %v9227_v7  ;;  %4181 = vmatpush1.bf16.msra.mxu0 %v9230_v38  ;;  %v3439_v15 = vpop.f32.mrb[64].mxu0  ;;  %v9264_v7 = vld [vmem:[%s12321_s12 + $0x70] sm:$0xff]  }
 0x4fb   :  { %v3440_v19 = vadd.f32 %v3439_v15, %v11166_v49  ;;  %v3441_v20 = vpop.f32.mrb[65].mxu0  ;;  %4083 = vmatprep.subr.bf16.mxu1 %v9233_v2  ;;  %4182 = vmatprep.subr.bf16.mxu0 %v9578_v1  ;;  %v9235_v49 = vld [vmem:[%s12360_s27 + $0x1f8] ss:$12 sps:$4 sm:$0xff]   ;;  %v9265_v38 = vld [vmem:[%s12321_s12 + $0x30] sm:$0xff]  }
 0x4fc   :  { %v3442_v21 = vadd.f32 %v3441_v20, %v11168_v63  ;;  %7902 = vmatprep.mubr.msk.bf16.mxu1 %vm4017_vm9, %v3495_v62  ;;  %7904 = vmatprep.mubr.msk.bf16.mxu0 %vm4017_vm9, %v3495_v62  ;;  %v3443_v22 = vpop.f32.mrb[66].mxu0  ;;  %v9241_v63 = vld [vmem:[%s12360_s27 + $0x214] ss:$12 sps:$4 sm:$0xff]   ;;  %v9268_v2 = vld [vmem:[%s12321_s12 + $0x38] sm:$0xff]  }
 0x4fd   :  { %v3444_v5 = vpop.f32.mrb[67].mxu0  ;;  %v3478_v31 = vadd.f32 %v11192_v30, %v3440_v19  ;;  %v9253_v30 = vld [vmem:[%s12321_s12 + $0x48] sm:$0xff]   ;;  %v9269_v14 = vld [vmem:[%s12321_s12 + $0x90] sm:$0x3f]  }
 0x4fe   :  { %4084 = vmatpush1.bf16.msra.mxu1 %v9231_v18  ;;  %4183 = vmatpush1.bf16.msra.mxu0 %v9234_v44  ;;  %v3479_v27 = vadd.f32 %v11198_v33, %v3442_v21  ;;  %v4403_v11 = vsel %vm3329_vm6, %v9269_v14, 0 }
 0x4ff   :  { %4085 = vmatprep.subr.bf16.mxu1 %v9237_v52  ;;  %4184 = vmatprep.subr.bf16.mxu0 %v9578_v1  ;;  %v3490_v33 = vmax.f32 %v3478_v31, 0.0 }
 0x500   :  { %v3491_v59 = vmax.f32 %v3479_v27, 0.0 }
 0x501   :  { %v3498_v36 = vpack.c.bf16 %v3490_v33, %v3490_v33 }
 0x502   :  { %4086 = vmatpush1.bf16.msra.mxu1 %v9235_v49  ;;  %4185 = vmatpush1.bf16.msra.mxu0 %v9238_v25  ;;  %v3499_v32 = vpack.c.bf16 %v3491_v59, %v3491_v59  ;;  %v3600_v49 = vld [vmem:[%s12322_s11] sm:$0x7] }
 0x503   :  { %4087 = vmatprep.subr.bf16.mxu1 %v9241_v63  ;;  %4186 = vmatprep.subr.bf16.mxu0 %v9578_v1  ;;  %v3613_v25 = vrot.slane %v3600_v49, %v9984_v45  ;;  %v3605_v63 = vrot.slane %v3600_v49, %v9973_v35 }
 0x506   :  { %4088 = vmatpush1.bf16.msra.mxu1 %v9239_v23  ;;  %4187 = vmatpush1.bf16.msra.mxu0 %v9242_v24  ;;  %v3609_v23 = vrot.slane %v3600_v49, %v9979_v37 }
 0x507   :  { %4089 = vmatprep.subr.bf16.mxu1 %v9245_v60  ;;  %4188 = vmatprep.subr.bf16.mxu0 %v9578_v1 }
 0x50a   :  { %4090 = vmatpush1.bf16.msra.mxu1 %v9243_v54  ;;  %4189 = vmatpush1.bf16.msra.mxu0 %v9246_v13 }
 0x50b   :  { %4091 = vmatprep.subr.bf16.mxu1 %v9249_v26  ;;  %4190 = vmatprep.subr.bf16.mxu0 %v9578_v1 }
 0x50e   :  { %4092 = vmatpush1.bf16.msra.mxu1 %v9247_v28  ;;  %4191 = vmatpush1.bf16.msra.mxu0 %v9250_v29 }
 0x50f   :  { %8275 = vmatprep.subr.bf16.mxu0 %v9251_v9  ;;  %8486 = vmatprep.subr.bf16.mxu1 %v9261_v48 }
 0x511   :  { %4108 = vmatmul.mubr.bf16.vlgmr.msra.gmra.mrb[28].mxu1 %v3494_v0  ;;  %4207 = vmatmul.mubr.bf16.vlgmr.msra.gmra.mrb[76].mxu0 %v3494_v0 }
 0x512   :  { %7903 = vmatprep.mubr.msk.bf16.mxu1 %vm4017_vm9, %v3499_v32  ;;  %7905 = vmatprep.mubr.msk.bf16.mxu0 %vm4017_vm9, %v3499_v32 }
 0x513   :  { %8276 = vmatpush3.bf16.msra.mxu0 %v9252_v39  ;;  %8487 = vmatpush3.bf16.msra.mxu1 %v9261_v48 }
 0x514   :  { %8277 = vmatprep.subr.bf16.mxu0 %v9253_v30  ;;  %8488 = vmatprep.subr.bf16.mxu1 %v9266_v61 }
 0x517   :  { %8278 = vmatpush3.bf16.msra.mxu0 %v9254_v40  ;;  %8489 = vmatpush3.bf16.msra.mxu1 %v9266_v61 }
 0x518   :  { %8279 = vmatprep.subr.bf16.mxu0 %v9255_v41  ;;  %8652 = vmatprep.subr.msk.bf16.mxu1 %vm3329_vm6, %v9269_v14 }
 0x519   :  { %4118 = vmatmul.mubr.bf16.gmra.mrb[32].mxu1 %v3498_v36  ;;  %4215 = vmatmul.mubr.bf16.gmra.mrb[80].mxu0 %v3498_v36 }
 0x51b   :  { %8280 = vmatpush3.bf16.msra.mxu0 %v9256_v58  ;;  %8491 = vmatpush3.bf16.msra.mxu1 %v4403_v11 }
 0x51c   :  { %8281 = vmatprep.subr.bf16.mxu0 %v9257_v42 }
 0x51f   :  { %8282 = vmatpush3.bf16.msra.mxu0 %v9258_v43 }
 0x520   :  { %8283 = vmatprep.subr.bf16.mxu0 %v9259_v6 }
 0x523   :  { %8284 = vmatpush3.bf16.msra.mxu0 %v9260_v4 }
 0x524   :  { %8285 = vmatprep.subr.bf16.mxu0 %v9262_v53 }
 0x527   :  { %8286 = vmatpush3.bf16.msra.mxu0 %v9263_v3 }
 0x528   :  { %8287 = vmatprep.subr.bf16.mxu0 %v9264_v7 }
 0x52b   :  { %8288 = vmatpush3.bf16.msra.mxu0 %v9265_v38 }
 0x52c   :  { %8289 = vmatprep.subr.bf16.mxu0 %v9267_v8 }
 0x52f   :  { %8290 = vmatpush3.bf16.msra.mxu0 %v9268_v2 }
 0x5c0   :  { %v8263_v0 = vpop.f32.mrb[68].mxu0 }
 0x5c1   :  { %v8264_v62 = vpop.f32.mrb[69].mxu0 }
 0x5c2   :  { %v8265_v15 = vadd.f32 %v8264_v62, %v8263_v0  ;;  %v8266_v18 = vpop.f32.mrb[70].mxu0 }
 0x5c3   :  { %v8267_v44 = vpop.f32.mrb[71].mxu0 }
 0x5c4   :  { %v8268_v19 = vadd.f32 %v8267_v44, %v8266_v18  ;;  %v4161_v24 = vadd.f32 %v8265_v15, %v3613_v25 }
 0x5c6   :  { %v4164_v29 = vadd.f32 %v8268_v19, %v3613_v25 }
 0x5c8   :  { %v8269_v20 = vpop.f32.mrb[72].mxu0 }
 0x5c9   :  { %v8270_v52 = vpop.f32.mrb[73].mxu0 }
 0x5ca   :  { %v8271_v21 = vadd.f32 %v8270_v52, %v8269_v20  ;;  %v8272_v22 = vpop.f32.mrb[74].mxu0 }
 0x5cb   :  { %v8273_v5 = vpop.f32.mrb[75].mxu0 }
 0x5cc   :  { %v4169_v53 = vadd.f32 %v8271_v21, %v3613_v25  ;;  %v4526_v5 = vld [vmem:[%s12323_s15] sm:$0xff] }
 0x5cd   :  { %v4530_v49 = vcombine.high %v4526_v5, %v4526_v5  ;;  %v4537_v25 = vrot.slane %v4526_v5, %v10952_v10 }
 0x5e4   :  { %v4109_v60 = vpop.f32.mrb[28].mxu1  ;;  %v4208_v54 = vpop.f32.mrb[76].mxu0 }
 0x5e5   :  { %v8538_v13 = vadd.f32 %v4109_v60, %v3605_v63  ;;  %v4209_v26 = vadd.f32 %v4208_v54, %v4161_v24  ;;  %v4111_v27 = vpop.f32.mrb[29].mxu1  ;;  %v4210_v28 = vpop.f32.mrb[77].mxu0 }
 0x5e6   :  { %v8539_v59 = vadd.f32 %v4111_v27, %v3609_v23  ;;  %v4113_v31 = vpop.f32.mrb[30].mxu1  ;;  %v4211_v32 = vpop.f32.mrb[78].mxu0  ;;  %v4527_v27 = vld [vmem:[%s12323_s15 + $0x8] sm:$0xff] }
 0x5e7   :  { %v8540_v33 = vadd.f32 %v4113_v31, %v3605_v63  ;;  %v4212_v36 = vadd.f32 %v4211_v32, %v4164_v29  ;;  %v4115_v9 = vpop.f32.mrb[31].mxu1  ;;  %v4213_v39 = vpop.f32.mrb[79].mxu0  ;;  %v4222_v40 = vmax.f32 %v8538_v13, 0.0  ;;  %v4224_v41 = vmax.f32 %v4209_v26, 0.0 }
 0x5e8   :  { %v8541_v30 = vadd.f32 %v4115_v9, %v3609_v23  ;;  %v4223_v43 = vmax.f32 %v8539_v59, 0.0  ;;  %v4571_v13 = vand.u32 %v4537_v25, %v10955_v12  ;;  %v4554_v28 = vrot.slane %v4527_v27, %v10952_v10  ;;  %v7906_v9 = vld [vmem:[%s12325_s13] ss:$0 sm:$0xff] }
 0x5e9   :  { %v4225_v58 = vmax.f32 %v8540_v33, 0.0  ;;  %v4227_v42 = vmax.f32 %v4212_v36, 0.0  ;;  %v4547_v59 = vcombine.high %v4527_v27, %v4527_v27 }
 0x5ea   :  { %v4226_v48 = vmax.f32 %v8541_v30, 0.0  ;;  %v4562_v29 = vcombine.high %v4554_v28, %v4554_v28 }
 0x5eb   :  { %v4231_v6 = vpack.c.bf16 %v4225_v58, %v4222_v40  ;;  %v4233_v4 = vpack.c.bf16 %v4227_v42, %v4224_v41  ;;  %v4561_v32 = vrot.slane %v4547_v59, %v10952_v10  ;;  %v4519_v59 = vld [vmem:[%s12326_s14 + $0x18] sm:$0xff] }
 0x5ec   :  { %v4232_v3 = vpack.c.bf16 %v4226_v48, %v4223_v43  ;;  %v4119_v7 = vpop.f32.mrb[32].mxu1  ;;  %v4216_v38 = vpop.f32.mrb[80].mxu0  ;;  %v4586_v31 = vand.u32 %v4562_v29, %v10955_v12  ;;  %v4522_v29 = vld [vmem:[%s12326_s14 + $0x30] sm:$0x33] }
 0x5ed   :  { %v8542_v61 = vadd.f32 %v4119_v7, %v3605_v63  ;;  %v4217_v8 = vadd.f32 %v4216_v38, %v4169_v53  ;;  %v4121_v2 = vpop.f32.mrb[33].mxu1  ;;  %v4218_v14 = vpop.f32.mrb[81].mxu0  ;;  %8492 = vmatprep.mubr.msk.bf16.mxu1 %vm4395_vm10, %v4233_v4  ;;  %v4544_v63 = vrot.slane %v4530_v49, %v10952_v10  ;;  %v4563_v33 = vcombine.high %v4561_v32, %v4561_v32 }
 0x5ee   :  { %v8543_v11 = vadd.f32 %v4121_v2, %v3609_v23  ;;  %v4123_v0 = vpop.f32.mrb[34].mxu1  ;;  %v4219_v62 = vpop.f32.mrb[82].mxu0  ;;  %4437 = vmatprep.mubr.bf16.mxu0 %v4232_v3  ;;  %v4545_v23 = vcombine.high %v4537_v25, %v4537_v25 }
 0x5ef   :  { %v4230_v15 = vmax.f32 %v4217_v8, 0.0  ;;  %v4124_v18 = vpop.f32.mrb[35].mxu1  ;;  %v4220_v44 = vpop.f32.mrb[83].mxu0  ;;  %4438 = vmatmul.mubr.bf16.vlgmr.msra.gmra.mrb[84].mxu0 %v4231_v6  ;;  %v4228_v20 = vmax.f32 %v8542_v61, 0.0  ;;  %v4546_v24 = vcombine.high %v4544_v63, %v4544_v63  ;;  %v4577_v26 = vand.u32 %v4544_v63, %v10955_v12 }
 0x5f0   :  { %v4229_v19 = vmax.f32 %v8543_v11, 0.0  ;;  %v4574_v60 = vand.u32 %v4545_v23, %v10955_v12  ;;  %v4592_v36 = vand.u32 %v4563_v33, %v10955_v12  ;;  %v4520_v44 = vld [vmem:[%s12326_s14 + $0x20] sm:$0x33] }
 0x5f1   :  { %v4236_v52 = vpack.c.bf16 %v4230_v15, %v4230_v15  ;;  %v4234_v22 = vpack.c.bf16 %v4228_v20, %v4228_v20  ;;  %v4580_v54 = vand.u32 %v4546_v24, %v10955_v12  ;;  %v4583_v24 = vand.u32 %v4554_v28, %v10955_v12 }
 0x5f2   :  { %v4235_v21 = vpack.c.bf16 %v4229_v19, %v4229_v19  ;;  %4594 = vmatprep.subr.bf16.mxu1 %v4574_v60 }
 0x5f3   :  { %8493 = vmatmul.mubr.msk.bf16.vlgmr.msra.gmra.mrb[36].mxu1 %vm4395_vm10, %v4236_v52  ;;  %4645 = vmatprep.subr.bf16.mxu0 %v4580_v54  ;;  %v4516_v52 = vld [vmem:[%s12326_s14] sm:$0xff] }
 0x5f4   :  { %4445 = vmatprep.mubr.bf16.mxu0 %v4235_v21  ;;  %4626 = vmatprep.mubr.bf16.mxu1 %v9578_v1  ;;  %v4517_v21 = vld [vmem:[%s12326_s14 + $0x8] sm:$0xff]  ;;  %v7940_v49 = vcombine.high %v4516_v52, %v4520_v44 }
 0x5f5   :  { %4595 = vmatpush1.bf16.msra.mxu1 %v4571_v13  ;;  %4646 = vmatpush1.bf16.msra.mxu0 %v4577_v26  ;;  %v4589_v13 = vand.u32 %v4561_v32, %v10955_v12  ;;  %v7939_v32 = vcombine.low %v4516_v52, %v4520_v44  ;;  %v9301_v44 = vld [vmem:[%s12324_s17 + $0xd8] ss:$12 sps:$4 sm:$0xff]   ;;  %v9304_v52 = vld [vmem:[%s12324_s17 + $0xe0] ss:$12 sps:$4 sm:$0xff]  }
 0x5f6   :  { %4696 = vmatprep.subr.bf16.mxu1 %v4586_v31  ;;  %4747 = vmatprep.subr.bf16.mxu0 %v4592_v36  ;;  %v4523_v31 = vld [vmem:[%s12326_s14 + $0x38] sm:$0x33] }
 0x5f7   :  { %4446 = vmatmul.mubr.bf16.gmra.mrb[88].mxu0 %v4234_v22  ;;  %v4521_v22 = vld [vmem:[%s12326_s14 + $0x28] sm:$0x33] }
 0x5f8   :  { %4677 = vmatprep.mubr.bf16.mxu0 %v9578_v1  ;;  %v7942_v25 = vcombine.high %v4517_v21, %v4521_v22  ;;  %v7941_v33 = vcombine.low %v4517_v21, %v4521_v22  ;;  %v9305_v21 = vld [vmem:[%s12324_s17 + $0x20] ss:$12 sps:$4 sm:$0xff]  }
 0x5f9   :  { %v9308_v22 = vld [vmem:[%s12324_s17 + $0xf4] ss:$12 sps:$4 sm:$0xff]  }
 0x5fa   :  { %v4840_v26 = vand.u32 %v7942_v25, %v11020_v50  ;;  %v9306_v25 = vld [vmem:[%s12324_s17 + $0xf0] ss:$12 sps:$4 sm:$0xff]  }
 0x6c2   :  { %v8291_v39 = vpop.f32.mrb[84].mxu0 }
 0x6c3   :  { %v8292_v30 = vpop.f32.mrb[85].mxu0 }
 0x6c4   :  { %v8293_v40 = vadd.f32 %v8292_v30, %v8291_v39  ;;  %v8294_v41 = vpop.f32.mrb[86].mxu0  ;;  %v4831_v39 = vand.u32 %v7939_v32, %v11020_v50  ;;  %v4837_v30 = vand.u32 %v7941_v33, %v11020_v50  ;;  %v9328_v32 = vld [vmem:[%s12324_s17 + $0x154] ss:$12 sps:$4 sm:$0xff]   ;;  %v9329_v33 = vld [vmem:[%s12324_s17 + $0x158] ss:$12 sps:$4 sm:$0xff]  }
 0x6c5   :  { %v8295_v58 = vpop.f32.mrb[87].mxu0 }
 0x6c6   :  { %v8296_v42 = vadd.f32 %v8295_v58, %v8294_v41  ;;  %v8494_v43 = vpop.f32.mrb[36].mxu1  ;;  %v4440_v48 = vadd.f32 %v8293_v40, %v7906_v9 }
 0x6c7   :  { %v4487_v6 = vpop.f32.mrb[37].mxu1 }
 0x6c8   :  { %v4488_v4 = vadd.f32 %v4487_v6, %v4440_v48  ;;  %v8495_v10 = vpop.f32.mrb[38].mxu1  ;;  %v4443_v53 = vadd.f32 %v8296_v42, %v7906_v9  ;;  %v7945_v42 = vcombine.low %v4519_v59, %v4523_v31  ;;  %v9274_v6 = vld [vmem:[%s12324_s17 + $0x4] ss:$12 sps:$4 sm:$0xff]  }
 0x6c9   :  { %v4490_v3 = vpop.f32.mrb[39].mxu1  ;;  %v9275_v10 = vld [vmem:[%s12324_s17 + $0x18] ss:$12 sps:$4 sm:$0xff]  }
 0x6ca   :  { %9572 = vtanh.f32 %v4488_v4  ;;  %v4491_v7 = vadd.f32 %v4490_v3, %v4443_v53  ;;  %v8297_v38 = vpop.f32.mrb[88].mxu0  ;;  %v4849_v48 = vand.u32 %v7945_v42, %v11020_v50  ;;  %v9277_v4 = vld [vmem:[%s12324_s17 + $0x1c] ss:$12 sps:$4 sm:$0xff]   ;;  %v9280_v53 = vld [vmem:[%s12324_s17 + $0x34] ss:$12 sps:$4 sm:$0xff]  }
 0x6cb   :  { %v8298_v61 = vpop.f32.mrb[89].mxu0  ;;  %v9278_v3 = vld [vmem:[%s12324_s17 + $0x30] ss:$12 sps:$4 sm:$0xff]   ;;  %v9339_v42 = vld [vmem:[%s12324_s17 + $0x248] ss:$12 sps:$4 sm:$0xff]  }
 0x6cc   :  { %9574 = vtanh.f32 %v4491_v7  ;;  %v8299_v8 = vadd.f32 %v8298_v61, %v8297_v38  ;;  %v8300_v2 = vpop.f32.mrb[90].mxu0  ;;  %v9286_v7 = vld [vmem:[%s12324_s17 + $0x64] ss:$12 sps:$4 sm:$0xff]   ;;  %v9284_v38 = vld [vmem:[%s12324_s17 + $0x60] ss:$12 sps:$4 sm:$0xff]  }
 0x6cd   :  { %v8301_v14 = vpop.f32.mrb[91].mxu0  ;;  %v9287_v61 = vld [vmem:[%s12324_s17 + $0x78] ss:$12 sps:$4 sm:$0xff]   ;;  %v9290_v2 = vld [vmem:[%s12324_s17 + $0x90] ss:$12 sps:$4 sm:$0xff]  }
 0x6ce   :  { %v4448_v11 = vadd.f32 %v8299_v8, %v7906_v9  ;;  %v7946_v9 = vcombine.high %v4519_v59, %v4523_v31  ;;  %v9292_v8 = vld [vmem:[%s12324_s17 + $0x94] ss:$12 sps:$4 sm:$0xff]   ;;  %v9295_v14 = vld [vmem:[%s12324_s17 + $0xac] ss:$12 sps:$4 sm:$0xff]  }
 0x6cf   :  { %v9324_v59 = vld [vmem:[%s12324_s17 + $0x140] ss:$12 sps:$4 sm:$0xff]  }
 0x6d0   :  { %v4496_v0 = vadd.f32 %v8494_v43, %v4448_v11  ;;  %v4852_v41 = vand.u32 %v7946_v9, %v11020_v50  ;;  %v9293_v11 = vld [vmem:[%s12324_s17 + $0xa8] ss:$12 sps:$4 sm:$0xff]   ;;  %v9325_v31 = vld [vmem:[%s12324_s17 + $0x80] ss:$12 sps:$4 sm:$0xff]   ;;  %v9330_v9 = vld [vmem:[%s12324_s17 + $0x98] ss:$12 sps:$4 sm:$0xff]  }
 0x6d2   :  { %9576 = vtanh.f32 %v4496_v0  ;;  %v9298_v0 = vld [vmem:[%s12324_s17 + $0xc4] ss:$12 sps:$4 sm:$0xff]  }
 0x6d4   :  { %v9573_v62 = vpop.eup %9572 }
 0x6d5   :  { %v4504_v15 = vmul.f32 0.05, %v9573_v62  ;;  %v9299_v62 = vld [vmem:[%s12324_s17 + $0xc8] ss:$12 sps:$4 sm:$0xff]  }
 0x6d6   :  { %v9575_v18 = vpop.eup %9574 }
 0x6d7   :  { %v11371_v19 = vadd.f32 %v11022_v56, %v4504_v15  ;;  %v4505_v20 = vmul.f32 0.05, %v9575_v18  ;;  %v9296_v15 = vld [vmem:[%s12324_s17 + $0xc0] ss:$12 sps:$4 sm:$0xff]   ;;  %v9300_v18 = vld [vmem:[%s12324_s17 + $0x8] ss:$12 sps:$4 sm:$0xff]  }
 0x6d9   :  { %v11383_v5 = vadd.f32 %v11024_v57, %v4505_v20  ;;  %v7928_v56 = vclamps-f32 %v11371_v19, 1.0  ;;  %v4834_v57 = vand.u32 %v7940_v49, %v11020_v50  ;;  %v9303_v20 = vld [vmem:[%s12324_s17 + $0xdc] ss:$12 sps:$4 sm:$0xff]   ;;  %v9309_v49 = vld [vmem:[%s12324_s17 + $0xf8] ss:$12 sps:$4 sm:$0xff]  }
 0x6db   :  { %v7929_v63 = vclamps-f32 %v11383_v5, 1.0 }
 0x6dc   :  { %v9577_v23 = vpop.eup %9576 }
 0x6dd   :  { %v4524_v60 = vpack.c.bf16 %v7929_v63, %v7928_v56  ;;  %v4506_v54 = vmul.f32 0.05, %v9577_v23  ;;  %v9310_v23 = vld [vmem:[%s12324_s17 + $0x38] ss:$12 sps:$4 sm:$0xff]  }
 0x6df   :  { %v4509_v27 = vadd.f32 %v11033_v47, %v4506_v54  ;;  %7931 = vmatmul.mubr.msk.bf16.vlgmr.msra.gmra.mrb[40].mxu1 %vm3183_vm7, %v4524_v60  ;;  %7933 = vmatmul.mubr.msk.bf16.vlgmr.msra.gmra.mrb[92].mxu0 %vm3183_vm7, %v4524_v60  ;;  %v4518_v47 = vld [vmem:[%s12326_s14 + $0x10] sm:$0xff] }
 0x6e0   :  { %4697 = vmatpush1.bf16.msra.mxu1 %v4583_v24  ;;  %4636 = vmatprep.mubr.bf16.mxu1 %v9578_v1  ;;  %v7944_v36 = vcombine.high %v4518_v47, %v4522_v29  ;;  %v7943_v58 = vcombine.low %v4518_v47, %v4522_v29  ;;  %v9313_v24 = vld [vmem:[%s12324_s17 + $0x10c] ss:$12 sps:$4 sm:$0xff]   ;;  %v9311_v54 = vld [vmem:[%s12324_s17 + $0x108] ss:$12 sps:$4 sm:$0xff]  }
 0x6e1   :  { %4687 = vmatprep.mubr.bf16.mxu0 %v9578_v1  ;;  %v11400_v28 = vclamps-f32 %v4509_v27, 1.0  ;;  %4748 = vmatpush1.bf16.msra.mxu0 %v4589_v13  ;;  %v9315_v13 = vld [vmem:[%s12324_s17 + $0x50] ss:$12 sps:$4 sm:$0xff]   ;;  %v9316_v27 = vld [vmem:[%s12324_s17 + $0x120] ss:$12 sps:$4 sm:$0xff]  }
 0x6e2   :  { %4854 = vmatprep.subr.bf16.mxu1 %v4834_v57  ;;  %4905 = vmatprep.subr.bf16.mxu0 %v4840_v26  ;;  %v4846_v40 = vand.u32 %v7944_v36, %v11020_v50  ;;  %v4843_v43 = vand.u32 %v7943_v58, %v11020_v50  ;;  %v9272_v50 = vld [vmem:[%s12324_s17] ss:$12 sps:$4 sm:$0xff]   ;;  %v9318_v57 = vld [vmem:[%s12324_s17 + $0x124] ss:$12 sps:$4 sm:$0xff]   ;;  %v9319_v26 = vld [vmem:[%s12324_s17 + $0x128] ss:$12 sps:$4 sm:$0xff]  }
 0x6e3   :  { %v4525_v12 = vpack.c.bf16 %v11400_v28, %v11400_v28  ;;  %v9321_v47 = vld [vmem:[%s12324_s17 + $0x138] ss:$12 sps:$4 sm:$0xff]   ;;  %v9323_v29 = vld [vmem:[%s12324_s17 + $0x13c] ss:$12 sps:$4 sm:$0xff]  }
 0x6e4   :  { %v9326_v36 = vld [vmem:[%s12324_s17 + $0x150] ss:$12 sps:$4 sm:$0xff]  }
 0x6e5   :  { %v9338_v58 = vld [vmem:[%s12324_s17 + $0x184] ss:$12 sps:$4 sm:$0xff]  }
 0x6e7   :  { %7932 = vmatmul.mubr.msk.bf16.gmra.mrb[44].mxu1 %vm3183_vm7, %v4525_v12  ;;  %7934 = vmatmul.mubr.msk.bf16.gmra.mrb[96].mxu0 %vm3183_vm7, %v4525_v12 }
 0x6e8   :  { %4728 = vmatprep.mubr.bf16.mxu1 %v9578_v1  ;;  %4779 = vmatprep.mubr.bf16.mxu0 %v9578_v1 }
 0x6ef   :  { %7935 = vmatmul.mubr.msk.bf16.vlgmr.msra.gmra.mrb[48].mxu1 %vm3183_vm7, %v4524_v60  ;;  %7937 = vmatmul.mubr.msk.bf16.vlgmr.msra.gmra.mrb[100].mxu0 %vm3183_vm7, %v4524_v60  ;;  %v9314_v60 = vld [vmem:[%s12324_s17 + $0x110] ss:$12 sps:$4 sm:$0xff]  }
 0x6f0   :  { %4855 = vmatpush1.bf16.msra.mxu1 %v4831_v39  ;;  %4738 = vmatprep.mubr.bf16.mxu1 %v9578_v1  ;;  %v9333_v39 = vld [vmem:[%s12324_s17 + $0x16c] ss:$12 sps:$4 sm:$0xff]  }
 0x6f1   :  { %4789 = vmatprep.mubr.bf16.mxu0 %v9578_v1  ;;  %4906 = vmatpush1.bf16.msra.mxu0 %v4837_v30  ;;  %v9334_v30 = vld [vmem:[%s12324_s17 + $0x170] ss:$12 sps:$4 sm:$0xff]  }
 0x6f2   :  { %4956 = vmatprep.subr.bf16.mxu1 %v4846_v40  ;;  %5007 = vmatprep.subr.bf16.mxu0 %v4852_v41  ;;  %v9331_v40 = vld [vmem:[%s12324_s17 + $0x168] ss:$12 sps:$4 sm:$0xff]   ;;  %v9335_v41 = vld [vmem:[%s12324_s17 + $0xb0] ss:$12 sps:$4 sm:$0xff]  }
 0x6f7   :  { %7936 = vmatmul.mubr.msk.bf16.gmra.mrb[52].mxu1 %vm3183_vm7, %v4525_v12  ;;  %7938 = vmatmul.mubr.msk.bf16.gmra.mrb[104].mxu0 %vm3183_vm7, %v4525_v12  ;;  %v9320_v12 = vld [vmem:[%s12324_s17 + $0x68] ss:$12 sps:$4 sm:$0xff]  }
 0x6f8   :  { %4886 = vmatprep.mubr.bf16.mxu1 %v9578_v1  ;;  %4937 = vmatprep.mubr.bf16.mxu0 %v9578_v1 }
 0x6ff   :  { %7947 = vmatmul.mubr.msk.bf16.vlgmr.msra.gmra.mrb[40].mxu1 %vm3323_vm8, %v9743_v16  ;;  %7949 = vmatmul.mubr.msk.bf16.vlgmr.msra.gmra.mrb[92].mxu0 %vm3323_vm8, %v9743_v16 }
 0x700   :  { %4896 = vmatprep.mubr.bf16.mxu1 %v9578_v1  ;;  %4947 = vmatprep.mubr.bf16.mxu0 %v9578_v1 }
 0x701   :  { %4957 = vmatpush1.bf16.msra.mxu1 %v4843_v43  ;;  %5008 = vmatpush1.bf16.msra.mxu0 %v4849_v48 }
 0x702   :  { %5813 = vmatprep.subr.bf16.mxu1 %v9274_v6  ;;  %8308 = vmatprep.subr.bf16.mxu0 %v9299_v62 }
 0x707   :  { %7948 = vmatmul.mubr.msk.bf16.gmra.mrb[56].mxu1 %vm3323_vm8, %v9745_v17  ;;  %7950 = vmatmul.mubr.msk.bf16.gmra.mrb[108].mxu0 %vm3323_vm8, %v9745_v17 }
 0x708   :  { %4988 = vmatprep.mubr.bf16.mxu1 %v9578_v1  ;;  %5039 = vmatprep.mubr.bf16.mxu0 %v9578_v1 }
 0x70f   :  { %7951 = vmatmul.mubr.msk.bf16.vlgmr.msra.gmra.mrb[48].mxu1 %vm3323_vm8, %v9743_v16  ;;  %7953 = vmatmul.mubr.msk.bf16.vlgmr.msra.gmra.mrb[100].mxu0 %vm3323_vm8, %v9743_v16  ;;  %v9281_v16 = vld [vmem:[%s12324_s17 + $0x48] ss:$12 sps:$4 sm:$0xff]  }
 0x710   :  { %4998 = vmatprep.mubr.bf16.mxu1 %v9578_v1  ;;  %5049 = vmatprep.mubr.bf16.mxu0 %v9578_v1  ;;  %v9283_v1 = vld [vmem:[%s12324_s17 + $0x4c] ss:$12 sps:$4 sm:$0xff]  }
 0x711   :  { %5814 = vmatpush1.bf16.msra.mxu1 %v9272_v50  ;;  %8309 = vmatpush3.bf16.msra.mxu0 %v9300_v18 }
 0x712   :  { %5815 = vmatprep.subr.bf16.mxu1 %v9277_v4  ;;  %8310 = vmatprep.subr.bf16.mxu0 %v9304_v52 }
 0x715   :  { %5816 = vmatpush1.bf16.msra.mxu1 %v9275_v10  ;;  %8311 = vmatpush3.bf16.msra.mxu0 %v9305_v21 }
 0x716   :  { %5817 = vmatprep.subr.bf16.mxu1 %v9280_v53  ;;  %8312 = vmatprep.subr.bf16.mxu0 %v9309_v49 }
 0x717   :  { %7952 = vmatmul.mubr.msk.bf16.gmra.mrb[60].mxu1 %vm3323_vm8, %v9745_v17  ;;  %7954 = vmatmul.mubr.msk.bf16.gmra.mrb[112].mxu0 %vm3323_vm8, %v9745_v17  ;;  %v9289_v17 = vld [vmem:[%s12324_s17 + $0x7c] ss:$12 sps:$4 sm:$0xff]  }
 0x719   :  { %5818 = vmatpush1.bf16.msra.mxu1 %v9278_v3  ;;  %8313 = vmatpush3.bf16.msra.mxu0 %v9310_v23 }
 0x71a   :  { %5819 = vmatprep.subr.bf16.mxu1 %v9283_v1  ;;  %8314 = vmatprep.subr.bf16.mxu0 %v9314_v60 }
 0x71d   :  { %5820 = vmatpush1.bf16.msra.mxu1 %v9281_v16  ;;  %8315 = vmatpush3.bf16.msra.mxu0 %v9315_v13 }
 0x71e   :  { %5821 = vmatprep.subr.bf16.mxu1 %v9286_v7  ;;  %8316 = vmatprep.subr.bf16.mxu0 %v9319_v26 }
 0x721   :  { %5822 = vmatpush1.bf16.msra.mxu1 %v9284_v38  ;;  %8317 = vmatpush3.bf16.msra.mxu0 %v9320_v12 }
 0x722   :  { %5823 = vmatprep.subr.bf16.mxu1 %v9289_v17  ;;  %8318 = vmatprep.subr.bf16.mxu0 %v9324_v59 }
 0x725   :  { %5824 = vmatpush1.bf16.msra.mxu1 %v9287_v61  ;;  %8319 = vmatpush3.bf16.msra.mxu0 %v9325_v31 }
 0x726   :  { %5825 = vmatprep.subr.bf16.mxu1 %v9292_v8  ;;  %8320 = vmatprep.subr.bf16.mxu0 %v9329_v33  ;;  %v11617_v8 = vld [vmem:[%s12328_s16] sm:$0xff] }
 0x727   :  { %v5067_v62 = vrot.slane %v11617_v8, %v9979_v37 }
 0x729   :  { %5826 = vmatpush1.bf16.msra.mxu1 %v9290_v2  ;;  %8321 = vmatpush3.bf16.msra.mxu0 %v9330_v9 }
 0x72a   :  { %5827 = vmatprep.subr.bf16.mxu1 %v9295_v14  ;;  %8322 = vmatprep.subr.bf16.mxu0 %v9334_v30 }
 0x72d   :  { %5828 = vmatpush1.bf16.msra.mxu1 %v9293_v11  ;;  %8323 = vmatpush3.bf16.msra.mxu0 %v9335_v41  ;;  %v5063_v11 = vrot.slane %v11617_v8, %v9973_v35 }
 0x72e   :  { %5829 = vmatprep.subr.bf16.mxu1 %v9298_v0  ;;  %8336 = vmatprep.subr.bf16.mxu0 %v9339_v42  ;;  %v11623_v0 = vrot.slane %v11617_v8, %v9984_v45  ;;  %v9340_v42 = vld [vmem:[%s12324_s17 + $0x188] ss:$12 sps:$4 sm:$0xff]  }
 0x731   :  { %5830 = vmatpush1.bf16.msra.mxu1 %v9296_v15  ;;  %v11629_v15 = vrot.slane %v11617_v8, %v9987_v46 }
 0x732   :  { %5831 = vmatprep.subr.bf16.mxu1 %v9303_v20 }
 0x735   :  { %5832 = vmatpush1.bf16.msra.mxu1 %v9301_v44 }
 0x736   :  { %5833 = vmatprep.subr.bf16.mxu1 %v9308_v22 }
 0x739   :  { %5834 = vmatpush1.bf16.msra.mxu1 %v9306_v25 }
 0x73a   :  { %5835 = vmatprep.subr.bf16.mxu1 %v9313_v24 }
 0x73d   :  { %5836 = vmatpush1.bf16.msra.mxu1 %v9311_v54 }
 0x73e   :  { %5837 = vmatprep.subr.bf16.mxu1 %v9318_v57 }
 0x741   :  { %5838 = vmatpush1.bf16.msra.mxu1 %v9316_v27 }
 0x742   :  { %5839 = vmatprep.subr.bf16.mxu1 %v9323_v29 }
 0x745   :  { %5840 = vmatpush1.bf16.msra.mxu1 %v9321_v47 }
 0x746   :  { %5841 = vmatprep.subr.bf16.mxu1 %v9328_v32 }
 0x749   :  { %5842 = vmatpush1.bf16.msra.mxu1 %v9326_v36 }
 0x74a   :  { %5843 = vmatprep.subr.bf16.mxu1 %v9333_v39  ;;  %v9336_v39 = vld [vmem:[%s12324_s17 + $0x180] ss:$12 sps:$4 sm:$0xff]  }
 0x74d   :  { %5844 = vmatpush1.bf16.msra.mxu1 %v9331_v40 }
 0x74e   :  { %5864 = vmatprep.subr.bf16.mxu1 %v9338_v58 }
 0x7ba   :  { %v4638_v43 = vpop.f32.mrb[44].mxu1  ;;  %v4689_v48 = vpop.f32.mrb[96].mxu0 }
 0x7bb   :  { %v4640_v6 = vpop.f32.mrb[45].mxu1  ;;  %v4691_v50 = vpop.f32.mrb[97].mxu0 }
 0x7bc   :  { %v4642_v4 = vpop.f32.mrb[46].mxu1  ;;  %v4693_v10 = vpop.f32.mrb[98].mxu0 }
 0x7bd   :  { %v4643_v53 = vpop.f32.mrb[47].mxu1  ;;  %v4694_v3 = vpop.f32.mrb[99].mxu0  ;;  %v9343_v4 = vld [vmem:[%s12324_s17 + $0x19c] ss:$12 sps:$4 sm:$0xff]  }
 0x7ca   :  { %v11606_v1 = vpop.f32.mrb[52].mxu1  ;;  %v11608_v16 = vpop.f32.mrb[104].mxu0 }
 0x7cb   :  { %v11610_v7 = vpop.f32.mrb[53].mxu1  ;;  %v11612_v38 = vpop.f32.mrb[105].mxu0 }
 0x7cc   :  { %v4744_v17 = vpop.f32.mrb[54].mxu1  ;;  %v4795_v61 = vpop.f32.mrb[106].mxu0 }
 0x7cd   :  { %v4745_v2 = vpop.f32.mrb[55].mxu1  ;;  %v4796_v14 = vpop.f32.mrb[107].mxu0  ;;  %v9344_v61 = vld [vmem:[%s12324_s17 + $0x260] ss:$12 sps:$4 sm:$0xff]  }
 0x7ce   :  { %v5086_v2 = vsub.s32 6, %v9970_v34 }
 0x7d2   :  { %v4888_v18 = vpop.f32.mrb[40].mxu1  ;;  %v4939_v44 = vpop.f32.mrb[92].mxu0 }
 0x7d3   :  { %v5100_v20 = vadd.f32 %v5063_v11, %v4888_v18  ;;  %v5102_v52 = vadd.f32 %v11623_v0, %v4939_v44  ;;  %v4890_v21 = vpop.f32.mrb[41].mxu1  ;;  %v4941_v22 = vpop.f32.mrb[93].mxu0 }
 0x7d4   :  { %v5101_v49 = vadd.f32 %v5067_v62, %v4890_v21  ;;  %v5103_v25 = vadd.f32 %v11629_v15, %v4941_v22  ;;  %v4892_v23 = vpop.f32.mrb[42].mxu1  ;;  %v4943_v24 = vpop.f32.mrb[94].mxu0 }
 0x7d5   :  { %v5108_v60 = vadd.f32 %v5063_v11, %v4892_v23  ;;  %v5110_v54 = vadd.f32 %v11623_v0, %v4943_v24  ;;  %v4894_v13 = vpop.f32.mrb[43].mxu1  ;;  %v4945_v57 = vpop.f32.mrb[95].mxu0  ;;  %v5124_v27 = vmax.f32 %v5100_v20, 0.0  ;;  %v5126_v12 = vmax.f32 %v5102_v52, 0.0 }
 0x7d6   :  { %v5109_v26 = vadd.f32 %v5067_v62, %v4894_v13  ;;  %v5111_v46 = vadd.f32 %v11629_v15, %v4945_v57  ;;  %v5125_v59 = vmax.f32 %v5101_v49, 0.0  ;;  %v5127_v31 = vmax.f32 %v5103_v25, 0.0  ;;  %v9349_v25 = vld [vmem:[%s12324_s17 + $0x278] ss:$12 sps:$4 sm:$0xff]   ;;  %v9346_v57 = vld [vmem:[%s12324_s17 + $0x1b0] ss:$12 sps:$4 sm:$0xff]  }
 0x7d7   :  { %v5132_v47 = vmax.f32 %v5108_v60, 0.0  ;;  %v5134_v29 = vmax.f32 %v5110_v54, 0.0  ;;  %v5090_v52 = vsub.s32 7, %v9970_v34  ;;  %v11665_v34 = vrot.slane %v11617_v8, %v9990_v51 }
 0x7d8   :  { %v5133_v32 = vmax.f32 %v5109_v26, 0.0  ;;  %v5135_v33 = vmax.f32 %v5111_v46, 0.0  ;;  %v11678_v24 = vrot.slane %v11617_v8, %v9993_v55  ;;  %v9350_v26 = vld [vmem:[%s12324_s17 + $0x1b8] ss:$12 sps:$4 sm:$0xff]  }
 0x7d9   :  { %v5148_v36 = vpack.c.bf16 %v5132_v47, %v5124_v27  ;;  %v11635_v9 = vpack.c.bf16 %v5134_v29, %v5126_v12  ;;  %v11681_v60 = vrot.slane %v11617_v8, %v5090_v52 }
 0x7da   :  { %v5149_v30 = vpack.c.bf16 %v5133_v32, %v5125_v59  ;;  %v11640_v40 = vpack.c.bf16 %v5135_v33, %v5127_v31  ;;  %v4898_v41 = vpop.f32.mrb[56].mxu1  ;;  %v4949_v58 = vpop.f32.mrb[108].mxu0  ;;  %v9353_v32 = vld [vmem:[%s12324_s17 + $0x1cc] ss:$12 sps:$4 sm:$0xff]   ;;  %v9354_v33 = vld [vmem:[%s12324_s17 + $0x290] ss:$12 sps:$4 sm:$0xff]  }
 0x7db   :  { %v4899_v10 = vadd.f32 %v4898_v41, %v4638_v43  ;;  %v11648_v53 = vadd.f32 %v4949_v58, %v4689_v48  ;;  %v4900_v3 = vpop.f32.mrb[57].mxu1  ;;  %v4951_v17 = vpop.f32.mrb[109].mxu0 }
 0x7dc   :  { %v4901_v14 = vadd.f32 %v4900_v3, %v4640_v6  ;;  %v11654_v18 = vadd.f32 %v4951_v17, %v4691_v50  ;;  %5845 = vmatprep.mubr.bf16.mxu1 %v5149_v30  ;;  %5947 = vmatprep.mubr.bf16.mxu0 %v5149_v30  ;;  %v4902_v44 = vpop.f32.mrb[58].mxu1  ;;  %v4953_v20 = vpop.f32.mrb[110].mxu0  ;;  %v9341_v6 = vld [vmem:[%s12324_s17 + $0x198] ss:$12 sps:$4 sm:$0xff]   ;;  %v9345_v50 = vld [vmem:[%s12324_s17 + $0x1a0] ss:$12 sps:$4 sm:$0xff]  }
 0x7dd   :  { %v5116_v43 = vadd.f32 %v5063_v11, %v4899_v10  ;;  %5846 = vmatmul.mubr.bf16.vlgmr.msra.gmra.mrb[64].mxu1 %v5148_v36  ;;  %5948 = vmatmul.mubr.bf16.vlgmr.msra.gmra.mrb[116].mxu0 %v5148_v36  ;;  %v4903_v48 = vpop.f32.mrb[59].mxu1  ;;  %v4954_v21 = vpop.f32.mrb[111].mxu0  ;;  %v11668_v11 = vrot.slane %v11617_v8, %v5086_v2  ;;  %v9355_v10 = vld [vmem:[%s12324_s17 + $0x1d0] ss:$12 sps:$4 sm:$0xff]   ;;  %v9359_v44 = vld [vmem:[%s12324_s17 + $0x2a8] ss:$12 sps:$4 sm:$0xff]  }
 0x7de   :  { %v5117_v22 = vadd.f32 %v5067_v62, %v4901_v14  ;;  %5865 = vmatpush1.bf16.msra.mxu1 %v9336_v39  ;;  %8337 = vmatpush3.bf16.msra.mxu0 %v9340_v42  ;;  %v9348_v62 = vld [vmem:[%s12324_s17 + $0x1b4] ss:$12 sps:$4 sm:$0xff]   ;;  %v9358_v3 = vld [vmem:[%s12324_s17 + $0x1e4] ss:$12 sps:$4 sm:$0xff]  }
 0x7df   :  { %v5140_v49 = vmax.f32 %v5116_v43, 0.0  ;;  %5866 = vmatprep.subr.bf16.mxu1 %v9343_v4  ;;  %8338 = vmatprep.subr.bf16.mxu0 %v9344_v61  ;;  %v9351_v4 = vld [vmem:[%s12324_s17 + $0x1c8] ss:$12 sps:$4 sm:$0xff]  }
 0x7e0   :  { %v5141_v23 = vmax.f32 %v5117_v22, 0.0 }
 0x7e1   :  { %v5152_v46 = vpack.c.bf16 %v5140_v49, %v5140_v49 }
 0x7e2   :  { %v5153_v51 = vpack.c.bf16 %v5141_v23, %v5141_v23  ;;  %5867 = vmatpush1.bf16.msra.mxu1 %v9341_v6  ;;  %8339 = vmatpush3.bf16.msra.mxu0 %v9345_v50  ;;  %v4990_v54 = vpop.f32.mrb[48].mxu1  ;;  %v5041_v13 = vpop.f32.mrb[100].mxu0 }
 0x7e3   :  { %v5104_v55 = vadd.f32 %v11665_v34, %v4990_v54  ;;  %v5106_v27 = vadd.f32 %v11668_v11, %v5041_v13  ;;  %v4992_v8 = vpop.f32.mrb[49].mxu1  ;;  %v5043_v12 = vpop.f32.mrb[101].mxu0  ;;  %5868 = vmatprep.subr.bf16.mxu1 %v9348_v62  ;;  %8340 = vmatprep.subr.bf16.mxu0 %v9349_v25  ;;  %v9356_v62 = vld [vmem:[%s12324_s17 + $0x1e0] ss:$12 sps:$4 sm:$0xff]   ;;  %v9360_v25 = vld [vmem:[%s12324_s17 + $0x1e8] ss:$12 sps:$4 sm:$0xff]  }
 0x7e4   :  { %v5105_v47 = vadd.f32 %v11678_v24, %v4992_v8  ;;  %v5107_v29 = vadd.f32 %v11681_v60, %v5043_v12  ;;  %v4994_v59 = vpop.f32.mrb[50].mxu1  ;;  %v5045_v31 = vpop.f32.mrb[102].mxu0  ;;  %5855 = vmatprep.mubr.bf16.mxu1 %v5153_v51  ;;  %5955 = vmatprep.mubr.bf16.mxu0 %v5153_v51 }
 0x7e5   :  { %v5112_v36 = vadd.f32 %v11665_v34, %v4994_v59  ;;  %v5114_v39 = vadd.f32 %v11668_v11, %v5045_v31  ;;  %v4996_v30 = vpop.f32.mrb[51].mxu1  ;;  %v5047_v41 = vpop.f32.mrb[103].mxu0  ;;  %5856 = vmatmul.mubr.bf16.gmra.mrb[68].mxu1 %v5152_v46  ;;  %5956 = vmatmul.mubr.bf16.gmra.mrb[120].mxu0 %v5152_v46  ;;  %v5128_v17 = vmax.f32 %v5104_v55, 0.0  ;;  %v5130_v61 = vmax.f32 %v5106_v27, 0.0  ;;  %v9370_v59 = vld [vmem:[%s12324_s17 + $0x218] ss:$12 sps:$4 sm:$0xff]  }
 0x7e6   :  { %v5113_v58 = vadd.f32 %v11678_v24, %v4996_v30  ;;  %v5115_v42 = vadd.f32 %v11681_v60, %v5047_v41  ;;  %5869 = vmatpush1.bf16.msra.mxu1 %v9346_v57  ;;  %8341 = vmatpush3.bf16.msra.mxu0 %v9350_v26  ;;  %v5129_v20 = vmax.f32 %v5105_v47, 0.0  ;;  %v5131_v52 = vmax.f32 %v5107_v29, 0.0  ;;  %v9363_v57 = vld [vmem:[%s12324_s17 + $0x1fc] ss:$12 sps:$4 sm:$0xff]   ;;  %v9364_v26 = vld [vmem:[%s12324_s17 + $0x2c0] ss:$12 sps:$4 sm:$0xff]  }
 0x7e7   :  { %v5136_v2 = vmax.f32 %v5112_v36, 0.0  ;;  %v5138_v14 = vmax.f32 %v5114_v39, 0.0  ;;  %5896 = vmatprep.mubr.bf16.mxu1 %v11640_v40  ;;  %5995 = vmatprep.mubr.bf16.mxu0 %v11640_v40  ;;  %v9373_v31 = vld [vmem:[%s12324_s17 + $0x22c] ss:$12 sps:$4 sm:$0xff]   ;;  %v9371_v36 = vld [vmem:[%s12324_s17 + $0x228] ss:$12 sps:$4 sm:$0xff]  }
 0x7e8   :  { %v5137_v43 = vmax.f32 %v5113_v58, 0.0  ;;  %v5139_v48 = vmax.f32 %v5115_v42, 0.0  ;;  %5870 = vmatprep.subr.bf16.mxu1 %v9353_v32  ;;  %8342 = vmatprep.subr.bf16.mxu0 %v9354_v33  ;;  %v9374_v32 = vld [vmem:[%s12324_s17 + $0x2f0] ss:$12 sps:$4 sm:$0xff]   ;;  %v5119_v33 = vadd.f32 %v11629_v15, %v11654_v18  ;;  %v9376_v41 = vld [vmem:[%s12324_s17 + $0x240] ss:$12 sps:$4 sm:$0xff]   ;;  %v5118_v58 = vadd.f32 %v11623_v0, %v11648_v53 }
 0x7e9   :  { %v11717_v21 = vpack.c.bf16 %v5136_v2, %v5128_v17  ;;  %v11719_v22 = vpack.c.bf16 %v5138_v14, %v5130_v61  ;;  %v9375_v39 = vld [vmem:[%s12324_s17 + $0x230] ss:$12 sps:$4 sm:$0xff]   ;;  %v9379_v42 = vld [vmem:[%s12327_s19] ss:$12 sps:$4 sm:$0xff]   ;;  %v9382_v0 = vld [vmem:[%s12324_s17 + $0x258] ss:$12 sps:$4 sm:$0xff]  }
 0x7ea   :  { %v11721_v6 = vpack.c.bf16 %v5137_v43, %v5129_v20  ;;  %v11723_v50 = vpack.c.bf16 %v5139_v48, %v5131_v52  ;;  %5871 = vmatpush1.bf16.msra.mxu1 %v9351_v4  ;;  %8343 = vmatpush3.bf16.msra.mxu0 %v9355_v10  ;;  %v5000_v40 = vpop.f32.mrb[60].mxu1  ;;  %v5051_v49 = vpop.f32.mrb[112].mxu0  ;;  %v9378_v30 = vld [vmem:[%s12324_s17 + $0x244] ss:$12 sps:$4 sm:$0xff]   ;;  %v5143_v18 = vmax.f32 %v5119_v33, 0.0  ;;  %v5142_v53 = vmax.f32 %v5118_v58, 0.0 }
 0x7eb   :  { %v5001_v23 = vadd.f32 %v5000_v40, %v11606_v1  ;;  %v5052_v51 = vadd.f32 %v5051_v49, %v11608_v16  ;;  %v5002_v54 = vpop.f32.mrb[61].mxu1  ;;  %v5053_v13 = vpop.f32.mrb[113].mxu0  ;;  %5872 = vmatprep.subr.bf16.mxu1 %v9358_v3  ;;  %8344 = vmatprep.subr.bf16.mxu0 %v9359_v44  ;;  %v9381_v15 = vld [vmem:[%s12327_s19 + $0x4] ss:$12 sps:$4 sm:$0xff]   ;;  %v9384_v4 = vld [vmem:[%s12324_s17 + $0x25c] ss:$12 sps:$4 sm:$0xff]  }
 0x7ec   :  { %v11740_v46 = vadd.f32 %v5002_v54, %v11610_v7  ;;  %v5054_v55 = vadd.f32 %v5053_v13, %v11612_v38  ;;  %v5004_v1 = vpop.f32.mrb[62].mxu1  ;;  %v5055_v27 = vpop.f32.mrb[114].mxu0  ;;  %v9361_v7 = vld [vmem:[%s12324_s17 + $0x1f8] ss:$12 sps:$4 sm:$0xff]   ;;  %v9365_v38 = vld [vmem:[%s12324_s17 + $0x200] ss:$12 sps:$4 sm:$0xff]   ;;  %v11801_v10 = vpack.c.bf16 %v5143_v18, %v5143_v18  ;;  %v11823_v44 = vpack.c.bf16 %v5142_v53, %v5142_v53 }
 0x7ed   :  { %v11744_v16 = vadd.f32 %v11665_v34, %v5001_v23  ;;  %v11747_v8 = vadd.f32 %v11668_v11, %v5052_v51  ;;  %v5005_v12 = vpop.f32.mrb[63].mxu1  ;;  %v5056_v47 = vpop.f32.mrb[115].mxu0  ;;  %v9368_v34 = vld [vmem:[%s12324_s17 + $0x214] ss:$12 sps:$4 sm:$0xff]   ;;  %v9369_v11 = vld [vmem:[%s12324_s17 + $0x2d8] ss:$12 sps:$4 sm:$0xff]  }
 0x7ee   :  { %v11750_v29 = vadd.f32 %v11681_v60, %v5054_v55  ;;  %5873 = vmatpush1.bf16.msra.mxu1 %v9356_v62  ;;  %8345 = vmatpush3.bf16.msra.mxu0 %v9360_v25  ;;  %v9366_v60 = vld [vmem:[%s12324_s17 + $0x210] ss:$12 sps:$4 sm:$0xff]   ;;  %v9385_v17 = vld [vmem:[%s12327_s19 + $0x18] ss:$12 sps:$4 sm:$0xff]   ;;  %v9390_v61 = vld [vmem:[%s12324_s17 + $0x274] ss:$12 sps:$4 sm:$0xff]  }
 0x7ef   :  { %5874 = vmatprep.subr.bf16.mxu1 %v9363_v57  ;;  %8346 = vmatprep.subr.bf16.mxu0 %v9364_v26  ;;  %v9387_v3 = vld [vmem:[%s12327_s19 + $0x1c] ss:$12 sps:$4 sm:$0xff]   ;;  %v9393_v2 = vld [vmem:[%s12327_s19 + $0x34] ss:$12 sps:$4 sm:$0xff]   ;;  %v9396_v52 = vld [vmem:[%s12324_s17 + $0x28c] ss:$12 sps:$4 sm:$0xff]  }
 0x7f0   :  { %v9388_v14 = vld [vmem:[%s12324_s17 + $0x270] ss:$12 sps:$4 sm:$0xff]   ;;  %v9399_v43 = vld [vmem:[%s12327_s19 + $0x4c] ss:$12 sps:$4 sm:$0xff]   ;;  %v9394_v48 = vld [vmem:[%s12324_s17 + $0x288] ss:$12 sps:$4 sm:$0xff]  }
 0x7f1   :  { %v9391_v20 = vld [vmem:[%s12327_s19 + $0x30] ss:$12 sps:$4 sm:$0xff]   ;;  %v9397_v40 = vld [vmem:[%s12327_s19 + $0x48] ss:$12 sps:$4 sm:$0xff]   ;;  %v9400_v25 = vld [vmem:[%s12324_s17 + $0x2a0] ss:$12 sps:$4 sm:$0xff]  }
 0x7f2   :  { %5875 = vmatpush1.bf16.msra.mxu1 %v9361_v7  ;;  %8347 = vmatpush3.bf16.msra.mxu0 %v9365_v38  ;;  %v9402_v49 = vld [vmem:[%s12324_s17 + $0x2a4] ss:$12 sps:$4 sm:$0xff]   ;;  %v9403_v23 = vld [vmem:[%s12327_s19 + $0x60] ss:$12 sps:$4 sm:$0xff]   ;;  %v9408_v51 = vld [vmem:[%s12324_s17 + $0x2bc] ss:$12 sps:$4 sm:$0xff]  }
 0x7f3   :  { %5876 = vmatprep.subr.bf16.mxu1 %v9368_v34  ;;  %8348 = vmatprep.subr.bf16.mxu0 %v9369_v11  ;;  %v9405_v62 = vld [vmem:[%s12327_s19 + $0x64] ss:$12 sps:$4 sm:$0xff]   ;;  %v9411_v54 = vld [vmem:[%s12327_s19 + $0x7c] ss:$12 sps:$4 sm:$0xff]   ;;  %v9414_v26 = vld [vmem:[%s12324_s17 + $0x2d4] ss:$12 sps:$4 sm:$0xff]  }
 0x7f4   :  { %v9406_v13 = vld [vmem:[%s12324_s17 + $0x2b8] ss:$12 sps:$4 sm:$0xff]   ;;  %v9417_v55 = vld [vmem:[%s12327_s19 + $0x94] ss:$12 sps:$4 sm:$0xff]   ;;  %v9412_v1 = vld [vmem:[%s12324_s17 + $0x2d0] ss:$12 sps:$4 sm:$0xff]  }
 0x7f5   :  { %v9409_v57 = vld [vmem:[%s12327_s19 + $0x78] ss:$12 sps:$4 sm:$0xff]   ;;  %v9415_v27 = vld [vmem:[%s12327_s19 + $0x90] ss:$12 sps:$4 sm:$0xff]   ;;  %v9418_v7 = vld [vmem:[%s12324_s17 + $0x2e8] ss:$12 sps:$4 sm:$0xff]  }
 0x7f6   :  { %5877 = vmatpush1.bf16.msra.mxu1 %v9366_v60  ;;  %8349 = vmatpush3.bf16.msra.mxu0 %v9370_v59  ;;  %v9420_v12 = vld [vmem:[%s12324_s17 + $0x2ec] ss:$12 sps:$4 sm:$0xff]   ;;  %v9421_v38 = vld [vmem:[%s12327_s19 + $0xa8] ss:$12 sps:$4 sm:$0xff]   ;;  %v9426_v11 = vld [vmem:[%s12327_s19 + $0xc4] ss:$12 sps:$4 sm:$0xff]  }
 0x7f7   :  { %5878 = vmatprep.subr.bf16.mxu1 %v9373_v31  ;;  %8350 = vmatprep.subr.bf16.mxu0 %v9374_v32  ;;  %v9423_v47 = vld [vmem:[%s12327_s19 + $0xac] ss:$12 sps:$4 sm:$0xff]   ;;  %v9427_v34 = vld [vmem:[%s12327_s19 + $0xc8] ss:$12 sps:$4 sm:$0xff]   ;;  %v9442_v18 = vld [vmem:[%s12327_s19 + $0x110] ss:$12 sps:$4 sm:$0xff]  }
 0x7f8   :  { %v9428_v60 = vld [vmem:[%s12327_s19 + $0x8] ss:$12 sps:$4 sm:$0xff]   ;;  %v9424_v59 = vld [vmem:[%s12327_s19 + $0xc0] ss:$12 sps:$4 sm:$0xff]   ;;  %v9443_v58 = vld [vmem:[%s12327_s19 + $0x50] ss:$12 sps:$4 sm:$0xff]  }
 0x7f9   :  { %v9432_v31 = vld [vmem:[%s12327_s19 + $0xe0] ss:$12 sps:$4 sm:$0xff]   ;;  %v9431_v32 = vld [vmem:[%s12327_s19 + $0xdc] ss:$12 sps:$4 sm:$0xff]  }
 0x7fa   :  { %5879 = vmatpush1.bf16.msra.mxu1 %v9371_v36  ;;  %8351 = vmatpush3.bf16.msra.mxu0 %v9375_v39  ;;  %v9433_v33 = vld [vmem:[%s12327_s19 + $0x20] ss:$12 sps:$4 sm:$0xff]   ;;  %v9429_v36 = vld [vmem:[%s12327_s19 + $0xd8] ss:$12 sps:$4 sm:$0xff]   ;;  %v9451_v53 = vld [vmem:[%s12327_s19 + $0x13c] ss:$12 sps:$4 sm:$0xff]  }
 0x7fb   :  { %5880 = vmatprep.subr.bf16.mxu1 %v9378_v30  ;;  %6685 = vmatprep.subr.bf16.mxu0 %v9381_v15  ;;  %v9437_v39 = vld [vmem:[%s12327_s19 + $0xf8] ss:$12 sps:$4 sm:$0xff]   ;;  %v9434_v15 = vld [vmem:[%s12327_s19 + $0xf0] ss:$12 sps:$4 sm:$0xff]  }
 0x7fc   :  { %v9438_v30 = vld [vmem:[%s12327_s19 + $0x38] ss:$12 sps:$4 sm:$0xff]  }
 0x7fd   :  { %5996 = vmatmul.mubr.bf16.vlgmr.msra.gmra.mrb[124].mxu0 %v11635_v9 }
 0x7fe   :  { %5881 = vmatpush1.bf16.msra.mxu1 %v9376_v41  ;;  %6003 = vmatprep.mubr.bf16.mxu0 %v11801_v10  ;;  %v9441_v41 = vld [vmem:[%s12327_s19 + $0x10c] ss:$12 sps:$4 sm:$0xff]  }
 0x7ff   :  { %6686 = vmatpush1.bf16.msra.mxu0 %v9379_v42  ;;  %5882 = vmatprep.subr.bf16.mxu1 %v9384_v4  ;;  %v9439_v42 = vld [vmem:[%s12327_s19 + $0x108] ss:$12 sps:$4 sm:$0xff]  }
 0x800   :  { %6687 = vmatprep.subr.bf16.mxu0 %v9387_v3  ;;  %v9447_v4 = vld [vmem:[%s12327_s19 + $0x128] ss:$12 sps:$4 sm:$0xff]   ;;  %v9444_v3 = vld [vmem:[%s12327_s19 + $0x120] ss:$12 sps:$4 sm:$0xff]  }
 0x802   :  { %5883 = vmatpush1.bf16.msra.mxu1 %v9382_v0  ;;  %v9452_v0 = vld [vmem:[%s12327_s19 + $0x140] ss:$12 sps:$4 sm:$0xff]  }
 0x803   :  { %6688 = vmatpush1.bf16.msra.mxu0 %v9385_v17  ;;  %5884 = vmatprep.subr.bf16.mxu1 %v9390_v61  ;;  %v9453_v17 = vld [vmem:[%s12327_s19 + $0x80] ss:$12 sps:$4 sm:$0xff]   ;;  %v9449_v61 = vld [vmem:[%s12327_s19 + $0x138] ss:$12 sps:$4 sm:$0xff]  }
 0x804   :  { %6689 = vmatprep.subr.bf16.mxu0 %v9393_v2  ;;  %v9457_v2 = vld [vmem:[%s12327_s19 + $0x158] ss:$12 sps:$4 sm:$0xff]  }
 0x805   :  { %6004 = vmatmul.mubr.bf16.gmra.mrb[128].mxu0 %v11823_v44 }
 0x806   :  { %5885 = vmatpush1.bf16.msra.mxu1 %v9388_v14  ;;  %6717 = vmatprep.mubr.bf16.mxu0 %v11721_v6  ;;  %v9456_v14 = vld [vmem:[%s12327_s19 + $0x154] ss:$12 sps:$4 sm:$0xff]  }
 0x807   :  { %6690 = vmatpush1.bf16.msra.mxu0 %v9391_v20  ;;  %5886 = vmatprep.subr.bf16.mxu1 %v9396_v52  ;;  %v9454_v20 = vld [vmem:[%s12327_s19 + $0x150] ss:$12 sps:$4 sm:$0xff]  }
 0x808   :  { %6691 = vmatprep.subr.bf16.mxu0 %v9399_v43  ;;  %v9462_v52 = vld [vmem:[%s12327_s19 + $0x170] ss:$12 sps:$4 sm:$0xff]   ;;  %v5121_v43 = vadd.f32 %v11678_v24, %v11740_v46  ;;  %v9467_v24 = vld [vmem:[%s12327_s19 + $0x248] ss:$12 sps:$4 sm:$0xff]  }
 0x80a   :  { %5887 = vmatpush1.bf16.msra.mxu1 %v9394_v48  ;;  %v9461_v48 = vld [vmem:[%s12327_s19 + $0x16c] ss:$12 sps:$4 sm:$0xff]   ;;  %v5145_v46 = vmax.f32 %v5121_v43, 0.0  ;;  %v9536_v43 = vld [vmem:[%s12329_s21 + $0x10] sm:$0xff]  }
 0x80b   :  { %6692 = vmatpush1.bf16.msra.mxu0 %v9397_v40  ;;  %5888 = vmatprep.subr.bf16.mxu1 %v9402_v49  ;;  %v9463_v40 = vld [vmem:[%s12327_s19 + $0xb0] ss:$12 sps:$4 sm:$0xff]   ;;  %v9459_v49 = vld [vmem:[%s12327_s19 + $0x168] ss:$12 sps:$4 sm:$0xff]  }
 0x80c   :  { %6693 = vmatprep.subr.bf16.mxu0 %v9405_v62  ;;  %v9466_v62 = vld [vmem:[%s12327_s19 + $0x184] ss:$12 sps:$4 sm:$0xff]  }
 0x80e   :  { %5889 = vmatpush1.bf16.msra.mxu1 %v9400_v25  ;;  %v9464_v25 = vld [vmem:[%s12327_s19 + $0x180] ss:$12 sps:$4 sm:$0xff]  }
 0x80f   :  { %6694 = vmatpush1.bf16.msra.mxu0 %v9403_v23  ;;  %5890 = vmatprep.subr.bf16.mxu1 %v9408_v51  ;;  %v6025_v23 = vpack.c.bf16 %v5145_v46, %v5145_v46  ;;  %v9468_v51 = vld [vmem:[%s12327_s19 + $0x188] ss:$12 sps:$4 sm:$0xff]   ;;  %v9538_v46 = vld [vmem:[%s12329_s21 + $0x18] sm:$0xff]  }
 0x810   :  { %6695 = vmatprep.subr.bf16.mxu0 %v9411_v54  ;;  %v9471_v54 = vld [vmem:[%s12327_s19 + $0x19c] ss:$12 sps:$4 sm:$0xff]  }
 0x812   :  { %5891 = vmatpush1.bf16.msra.mxu1 %v9406_v13  ;;  %v9472_v13 = vld [vmem:[%s12327_s19 + $0x260] ss:$12 sps:$4 sm:$0xff]  }
 0x813   :  { %6696 = vmatpush1.bf16.msra.mxu0 %v9409_v57  ;;  %5892 = vmatprep.subr.bf16.mxu1 %v9414_v26  ;;  %v5144_v57 = vmax.f32 %v11744_v16, 0.0  ;;  %v9469_v26 = vld [vmem:[%s12327_s19 + $0x198] ss:$12 sps:$4 sm:$0xff]  }
 0x814   :  { %6697 = vmatprep.subr.bf16.mxu0 %v9417_v55  ;;  %v9473_v55 = vld [vmem:[%s12327_s19 + $0x1a0] ss:$12 sps:$4 sm:$0xff]  }
 0x815   :  { %v6024_v16 = vpack.c.bf16 %v5144_v57, %v5144_v57  ;;  %v9524_v57 = vld [vmem:[%s12327_s19 + $0x2d4] ss:$12 sps:$4 sm:$0xff]  }
 0x816   :  { %5893 = vmatpush1.bf16.msra.mxu1 %v9412_v1  ;;  %v9476_v1 = vld [vmem:[%s12327_s19 + $0x1b4] ss:$12 sps:$4 sm:$0xff]  }
 0x817   :  { %6698 = vmatpush1.bf16.msra.mxu0 %v9415_v27  ;;  %5894 = vmatprep.subr.bf16.mxu1 %v9420_v12  ;;  %v9474_v27 = vld [vmem:[%s12327_s19 + $0x1b0] ss:$12 sps:$4 sm:$0xff]   ;;  %v9478_v12 = vld [vmem:[%s12327_s19 + $0x1b8] ss:$12 sps:$4 sm:$0xff]  }
 0x818   :  { %6699 = vmatprep.subr.bf16.mxu0 %v9423_v47  ;;  %v9481_v47 = vld [vmem:[%s12327_s19 + $0x1cc] ss:$12 sps:$4 sm:$0xff]  }
 0x81a   :  { %5895 = vmatpush1.bf16.msra.mxu1 %v9418_v7  ;;  %v9482_v7 = vld [vmem:[%s12327_s19 + $0x290] ss:$12 sps:$4 sm:$0xff]  }
 0x81b   :  { %6700 = vmatpush1.bf16.msra.mxu0 %v9421_v38  ;;  %8364 = vmatprep.subr.bf16.mxu1 %v9427_v34  ;;  %v9479_v38 = vld [vmem:[%s12327_s19 + $0x1c8] ss:$12 sps:$4 sm:$0xff]   ;;  %v9483_v34 = vld [vmem:[%s12327_s19 + $0x1d0] ss:$12 sps:$4 sm:$0xff]  }
 0x81c   :  { %6701 = vmatprep.subr.bf16.mxu0 %v9426_v11  ;;  %v9486_v11 = vld [vmem:[%s12327_s19 + $0x1e4] ss:$12 sps:$4 sm:$0xff]  }
 0x81d   :  { %5897 = vmatmul.mubr.bf16.vlgmr.msra.gmra.mrb[64].mxu1 %v11635_v9  ;;  %v9436_v9 = vld [vmem:[%s12327_s19 + $0xf4] ss:$12 sps:$4 sm:$0xff]  }
 0x81e   :  { %5906 = vmatprep.mubr.bf16.mxu1 %v11801_v10  ;;  %8365 = vmatpush3.bf16.msra.mxu1 %v9428_v60  ;;  %v9446_v10 = vld [vmem:[%s12327_s19 + $0x124] ss:$12 sps:$4 sm:$0xff]   ;;  %v9487_v60 = vld [vmem:[%s12327_s19 + $0x2a8] ss:$12 sps:$4 sm:$0xff]  }
 0x81f   :  { %6702 = vmatpush1.bf16.msra.mxu0 %v9424_v59  ;;  %8366 = vmatprep.subr.bf16.mxu1 %v9432_v31  ;;  %v9488_v59 = vld [vmem:[%s12327_s19 + $0x1e8] ss:$12 sps:$4 sm:$0xff]  }
 0x820   :  { %6703 = vmatprep.subr.bf16.mxu0 %v9431_v32  ;;  %v9491_v31 = vld [vmem:[%s12327_s19 + $0x1fc] ss:$12 sps:$4 sm:$0xff]   ;;  %v9492_v32 = vld [vmem:[%s12327_s19 + $0x2c0] ss:$12 sps:$4 sm:$0xff]  }
 0x822   :  { %8367 = vmatpush3.bf16.msra.mxu1 %v9433_v33  ;;  %v9489_v33 = vld [vmem:[%s12327_s19 + $0x1f8] ss:$12 sps:$4 sm:$0xff]  }
 0x823   :  { %6704 = vmatpush1.bf16.msra.mxu0 %v9429_v36  ;;  %8368 = vmatprep.subr.bf16.mxu1 %v9437_v39  ;;  %v9493_v36 = vld [vmem:[%s12327_s19 + $0x200] ss:$12 sps:$4 sm:$0xff]  }
 0x824   :  { %6705 = vmatprep.subr.bf16.mxu0 %v9436_v9  ;;  %v9496_v39 = vld [vmem:[%s12327_s19 + $0x214] ss:$12 sps:$4 sm:$0xff]   ;;  %v9497_v9 = vld [vmem:[%s12327_s19 + $0x2d8] ss:$12 sps:$4 sm:$0xff]  }
 0x825   :  { %5907 = vmatmul.mubr.bf16.gmra.mrb[68].mxu1 %v11823_v44  ;;  %v9458_v44 = vld [vmem:[%s12327_s19 + $0x98] ss:$12 sps:$4 sm:$0xff]  }
 0x826   :  { %8369 = vmatpush3.bf16.msra.mxu1 %v9438_v30  ;;  %6819 = vmatprep.mubr.bf16.mxu1 %v11721_v6  ;;  %v9448_v6 = vld [vmem:[%s12327_s19 + $0x68] ss:$12 sps:$4 sm:$0xff]   ;;  %v9494_v30 = vld [vmem:[%s12327_s19 + $0x210] ss:$12 sps:$4 sm:$0xff]  }
 0x827   :  { %6706 = vmatpush1.bf16.msra.mxu0 %v9434_v15  ;;  %8370 = vmatprep.subr.bf16.mxu1 %v9442_v18  ;;  %v9498_v15 = vld [vmem:[%s12327_s19 + $0x218] ss:$12 sps:$4 sm:$0xff]  }
 0x828   :  { %6707 = vmatprep.subr.bf16.mxu0 %v9441_v41  ;;  %v9501_v18 = vld [vmem:[%s12327_s19 + $0x22c] ss:$12 sps:$4 sm:$0xff]   ;;  %v9499_v41 = vld [vmem:[%s12327_s19 + $0x228] ss:$12 sps:$4 sm:$0xff]  }
 0x82a   :  { %8371 = vmatpush3.bf16.msra.mxu1 %v9443_v58  ;;  %v9502_v58 = vld [vmem:[%s12327_s19 + $0x2f0] ss:$12 sps:$4 sm:$0xff]  }
 0x82b   :  { %6708 = vmatpush1.bf16.msra.mxu0 %v9439_v42  ;;  %8372 = vmatprep.subr.bf16.mxu1 %v9447_v4  ;;  %v9503_v42 = vld [vmem:[%s12327_s19 + $0x230] ss:$12 sps:$4 sm:$0xff]  }
 0x82c   :  { %6709 = vmatprep.subr.bf16.mxu0 %v9446_v10  ;;  %v9506_v4 = vld [vmem:[%s12327_s19 + $0x244] ss:$12 sps:$4 sm:$0xff]   ;;  %v9504_v10 = vld [vmem:[%s12327_s19 + $0x240] ss:$12 sps:$4 sm:$0xff]  }
 0x82e   :  { %8373 = vmatpush3.bf16.msra.mxu1 %v9448_v6  ;;  %v5147_v6 = vmax.f32 %v11750_v29, 0.0 }
 0x82f   :  { %6710 = vmatpush1.bf16.msra.mxu0 %v9444_v3  ;;  %8374 = vmatprep.subr.bf16.mxu1 %v9452_v0  ;;  %v9509_v3 = vld [vmem:[%s12327_s19 + $0x25c] ss:$12 sps:$4 sm:$0xff]   ;;  %v9530_v0 = vld [vmem:[%s12329_s21 + $0x40] sm:$0xff]  }
 0x830   :  { %6711 = vmatprep.subr.bf16.mxu0 %v9451_v53  ;;  %v9531_v53 = vld [vmem:[%s12329_s21] sm:$0xff]   ;;  %v12112_v29 = vpack.c.bf16 %v5147_v6, %v5147_v6 }
 0x832   :  { %8375 = vmatpush3.bf16.msra.mxu1 %v9453_v17  ;;  %v9507_v17 = vld [vmem:[%s12327_s19 + $0x258] ss:$12 sps:$4 sm:$0xff]  }
 0x833   :  { %6712 = vmatpush1.bf16.msra.mxu0 %v9449_v61  ;;  %8376 = vmatprep.subr.bf16.mxu1 %v9457_v2  ;;  %v9512_v61 = vld [vmem:[%s12327_s19 + $0x274] ss:$12 sps:$4 sm:$0xff]   ;;  %v9533_v2 = vld [vmem:[%s12329_s21 + $0x48] sm:$0xff]  }
 0x834   :  { %6713 = vmatprep.subr.bf16.mxu0 %v9456_v14  ;;  %v5146_v14 = vmax.f32 %v11747_v8, 0.0  ;;  %v9515_v8 = vld [vmem:[%s12327_s19 + $0x28c] ss:$12 sps:$4 sm:$0xff]  }
 0x836   :  { %8377 = vmatpush3.bf16.msra.mxu1 %v9458_v44  ;;  %v9534_v44 = vld [vmem:[%s12329_s21 + $0x8] sm:$0xff]  }
 0x837   :  { %6714 = vmatpush1.bf16.msra.mxu0 %v9454_v20  ;;  %8378 = vmatprep.subr.bf16.mxu1 %v9462_v52  ;;  %v9535_v20 = vld [vmem:[%s12329_s21 + $0x50] sm:$0xff]  }
 0x838   :  { %6715 = vmatprep.subr.bf16.mxu0 %v9461_v48  ;;  %v9510_v52 = vld [vmem:[%s12327_s19 + $0x270] ss:$12 sps:$4 sm:$0xff]  }
 0x839   :  { %v9537_v48 = vld [vmem:[%s12329_s21 + $0x58] sm:$0xff]  }
 0x83a   :  { %8379 = vmatpush3.bf16.msra.mxu1 %v9463_v40  ;;  %v6026_v40 = vpack.c.bf16 %v5146_v14, %v5146_v14 }
 0x83b   :  { %6716 = vmatpush1.bf16.msra.mxu0 %v9459_v49  ;;  %8392 = vmatprep.subr.bf16.mxu1 %v9467_v24  ;;  %v9513_v49 = vld [vmem:[%s12327_s19 + $0x288] ss:$12 sps:$4 sm:$0xff]   ;;  %v9518_v24 = vld [vmem:[%s12327_s19 + $0x2a4] ss:$12 sps:$4 sm:$0xff]  }
 0x83c   :  { %6736 = vmatprep.subr.bf16.mxu0 %v9466_v62  ;;  %v9539_v62 = vld [vmem:[%s12329_s21 + $0x60] sm:$0xff]  }
 0x83d   :  { %6820 = vmatmul.mubr.bf16.vlgmr.msra.gmra.mrb[72].mxu1 %v11717_v21 }
 0x83e   :  { %6718 = vmatmul.mubr.bf16.vlgmr.msra.gmra.mrb[132].mxu0 %v11717_v21  ;;  %6827 = vmatprep.mubr.bf16.mxu1 %v6025_v23  ;;  %v9477_v21 = vld [vmem:[%s12327_s19 + $0x278] ss:$12 sps:$4 sm:$0xff]  }
 0x83f   :  { %6727 = vmatprep.mubr.bf16.mxu0 %v6025_v23  ;;  %6737 = vmatpush1.bf16.msra.mxu0 %v9464_v25  ;;  %v9516_v25 = vld [vmem:[%s12327_s19 + $0x2a0] ss:$12 sps:$4 sm:$0xff]   ;;  %v9521_v23 = vld [vmem:[%s12327_s19 + $0x2bc] ss:$12 sps:$4 sm:$0xff]  }
 0x840   :  { %8393 = vmatpush3.bf16.msra.mxu1 %v9468_v51  ;;  %6738 = vmatprep.subr.bf16.mxu0 %v9471_v54  ;;  %v9540_v51 = vld [vmem:[%s12329_s21 + $0x20] sm:$0xff]   ;;  %v9541_v54 = vld [vmem:[%s12329_s21 + $0x68] sm:$0xff]  }
 0x841   :  { %8394 = vmatprep.subr.bf16.mxu1 %v9472_v13  ;;  %v9519_v13 = vld [vmem:[%s12327_s19 + $0x2b8] ss:$12 sps:$4 sm:$0xff]  }
 0x843   :  { %6739 = vmatpush1.bf16.msra.mxu0 %v9469_v26  ;;  %v9542_v26 = vld [vmem:[%s12329_s21 + $0x28] sm:$0xff]  }
 0x844   :  { %8395 = vmatpush3.bf16.msra.mxu1 %v9473_v55  ;;  %6740 = vmatprep.subr.bf16.mxu0 %v9476_v1  ;;  %v9522_v55 = vld [vmem:[%s12327_s19 + $0x2d0] ss:$12 sps:$4 sm:$0xff]  }
 0x845   :  { %6828 = vmatmul.mubr.bf16.gmra.mrb[76].mxu1 %v6024_v16  ;;  %8396 = vmatprep.subr.bf16.mxu1 %v9477_v21  ;;  %v9543_v1 = vld [vmem:[%s12329_s21 + $0x70] sm:$0xff]   ;;  %v9527_v21 = vld [vmem:[%s12327_s19 + $0x2ec] ss:$12 sps:$4 sm:$0xff]  }
 0x846   :  { %6728 = vmatmul.mubr.bf16.gmra.mrb[136].mxu0 %v6024_v16  ;;  %6867 = vmatprep.mubr.bf16.mxu1 %v11723_v50  ;;  %v9544_v16 = vld [vmem:[%s12329_s21 + $0x30] sm:$0xff]  }
 0x847   :  { %6741 = vmatpush1.bf16.msra.mxu0 %v9474_v27  ;;  %6768 = vmatprep.mubr.bf16.mxu0 %v11723_v50  ;;  %v9484_v50 = vld [vmem:[%s12327_s19 + $0x1e0] ss:$12 sps:$4 sm:$0xff]   ;;  %v9525_v27 = vld [vmem:[%s12327_s19 + $0x2e8] ss:$12 sps:$4 sm:$0xff]  }
 0x848   :  { %8397 = vmatpush3.bf16.msra.mxu1 %v9478_v12  ;;  %6742 = vmatprep.subr.bf16.mxu0 %v9481_v47  ;;  %v9545_v12 = vld [vmem:[%s12329_s21 + $0x78] sm:$0xff]   ;;  %v9528_v47 = vld [vmem:[%s12329_s21 + $0x80] sm:$0xff]  }
 0x849   :  { %8398 = vmatprep.subr.bf16.mxu1 %v9482_v7  ;;  %v9546_v7 = vld [vmem:[%s12329_s21 + $0x38] sm:$0xff]  }
 0x84b   :  { %6743 = vmatpush1.bf16.msra.mxu0 %v9479_v38  ;;  %v9529_v38 = vld [vmem:[%s12329_s21 + $0x88] sm:$0xff]  }
 0x84c   :  { %8399 = vmatpush3.bf16.msra.mxu1 %v9483_v34  ;;  %6744 = vmatprep.subr.bf16.mxu0 %v9486_v11  ;;  %v9532_v34 = vld [vmem:[%s12329_s21 + $0x90] sm:$0x3f]  }
 0x84d   :  { %8400 = vmatprep.subr.bf16.mxu1 %v9487_v60  ;;  %v7063_v11 = vsel %vm3329_vm6, %v9532_v34, 0 }
 0x84f   :  { %6745 = vmatpush1.bf16.msra.mxu0 %v9484_v50 }
 0x850   :  { %8401 = vmatpush3.bf16.msra.mxu1 %v9488_v59  ;;  %6746 = vmatprep.subr.bf16.mxu0 %v9491_v31 }
 0x851   :  { %8402 = vmatprep.subr.bf16.mxu1 %v9492_v32 }
 0x853   :  { %6747 = vmatpush1.bf16.msra.mxu0 %v9489_v33  ;;  %v12211_v33 = vld [vmem:[%s12330_s23 + $0x80] sm:$0xff]  }
 0x854   :  { %8403 = vmatpush3.bf16.msra.mxu1 %v9493_v36  ;;  %6748 = vmatprep.subr.bf16.mxu0 %v9496_v39 }
 0x855   :  { %8404 = vmatprep.subr.bf16.mxu1 %v9497_v9 }
 0x857   :  { %6749 = vmatpush1.bf16.msra.mxu0 %v9494_v30 }
 0x858   :  { %8405 = vmatpush3.bf16.msra.mxu1 %v9498_v15  ;;  %6750 = vmatprep.subr.bf16.mxu0 %v9501_v18  ;;  %v9549_v18 = vld [vmem:[%s12330_s23 + $0x40] sm:$0xff]  }
 0x859   :  { %8406 = vmatprep.subr.bf16.mxu1 %v9502_v58 }
 0x85b   :  { %6751 = vmatpush1.bf16.msra.mxu0 %v9499_v41  ;;  %v5284_v41 = vld [vmem:[%s12331_s18] sm:$0x7] }
 0x85c   :  { %8407 = vmatpush3.bf16.msra.mxu1 %v9503_v42  ;;  %6752 = vmatprep.subr.bf16.mxu0 %v9506_v4  ;;  %v5297_v58 = vrot.slane %v5284_v41, %v9984_v45 }
 0x85d   :  { %8420 = vmatprep.subr.bf16.mxu1 %v9530_v0 }
 0x85f   :  { %6868 = vmatmul.mubr.bf16.vlgmr.msra.gmra.mrb[80].mxu1 %v11719_v22  ;;  %6753 = vmatpush1.bf16.msra.mxu0 %v9504_v10 }
 0x860   :  { %6875 = vmatprep.mubr.bf16.mxu1 %v12112_v29  ;;  %6754 = vmatprep.subr.bf16.mxu0 %v9509_v3 }
 0x861   :  { %8421 = vmatpush3.bf16.msra.mxu1 %v9531_v53 }
 0x862   :  { %8422 = vmatprep.subr.bf16.mxu1 %v9533_v2 }
 0x863   :  { %6755 = vmatpush1.bf16.msra.mxu0 %v9507_v17 }
 0x864   :  { %6756 = vmatprep.subr.bf16.mxu0 %v9512_v61 }
 0x865   :  { %8423 = vmatpush3.bf16.msra.mxu1 %v9534_v44 }
 0x866   :  { %8424 = vmatprep.subr.bf16.mxu1 %v9535_v20 }
 0x867   :  { %6876 = vmatmul.mubr.bf16.gmra.mrb[84].mxu1 %v6026_v40  ;;  %6757 = vmatpush1.bf16.msra.mxu0 %v9510_v52 }
 0x868   :  { %6758 = vmatprep.subr.bf16.mxu0 %v9515_v8 }
 0x869   :  { %8425 = vmatpush3.bf16.msra.mxu1 %v9536_v43 }
 0x86a   :  { %8426 = vmatprep.subr.bf16.mxu1 %v9537_v48 }
 0x86b   :  { %6759 = vmatpush1.bf16.msra.mxu0 %v9513_v49 }
 0x86c   :  { %6760 = vmatprep.subr.bf16.mxu0 %v9518_v24 }
 0x86d   :  { %8427 = vmatpush3.bf16.msra.mxu1 %v9538_v46  ;;  %v9550_v46 = vld [vmem:[%s12330_s23] sm:$0xff]  }
 0x86e   :  { %8428 = vmatprep.subr.bf16.mxu1 %v9539_v62 }
 0x86f   :  { %6761 = vmatpush1.bf16.msra.mxu0 %v9516_v25  ;;  %v9552_v25 = vld [vmem:[%s12330_s23 + $0x48] sm:$0xff]  }
 0x870   :  { %6762 = vmatprep.subr.bf16.mxu0 %v9521_v23  ;;  %v9553_v23 = vld [vmem:[%s12330_s23 + $0x8] sm:$0xff]  }
 0x871   :  { %8429 = vmatpush3.bf16.msra.mxu1 %v9540_v51  ;;  %v9554_v51 = vld [vmem:[%s12330_s23 + $0x50] sm:$0xff]  }
 0x872   :  { %8430 = vmatprep.subr.bf16.mxu1 %v9541_v54  ;;  %v9555_v54 = vld [vmem:[%s12330_s23 + $0x10] sm:$0xff]  }
 0x873   :  { %6763 = vmatpush1.bf16.msra.mxu0 %v9519_v13  ;;  %v9556_v13 = vld [vmem:[%s12330_s23 + $0x58] sm:$0xff]  }
 0x874   :  { %6764 = vmatprep.subr.bf16.mxu0 %v9524_v57  ;;  %v9557_v57 = vld [vmem:[%s12330_s23 + $0x18] sm:$0xff]  }
 0x875   :  { %8431 = vmatpush3.bf16.msra.mxu1 %v9542_v26  ;;  %v9558_v26 = vld [vmem:[%s12330_s23 + $0x60] sm:$0xff]  }
 0x876   :  { %8432 = vmatprep.subr.bf16.mxu1 %v9543_v1  ;;  %v5293_v1 = vrot.slane %v5284_v41, %v9979_v37 }
 0x877   :  { %6765 = vmatpush1.bf16.msra.mxu0 %v9522_v55  ;;  %v5289_v55 = vrot.slane %v5284_v41, %v9973_v35 }
 0x878   :  { %6766 = vmatprep.subr.bf16.mxu0 %v9527_v21  ;;  %v9559_v21 = vld [vmem:[%s12330_s23 + $0x20] sm:$0xff]  }
 0x879   :  { %8433 = vmatpush3.bf16.msra.mxu1 %v9544_v16 }
 0x87a   :  { %8434 = vmatprep.subr.bf16.mxu1 %v9545_v12 }
 0x87b   :  { %6767 = vmatpush1.bf16.msra.mxu0 %v9525_v27  ;;  %v9560_v27 = vld [vmem:[%s12330_s23 + $0x68] sm:$0xff]  }
 0x87c   :  { %8496 = vmatprep.subr.bf16.mxu0 %v9528_v47 }
 0x87d   :  { %8435 = vmatpush3.bf16.msra.mxu1 %v9546_v7 }
 0x87e   :  { %6769 = vmatmul.mubr.bf16.vlgmr.msra.gmra.mrb[132].mxu0 %v11719_v22  ;;  %8506 = vmatprep.subr.bf16.mxu1 %v12211_v33 }
 0x87f   :  { %6778 = vmatprep.mubr.bf16.mxu0 %v12112_v29  ;;  %8497 = vmatpush3.bf16.msra.mxu0 %v9528_v47 }
 0x880   :  { %8498 = vmatprep.subr.bf16.mxu0 %v9529_v38 }
 0x883   :  { %8499 = vmatpush3.bf16.msra.mxu0 %v9529_v38 }
 0x884   :  { %8653 = vmatprep.subr.msk.bf16.mxu0 %vm3329_vm6, %v9532_v34 }
 0x886   :  { %6779 = vmatmul.mubr.bf16.gmra.mrb[136].mxu0 %v6026_v40 }
 0x887   :  { %8501 = vmatpush3.bf16.msra.mxu0 %v7063_v11 }
 0x888   :  { %8453 = vmatprep.subr.bf16.mxu0 %v9549_v18  ;;  %v9564_v18 = vld [vmem:[%s12330_s23 + $0x78] sm:$0xff]  }
 0x8b0   :  { %v8324_v60 = vpop.f32.mrb[116].mxu0 }
 0x8b1   :  { %v8325_v50 = vpop.f32.mrb[117].mxu0 }
 0x8b2   :  { %v8326_v59 = vadd.f32 %v8325_v50, %v8324_v60  ;;  %v8327_v31 = vpop.f32.mrb[118].mxu0  ;;  %v9561_v60 = vld [vmem:[%s12330_s23 + $0x28] sm:$0xff]  }
 0x8b3   :  { %v8328_v22 = vpop.f32.mrb[119].mxu0 }
 0x8b4   :  { %v8329_v32 = vadd.f32 %v8328_v22, %v8327_v31  ;;  %v5950_v10 = vadd.f32 %v8326_v59, %v5297_v58  ;;  %v9562_v59 = vld [vmem:[%s12330_s23 + $0x70] sm:$0xff]  }
 0x8b6   :  { %v5953_v53 = vadd.f32 %v8329_v32, %v5297_v58 }
 0x8b8   :  { %v8330_v36 = vpop.f32.mrb[120].mxu0 }
 0x8b9   :  { %v8331_v39 = vpop.f32.mrb[121].mxu0 }
 0x8ba   :  { %v8332_v9 = vadd.f32 %v8331_v39, %v8330_v36  ;;  %v8333_v30 = vpop.f32.mrb[122].mxu0 }
 0x8bb   :  { %v8334_v15 = vpop.f32.mrb[123].mxu0 }
 0x8bc   :  { %v5958_v52 = vadd.f32 %v8332_v9, %v5297_v58  ;;  %v9563_v9 = vld [vmem:[%s12330_s23 + $0x30] sm:$0xff]  }
 0x8d0   :  { %v8352_v42 = vpop.f32.mrb[124].mxu0 }
 0x8d1   :  { %v8353_v4 = vpop.f32.mrb[125].mxu0 }
 0x8d2   :  { %v8354_v6 = vadd.f32 %v8353_v4, %v8352_v42  ;;  %v8355_v3 = vpop.f32.mrb[126].mxu0  ;;  %v9548_v42 = vld [vmem:[%s12330_s23 + $0x88] sm:$0xff]  }
 0x8d3   :  { %v8356_v0 = vpop.f32.mrb[127].mxu0 }
 0x8d4   :  { %v5998_v17 = vadd.f32 %v8354_v6, %v5950_v10  ;;  %v8357_v29 = vadd.f32 %v8356_v0, %v8355_v3  ;;  %v9565_v3 = vld [vmem:[%s12330_s23 + $0x38] sm:$0xff]  }
 0x8d6   :  { %v6001_v61 = vadd.f32 %v8357_v29, %v5953_v53  ;;  %v6013_v2 = vmax.f32 %v5998_v17, 0.0  ;;  %v9551_v17 = vld [vmem:[%s12330_s23 + $0x90] sm:$0x3f]  }
 0x8d8   :  { %v6016_v14 = vmax.f32 %v6001_v61, 0.0  ;;  %v8358_v44 = vpop.f32.mrb[128].mxu0 }
 0x8d9   :  { %v8359_v20 = vpop.f32.mrb[129].mxu0 }
 0x8da   :  { %v6894_v8 = vpack.c.bf16 %v6016_v14, %v6013_v2  ;;  %v8360_v43 = vadd.f32 %v8359_v20, %v8358_v44  ;;  %v8361_v48 = vpop.f32.mrb[130].mxu0  ;;  %v7332_v2 = vsel %vm3329_vm6, %v9551_v17, 0 }
 0x8db   :  { %v8362_v40 = vpop.f32.mrb[131].mxu0 }
 0x8dc   :  { %v6006_v49 = vadd.f32 %v8360_v43, %v5958_v52  ;;  %8502 = vmatprep.mubr.msk.bf16.mxu0 %vm4395_vm10, %v6894_v8 }
 0x8de   :  { %v6019_v24 = vmax.f32 %v6006_v49, 0.0 }
 0x8e0   :  { %v6897_v62 = vpack.c.bf16 %v6019_v24, %v6019_v24 }
 0x8e2   :  { %8503 = vmatmul.mubr.msk.bf16.vlgmr.msra.gmra.mrb[140].mxu0 %vm4395_vm10, %v6897_v62 }
 0x8e3   :  { %8454 = vmatpush3.bf16.msra.mxu0 %v9550_v46  ;;  %v6156_v46 = vld [vmem:[%s12332_s20] sm:$0x7] }
 0x8e4   :  { %8455 = vmatprep.subr.bf16.mxu0 %v9552_v25  ;;  %v6169_v62 = vrot.slane %v6156_v46, %v9984_v45 }
 0x8e7   :  { %8456 = vmatpush3.bf16.msra.mxu0 %v9553_v23 }
 0x8e8   :  { %8457 = vmatprep.subr.bf16.mxu0 %v9554_v51 }
 0x8eb   :  { %8458 = vmatpush3.bf16.msra.mxu0 %v9555_v54 }
 0x8ec   :  { %8459 = vmatprep.subr.bf16.mxu0 %v9556_v13 }
 0x8ef   :  { %8460 = vmatpush3.bf16.msra.mxu0 %v9557_v57 }
 0x8f0   :  { %v5898_v16 = vpop.f32.mrb[64].mxu1  ;;  %8461 = vmatprep.subr.bf16.mxu0 %v9558_v26 }
 0x8f1   :  { %v8544_v12 = vadd.f32 %v5898_v16, %v5289_v55  ;;  %v5900_v47 = vpop.f32.mrb[65].mxu1 }
 0x8f2   :  { %v8545_v7 = vadd.f32 %v5900_v47, %v5293_v1  ;;  %v5902_v38 = vpop.f32.mrb[66].mxu1 }
 0x8f3   :  { %v8546_v34 = vadd.f32 %v5902_v38, %v5289_v55  ;;  %v5904_v11 = vpop.f32.mrb[67].mxu1  ;;  %8462 = vmatpush3.bf16.msra.mxu0 %v9559_v21  ;;  %v6011_v31 = vmax.f32 %v8544_v12, 0.0 }
 0x8f4   :  { %v8547_v50 = vadd.f32 %v5904_v11, %v5293_v1  ;;  %8463 = vmatprep.subr.bf16.mxu0 %v9560_v27  ;;  %v6012_v32 = vmax.f32 %v8545_v7, 0.0 }
 0x8f5   :  { %v6014_v22 = vmax.f32 %v8546_v34, 0.0 }
 0x8f6   :  { %v6015_v36 = vmax.f32 %v8547_v50, 0.0 }
 0x8f7   :  { %v6892_v39 = vpack.c.bf16 %v6014_v22, %v6011_v31  ;;  %8464 = vmatpush3.bf16.msra.mxu0 %v9561_v60  ;;  %v30_v31 = vstv %s12333_s22  ;;  %v6161_v22 = vrot.slane %v6156_v46, %v9973_v35 }
 0x8f8   :  { %v6893_v30 = vpack.c.bf16 %v6015_v36, %v6012_v32  ;;  %v5908_v15 = vpop.f32.mrb[68].mxu1  ;;  %8465 = vmatprep.subr.bf16.mxu0 %v9562_v59  ;;  %31 = vst [vmem:[#allocation2] sm:$0x1] %v30_v31  ;;  %v6165_v32 = vrot.slane %v6156_v46, %v9979_v37 }
 0x8f9   :  { %v8548_v41 = vadd.f32 %v5908_v15, %v5289_v55  ;;  %v5910_v58 = vpop.f32.mrb[69].mxu1 }
 0x8fa   :  { %v8549_v4 = vadd.f32 %v5910_v58, %v5293_v1  ;;  %v5912_v10 = vpop.f32.mrb[70].mxu1  ;;  %7097 = vmatprep.mubr.bf16.mxu1 %v6893_v30 }
 0x8fb   :  { %v5913_v6 = vpop.f32.mrb[71].mxu1  ;;  %7098 = vmatmul.mubr.bf16.vlgmr.msra.gmra.mrb[88].mxu1 %v6892_v39  ;;  %8466 = vmatpush3.bf16.msra.mxu0 %v9563_v9  ;;  %v6017_v53 = vmax.f32 %v8548_v41, 0.0 }
 0x8fc   :  { %v6018_v0 = vmax.f32 %v8549_v4, 0.0  ;;  %8507 = vmatpush3.bf16.msra.mxu1 %v12211_v33  ;;  %8467 = vmatprep.subr.bf16.mxu0 %v9564_v18 }
 0x8fd   :  { %8508 = vmatprep.subr.bf16.mxu1 %v9548_v42  ;;  %v6895_v61 = vpack.c.bf16 %v6017_v53, %v6017_v53 }
 0x8fe   :  { %v6896_v29 = vpack.c.bf16 %v6018_v0, %v6018_v0 }
 0x8ff   :  { %8468 = vmatpush3.bf16.msra.mxu0 %v9565_v3 }
 0x900   :  { %7105 = vmatprep.mubr.bf16.mxu1 %v6896_v29  ;;  %8509 = vmatpush3.bf16.msra.mxu1 %v9548_v42 }
 0x901   :  { %8654 = vmatprep.subr.msk.bf16.mxu1 %vm3329_vm6, %v9551_v17 }
 0x903   :  { %7106 = vmatmul.mubr.bf16.gmra.mrb[92].mxu1 %v6895_v61 }
 0x904   :  { %8511 = vmatpush3.bf16.msra.mxu1 %v7332_v2 }
 0x910   :  { %v8380_v14 = vpop.f32.mrb[72].mxu1 }
 0x911   :  { %v8381_v33 = vpop.f32.mrb[73].mxu1 }
 0x912   :  { %v8382_v44 = vadd.f32 %v8381_v33, %v8380_v14  ;;  %v8383_v20 = vpop.f32.mrb[74].mxu1 }
 0x913   :  { %v8384_v52 = vpop.f32.mrb[75].mxu1 }
 0x914   :  { %v8385_v8 = vadd.f32 %v8384_v52, %v8383_v20  ;;  %v6822_v51 = vadd.f32 %v8382_v44, %v6169_v62  ;;  %v32_v20 = vstv %s12334_s24  ;;  %s9581_s24 = smov 3  }
 0x915   :  { %33 = vst [vmem:[#allocation3] sm:$0x1] %v32_v20 }
 0x916   :  { %v6825_v26 = vadd.f32 %v8385_v8, %v6169_v62 }
 0x918   :  { %v8386_v43 = vpop.f32.mrb[76].mxu1 }
 0x919   :  { %v8387_v48 = vpop.f32.mrb[77].mxu1 }
 0x91a   :  { %v8388_v40 = vadd.f32 %v8387_v48, %v8386_v43  ;;  %v8389_v49 = vpop.f32.mrb[78].mxu1 }
 0x91b   :  { %v8390_v24 = vpop.f32.mrb[79].mxu1  ;;  %v8147_v49 = vld [vmem:[#allocation2] ss:$0 sm:$0xff] }
 0x91c   :  { %v6830_v7 = vadd.f32 %v8388_v40, %v6169_v62 }
 0x932   :  { %v8408_v25 = vpop.f32.mrb[80].mxu1 }
 0x933   :  { %v8409_v23 = vpop.f32.mrb[81].mxu1 }
 0x934   :  { %v8410_v54 = vadd.f32 %v8409_v23, %v8408_v25  ;;  %v8411_v13 = vpop.f32.mrb[82].mxu1 }
 0x935   :  { %v8412_v57 = vpop.f32.mrb[83].mxu1 }
 0x936   :  { %v6870_v55 = vadd.f32 %v8410_v54, %v6822_v51  ;;  %v8413_v1 = vadd.f32 %v8412_v57, %v8411_v13 }
 0x938   :  { %v6873_v21 = vadd.f32 %v8413_v1, %v6825_v26  ;;  %v6885_v16 = vmax.f32 %v6870_v55, 0.0 }
 0x93a   :  { %v6888_v27 = vmax.f32 %v6873_v21, 0.0  ;;  %v8414_v12 = vpop.f32.mrb[84].mxu1 }
 0x93b   :  { %v8415_v47 = vpop.f32.mrb[85].mxu1 }
 0x93c   :  { %v7163_v38 = vpack.c.bf16 %v6888_v27, %v6885_v16  ;;  %v8416_v34 = vadd.f32 %v8415_v47, %v8414_v12  ;;  %v8417_v11 = vpop.f32.mrb[86].mxu1 }
 0x93d   :  { %v8418_v60 = vpop.f32.mrb[87].mxu1 }
 0x93e   :  { %v6878_v45 = vadd.f32 %v8416_v34, %v6830_v7  ;;  %8512 = vmatprep.mubr.msk.bf16.mxu1 %vm4395_vm10, %v7163_v38  ;;  %v8169_v60 = vld [vmem:[#allocation3] ss:$0 sm:$0xff] }
 0x940   :  { %v6891_v50 = vmax.f32 %v6878_v45, 0.0 }
 0x942   :  { %v7166_v59 = vpack.c.bf16 %v6891_v50, %v6891_v50 }
 0x944   :  { %8513 = vmatmul.mubr.msk.bf16.vlgmr.msra.gmra.mrb[96].mxu1 %vm4395_vm10, %v7166_v59 }
 0x951   :  { %v6770_v36 = vpop.f32.mrb[132].mxu0 }
 0x952   :  { %v8550_v39 = vadd.f32 %v6770_v36, %v6161_v22  ;;  %v6772_v9 = vpop.f32.mrb[133].mxu0 }
 0x953   :  { %v8551_v30 = vadd.f32 %v6772_v9, %v6165_v32  ;;  %v6774_v15 = vpop.f32.mrb[134].mxu0 }
 0x954   :  { %v8552_v18 = vadd.f32 %v6774_v15, %v6161_v22  ;;  %v6776_v41 = vpop.f32.mrb[135].mxu0  ;;  %v6883_v42 = vmax.f32 %v8550_v39, 0.0 }
 0x955   :  { %v8553_v58 = vadd.f32 %v6776_v41, %v6165_v32  ;;  %v6884_v10 = vmax.f32 %v8551_v30, 0.0 }
 0x956   :  { %v6886_v4 = vmax.f32 %v8552_v18, 0.0 }
 0x957   :  { %v6887_v6 = vmax.f32 %v8553_v58, 0.0 }
 0x958   :  { %v7161_v3 = vpack.c.bf16 %v6886_v4, %v6883_v42 }
 0x959   :  { %v7162_v0 = vpack.c.bf16 %v6887_v6, %v6884_v10  ;;  %v6780_v53 = vpop.f32.mrb[136].mxu0 }
 0x95a   :  { %v8554_v17 = vadd.f32 %v6780_v53, %v6161_v22  ;;  %v6782_v29 = vpop.f32.mrb[137].mxu0 }
 0x95b   :  { %v8555_v35 = vadd.f32 %v6782_v29, %v6165_v32  ;;  %v6784_v61 = vpop.f32.mrb[138].mxu0  ;;  %7366 = vmatprep.mubr.bf16.mxu0 %v7162_v0 }
 0x95c   :  { %v6785_v37 = vpop.f32.mrb[139].mxu0  ;;  %7367 = vmatmul.mubr.bf16.vlgmr.msra.gmra.mrb[144].mxu0 %v7161_v3  ;;  %v6889_v14 = vmax.f32 %v8554_v17, 0.0 }
 0x95d   :  { %v6890_v2 = vmax.f32 %v8555_v35, 0.0 }
 0x95e   :  { %v7164_v44 = vpack.c.bf16 %v6889_v14, %v6889_v14 }
 0x95f   :  { %v7165_v33 = vpack.c.bf16 %v6890_v2, %v6890_v2 }
 0x961   :  { %7374 = vmatprep.mubr.bf16.mxu0 %v7165_v33 }
 0x964   :  { %7375 = vmatmul.mubr.bf16.gmra.mrb[148].mxu0 %v7164_v44 }
 0x9b5   :  { %v8504_v52 = vpop.f32.mrb[140].mxu0 }
 0x9b6   :  { %v7147_v8 = vpop.f32.mrb[141].mxu0 }
 0x9b7   :  { %v8505_v43 = vpop.f32.mrb[142].mxu0 }
 0x9b8   :  { %v7150_v48 = vpop.f32.mrb[143].mxu0 }
 0x9ce   :  { %v8436_v40 = vpop.f32.mrb[88].mxu1 }
 0x9cf   :  { %v8437_v24 = vpop.f32.mrb[89].mxu1 }
 0x9d0   :  { %v8438_v46 = vadd.f32 %v8437_v24, %v8436_v40  ;;  %v8439_v62 = vpop.f32.mrb[90].mxu1 }
 0x9d1   :  { %v8440_v25 = vpop.f32.mrb[91].mxu1 }
 0x9d2   :  { %v7100_v23 = vadd.f32 %v8438_v46, %v8147_v49  ;;  %v8441_v51 = vadd.f32 %v8440_v25, %v8439_v62 }
 0x9d4   :  { %v7103_v54 = vadd.f32 %v8441_v51, %v8147_v49  ;;  %v7148_v13 = vadd.f32 %v7147_v8, %v7100_v23 }
 0x9d6   :  { %v7151_v57 = vadd.f32 %v7150_v48, %v7103_v54  ;;  %v8442_v26 = vpop.f32.mrb[92].mxu1 }
 0x9d7   :  { %v8443_v55 = vpop.f32.mrb[93].mxu1 }
 0x9d8   :  { %v8444_v1 = vadd.f32 %v8443_v55, %v8442_v26  ;;  %v8445_v21 = vpop.f32.mrb[94].mxu1 }
 0x9d9   :  { %v8446_v16 = vpop.f32.mrb[95].mxu1 }
 0x9da   :  { %v7108_v27 = vadd.f32 %v8444_v1, %v8147_v49 }
 0x9dc   :  { %v7156_v12 = vadd.f32 %v8504_v52, %v7108_v27 }
 0xa17   :  { %v8514_v47 = vpop.f32.mrb[96].mxu1 }
 0xa18   :  { %v7416_v7 = vpop.f32.mrb[97].mxu1 }
 0xa19   :  { %v8515_v38 = vpop.f32.mrb[98].mxu1 }
 0xa1a   :  { %v7419_v34 = vpop.f32.mrb[99].mxu1 }
 0xa2f   :  { %v8469_v11 = vpop.f32.mrb[144].mxu0 }
 0xa30   :  { %v8470_v45 = vpop.f32.mrb[145].mxu0 }
 0xa31   :  { %v8471_v50 = vadd.f32 %v8470_v45, %v8469_v11  ;;  %v8472_v59 = vpop.f32.mrb[146].mxu0 }
 0xa32   :  { %v8473_v31 = vpop.f32.mrb[147].mxu0 }
 0xa33   :  { %v7369_v22 = vadd.f32 %v8471_v50, %v8169_v60  ;;  %v8474_v32 = vadd.f32 %v8473_v31, %v8472_v59 }
 0xa35   :  { %v7372_v36 = vadd.f32 %v8474_v32, %v8169_v60  ;;  %v7417_v39 = vadd.f32 %v7416_v7, %v7369_v22 }
 0xa37   :  { %v7420_v9 = vadd.f32 %v7419_v34, %v7372_v36  ;;  %v8475_v30 = vpop.f32.mrb[148].mxu0  ;;  %v7430_v15 = vmin.f32 %v7148_v13, %v7417_v39 }
 0xa38   :  { %v8476_v18 = vpop.f32.mrb[149].mxu0 }
 0xa39   :  { %v8477_v41 = vadd.f32 %v8476_v18, %v8475_v30  ;;  %v8478_v58 = vpop.f32.mrb[150].mxu0  ;;  %7436 = vrot.lane.b32.xlu0 %v7430_v15, %s9581_s24  ;;  %v7431_v42 = vmin.f32 %v7151_v57, %v7420_v9 }
 0xa3a   :  { %v8479_v4 = vpop.f32.mrb[151].mxu0 }
 0xa3b   :  { %v7377_v10 = vadd.f32 %v8477_v41, %v8169_v60 }
 0xa3d   :  { %7438 = vrot.lane.b32.xlu0 %v7431_v42, %s9581_s24  ;;  %v7425_v6 = vadd.f32 %v8514_v47, %v7377_v10 }
 0xa3f   :  { %v7432_v3 = vmin.f32 %v7156_v12, %v7425_v6 }
 0xa41   :  { %7440 = vrot.lane.b32.xlu1 %v7432_v3, %s9581_s24 }
 0xaab   :  { %v7437_v0 = vpop.permute.xlu0 %7436 }
 0xaac   :  { %v7445_v53 = vsel %vm3183_vm7, %v7928_v56, %v7437_v0 }
 0xaad   :  { %7449 = vst.msk [vmem:[%s12335_s25] sm:$0xff] %vm7448_vm11, %v7445_v53 }
 0xaaf   :  { %v7439_v17 = vpop.permute.xlu0 %7438 }
 0xab0   :  { %v7446_v29 = vsel %vm3183_vm7, %v7929_v63, %v7439_v17 }
 0xab1   :  { %7450 = vst.msk [vmem:[%s12335_s25 + $0x8] sm:$0xff] %vm7448_vm11, %v7446_v29 }
 0xab3   :  { %v7441_v35 = vpop.permute.xlu1 %7440 }
 0xab4   :  { %v7447_v61 = vsel %vm3183_vm7, %v11400_v28, %v7441_v35 }
 0xab5   :  { %7451 = vst.msk [vmem:[%s12335_s25 + $0x10] sm:$0xff] %vm7448_vm11, %v7447_v61 }

</bundles_post_ra>
